<compile_context>
chip_gen: v7x
topology: tpu7x:2x2x1
jax: 0.10.0
libtpu: 0.0.40
codegen_flags: <defaults>
</compile_context>

<pallas_src>
import math
import functools

import jax
import jax.numpy as jnp
from jax import lax
from jax.experimental import pallas as pl
from jax.experimental.pallas import tpu as pltpu


# ----------------------------------------------------------------------------
# In-kernel helpers
# ----------------------------------------------------------------------------
def _ln(x, gamma, beta, eps):
    mean = jnp.mean(x, axis=-1, keepdims=True)
    var = jnp.mean(jnp.square(x - mean), axis=-1, keepdims=True)
    return (x - mean) * lax.rsqrt(var + eps) * gamma + beta


# ----------------------------------------------------------------------------
# Fully-fused encoder kernel: grid = (batch, layer), layer axis "arbitrary".
# One grid step = one batch element x one encoder layer; the sequence state is
# resident in the output block across the layer axis.  The class-head logit is
# produced as a lane-dense (1, S) epilogue on the last layer step.
# ----------------------------------------------------------------------------
def _fused_encoder_kernel(src_ref, pos_ref,
                          wq_ref, bq_ref, wk_ref, bk_ref, wv_ref, bv_ref,
                          wo_ref, bo_ref,
                          g1_ref, beta1_ref,
                          w1_ref, b1_ref, w2_ref, b2_ref,
                          g2_ref, beta2_ref,
                          clsw_ref, clsb_ref,
                          out_ref, logits_ref, *, num_heads, eps):
    l = pl.program_id(1)
    n_layers = pl.num_programs(1)

    # Layer 0: seed the resident sequence state from src.
    @pl.when(l == 0)
    def _():
        out_ref[...] = src_ref[...]

    x = out_ref[...].astype(jnp.float32)                      # (S, D) running state
    pos = pos_ref[...].astype(jnp.float32)
    S, D = x.shape
    dh = D // num_heads
    scale = 1.0 / math.sqrt(dh)

    # bf16 MXU operands, f32 accumulation.
    qk_in = (x + pos).astype(jnp.bfloat16)
    x16 = x.astype(jnp.bfloat16)

    q = jnp.dot(qk_in, wq_ref[...], preferred_element_type=jnp.float32) + bq_ref[...]
    k = jnp.dot(qk_in, wk_ref[...], preferred_element_type=jnp.float32) + bk_ref[...]
    v = jnp.dot(x16, wv_ref[...], preferred_element_type=jnp.float32) + bv_ref[...]

    q = (q * scale).astype(jnp.bfloat16)    # fold 1/sqrt(dh) into q once (one (S,D) multiply)
    k = k.astype(jnp.bfloat16)
    v = v.astype(jnp.bfloat16)

    # Per-head attention; head outputs are lane-concatenated and projected with ONE
    # (S,D)@(D,D) matmul instead of H matmuls with K=dh.
    heads = []
    for h in range(num_heads):
        lo = h * dh
        hi = lo + dh
        qh = q[:, lo:hi]                                       # (S, dh)
        kh = k[:, lo:hi]
        vh = v[:, lo:hi]
        # q @ k^T without materializing a transpose: contract last dims of both operands.
        s = lax.dot_general(qh, kh, (((1,), (1,)), ((), ())),
                            preferred_element_type=jnp.float32)
        s = s - jnp.max(s, axis=-1, keepdims=True)             # f32 softmax
        p = jnp.exp(s)
        p = p * pl.reciprocal(jnp.sum(p, axis=-1, keepdims=True), approx=True)
        heads.append(jnp.dot(p.astype(jnp.bfloat16), vh,
                             preferred_element_type=jnp.float32))
    o = jnp.concatenate(heads, axis=-1).astype(jnp.bfloat16)   # (S, D)
    o = jnp.dot(o, wo_ref[...], preferred_element_type=jnp.float32) + bo_ref[...]

    # residual + LayerNorm 1 (f32)
    x1 = _ln(x + o, g1_ref[...], beta1_ref[...], eps)
    # FFN (bf16 operands, f32 accumulation / activation)
    ff = jnp.maximum(
        jnp.dot(x1.astype(jnp.bfloat16), w1_ref[...],
                preferred_element_type=jnp.float32) + b1_ref[...], 0.0)
    ff = jnp.dot(ff.astype(jnp.bfloat16), w2_ref[...],
                 preferred_element_type=jnp.float32) + b2_ref[...]
    # residual + LayerNorm 2 (f32)
    x2 = _ln(x1 + ff, g2_ref[...], beta2_ref[...], eps)
    out_ref[...] = x2.astype(out_ref.dtype)

    # Epilogue on the last layer: class_embed column 0, written lane-dense as (1, S).
    @pl.when(l == n_layers - 1)
    def _():
        logits = lax.dot_general(clsw_ref[...], x2.astype(jnp.bfloat16),
                                 (((1,), (1,)), ((), ())),
                                 preferred_element_type=jnp.float32) + clsb_ref[...]
        logits_ref[...] = logits.astype(logits_ref.dtype)


def pallas_box_encoder(params, src, pos, *, num_heads, eps=1e-5):
    B, S, D = src.shape
    lw = params["layer_stack"]
    L = lw["wq"].shape[0]
    dff = lw["lin1_w"].shape[-1]

    seq = pl.BlockSpec((None, S, D), lambda b, l: (b, 0, 0))

    def per_layer(*tail):
        return pl.BlockSpec((None,) + tail, lambda b, l, _n=len(tail): (l,) + (0,) * _n)

    def fixed(shape):
        return pl.BlockSpec(shape, lambda b, l, _n=len(shape): (0,) * _n)

    out, logits = pl.pallas_call(
        functools.partial(_fused_encoder_kernel, num_heads=num_heads, eps=eps),
        out_shape=(jax.ShapeDtypeStruct((B, S, D), src.dtype),
                   jax.ShapeDtypeStruct((B, 1, S), jnp.float32)),
        grid=(B, L),
        in_specs=[
            seq, seq,
            per_layer(D, D), per_layer(1, D),        # wq, bq
            per_layer(D, D), per_layer(1, D),        # wk, bk
            per_layer(D, D), per_layer(1, D),        # wv, bv
            per_layer(D, D), per_layer(1, D),        # wo, bo
            per_layer(1, D), per_layer(1, D),        # norm1 gamma / beta
            per_layer(D, dff), per_layer(1, dff),    # lin1
            per_layer(dff, D), per_layer(1, D),      # lin2
            per_layer(1, D), per_layer(1, D),        # norm2 gamma / beta
            fixed((1, D)), fixed((1, 1)),            # class_embed column 0
        ],
        out_specs=(pl.BlockSpec((None, S, D), lambda b, l: (b, 0, 0)),
                   pl.BlockSpec((None, 1, S), lambda b, l: (b, 0, 0))),
        compiler_params=pltpu.CompilerParams(
            dimension_semantics=("parallel", "arbitrary"),
            vmem_limit_bytes=32 * 1024 * 1024),
    )(src, pos,
      lw["wq"], lw["bq"], lw["wk"], lw["bk"], lw["wv"], lw["bv"],
      lw["wo"], lw["bo"],
      lw["norm1_g"], lw["norm1_b"],
      lw["lin1_w"], lw["lin1_b"], lw["lin2_w"], lw["lin2_b"],
      lw["norm2_g"], lw["norm2_b"],
      params["class_w_col"], params["class_b0"])
    return out, logits[:, 0, :]


# ----------------------------------------------------------------------------
# Fused proposal head: enc_linear + LayerNorm  and  3-layer bbox MLP, one kernel
# (operates on the B*Q gathered queries; box output is 4-wide — tiny, accepted).
# ----------------------------------------------------------------------------
def _proposal_head_kernel(x_ref,
                          encw_ref, encb_ref, encg_ref, encbeta_ref,
                          bw1_ref, bb1_ref, bw2_ref, bb2_ref, bw3_ref, bb3_ref,
                          embed_ref, box_ref, *, eps):
    x = x_ref[...].astype(jnp.float32)
    x16 = x.astype(jnp.bfloat16)
    # enc_linear = Linear(d, d) + LayerNorm(d)
    e = jnp.dot(x16, encw_ref[...], preferred_element_type=jnp.float32) + encb_ref[...]
    embed_ref[...] = _ln(e, encg_ref[...], encbeta_ref[...], eps).astype(embed_ref.dtype)
    # bbox_embed: 3-layer MLP (relu, relu, linear) on the gathered (pre-enc_linear) queries
    h = jnp.maximum(
        jnp.dot(x16, bw1_ref[...], preferred_element_type=jnp.float32) + bb1_ref[...], 0.0)
    h = jnp.maximum(
        jnp.dot(h.astype(jnp.bfloat16), bw2_ref[...],
                preferred_element_type=jnp.float32) + bb2_ref[...], 0.0)
    box_ref[...] = (jnp.dot(h.astype(jnp.bfloat16), bw3_ref[...],
                            preferred_element_type=jnp.float32) + bb3_ref[...]
                    ).astype(box_ref.dtype)


def pallas_proposal_head(params, gathered, eps=1e-5):
    B, Q, D = gathered.shape
    n = B * Q
    x2 = gathered.reshape(n, D)

    def full(shape):
        return pl.BlockSpec(shape, lambda i, _n=len(shape): (0,) * _n)

    embed, box = pl.pallas_call(
        functools.partial(_proposal_head_kernel, eps=eps),
        out_shape=(jax.ShapeDtypeStruct((n, D), gathered.dtype),
                   jax.ShapeDtypeStruct((n, 4), gathered.dtype)),
        grid=(1,),
        in_specs=[
            full((n, D)),
            full((D, D)), full((1, D)), full((1, D)), full((1, D)),
            full((D, D)), full((1, D)),
            full((D, D)), full((1, D)),
            full((D, 4)), full((1, 4)),
        ],
        out_specs=(full((n, D)), full((n, 4))),
        compiler_params=pltpu.CompilerParams(vmem_limit_bytes=32 * 1024 * 1024),
    )(x2,
      params["enc_w"], params["enc_b"], params["enc_g"], params["enc_beta"],
      params["bbox"]["w1"], params["bbox"]["b1"],
      params["bbox"]["w2"], params["bbox"]["b2"],
      params["bbox"]["w3"], params["bbox"]["b3"])
    return embed.reshape(B, Q, D), box.reshape(B, Q, 4)


# ----------------------------------------------------------------------------
# Module glue (plain JAX, under jit)
# ----------------------------------------------------------------------------
def inverse_sigmoid(x, eps=1e-5):
    x = jnp.clip(x, 0.0, 1.0)
    x1 = jnp.maximum(x, eps)
    x2 = jnp.maximum(1.0 - x, eps)
    return jnp.log(x1 / x2)


def get_proposal_pos_embed(proposals, hidden_dim):
    # proposals: (..., 2) -> (..., hidden_dim)  (sin/cos interleave, DETR-style)
    num_pos_feats = hidden_dim // 2
    temperature = 10000.0
    scale = 2.0 * math.pi
    dim_t = jnp.arange(num_pos_feats, dtype=jnp.float32)
    dim_t = temperature ** (2.0 * jnp.floor_divide(dim_t, 2.0) / num_pos_feats)
    proposals = proposals * scale
    pos = proposals[..., None] / dim_t                      # (..., 2, num_pos_feats)
    pos = jnp.stack((jnp.sin(pos[..., 0::2]), jnp.cos(pos[..., 1::2])), axis=-1)
    pos = pos.reshape(*pos.shape[:-3], -1)                  # flatten last 3 dims
    return pos


def get_enc_proposals(params, output, out_logits, src_mask, ref_windows,
                      *, num_queries, d_model):
    ref_windows_valid = jnp.all(
        (ref_windows[..., :2] > 0.01) & (ref_windows[..., :2] < 0.99), axis=-1)
    if src_mask is not None:
        src_mask = src_mask & (~ref_windows_valid)
    else:
        src_mask = ~ref_windows_valid
    # NOTE: the reference calls `out_logits.masked_fill(src_mask, -65504.0)` *out of place*
    # and discards the result, so the mask does not affect top-k; reproduced faithfully.
    _ = src_mask

    _, indexes = lax.top_k(out_logits, num_queries)          # (B, Q)
    idx = indexes[..., None]                                  # (B, Q, 1)
    gathered = jnp.take_along_axis(
        output, jnp.broadcast_to(idx, idx.shape[:-1] + (d_model,)), axis=1)
    ref_g = jnp.take_along_axis(
        ref_windows, jnp.broadcast_to(idx, idx.shape[:-1] + (4,)), axis=1)

    # fused enc_linear+LayerNorm and bbox MLP on the gathered queries
    out_embed, tmp_box = pallas_proposal_head(params, gathered)

    tmp_box = tmp_box + inverse_sigmoid(ref_g)
    out_ref_windows = jax.nn.sigmoid(tmp_box)

    pos = get_proposal_pos_embed(out_ref_windows[..., :2], d_model)
    size = get_proposal_pos_embed(out_ref_windows[..., 2:], d_model)
    out_pos = pos + size
    return out_embed, out_ref_windows, out_pos


@functools.partial(jax.jit, static_argnames=("num_heads", "num_queries", "d_model"))
def box_transformer_encoder_forward(params, src, pos, src_shape, src_mask,
                                    src_start_index, src_valid_ratios, ref_windows,
                                    *, num_heads, num_queries, d_model):
    del src_shape, src_start_index, src_valid_ratios  # only used by the external BoxAttention layer
    # One launch for all encoder layers + class-head logit epilogue.
    output, out_logits = pallas_box_encoder(params, src, pos, num_heads=num_heads)
    out_embed, out_ref_windows, out_pos = get_enc_proposals(
        params, output, out_logits, src_mask, ref_windows,
        num_queries=num_queries, d_model=d_model)
    return output, out_embed, out_ref_windows, out_pos


# ----------------------------------------------------------------------------
# Deterministic parameter construction (weights stored bf16 for MXU operands,
# biases / LayerNorm parameters stay f32).
# ----------------------------------------------------------------------------
def init_params(key, d_model, num_layers, num_heads, dim_ff, num_queries, num_classes):
    del num_heads, num_queries  # static config passed separately to the forward
    keys = iter(jax.random.split(key, 256))

    def dense(din, dout):
        w = jax.random.normal(next(keys), (din, dout), jnp.float32) * 0.02
        b = jnp.zeros((dout,), jnp.float32)
        return w, b

    wq, bq, wk, bk, wv, bv, wo, bo = ([] for _ in range(8))
    n1g, n1b, l1w, l1b, l2w, l2b, n2g, n2b = ([] for _ in range(8))
    for _ in range(num_layers):
        w, b = dense(d_model, d_model); wq.append(w); bq.append(b.reshape(1, -1))
        w, b = dense(d_model, d_model); wk.append(w); bk.append(b.reshape(1, -1))
        w, b = dense(d_model, d_model); wv.append(w); bv.append(b.reshape(1, -1))
        w, b = dense(d_model, d_model); wo.append(w); bo.append(b.reshape(1, -1))
        n1g.append(jnp.ones((1, d_model), jnp.float32))
        n1b.append(jnp.zeros((1, d_model), jnp.float32))
        w, b = dense(d_model, dim_ff);  l1w.append(w); l1b.append(b.reshape(1, -1))
        w, b = dense(dim_ff, d_model);  l2w.append(w); l2b.append(b.reshape(1, -1))
        n2g.append(jnp.ones((1, d_model), jnp.float32))
        n2b.append(jnp.zeros((1, d_model), jnp.float32))

    bf16 = lambda lst: jnp.stack(lst, axis=0).astype(jnp.bfloat16)
    f32 = lambda lst: jnp.stack(lst, axis=0)

    layer_stack = dict(
        wq=bf16(wq), bq=f32(bq), wk=bf16(wk), bk=f32(bk),
        wv=bf16(wv), bv=f32(bv), wo=bf16(wo), bo=f32(bo),
        norm1_g=f32(n1g), norm1_b=f32(n1b),
        lin1_w=bf16(l1w), lin1_b=f32(l1b),
        lin2_w=bf16(l2w), lin2_b=f32(l2b),
        norm2_g=f32(n2g), norm2_b=f32(n2b),
    )

    class_w, class_b = dense(d_model, num_classes)            # detector[0].class_embed
    bw1, bb1 = dense(d_model, d_model)                        # detector[0].bbox_embed (3-layer MLP)
    bw2, bb2 = dense(d_model, d_model)
    bw3, bb3 = dense(d_model, 4)
    enc_w, enc_b = dense(d_model, d_model)                    # enc_linear[0]

    return dict(
        layer_stack=layer_stack,
        # only logit column 0 feeds top-k in the reference -> keep just that column (lane-dense row)
        class_w_col=class_w[:, :1].T.astype(jnp.bfloat16),    # (1, D)
        class_b0=class_b[:1].reshape(1, 1),
        bbox=dict(w1=bw1.astype(jnp.bfloat16), b1=bb1.reshape(1, -1),
                  w2=bw2.astype(jnp.bfloat16), b2=bb2.reshape(1, -1),
                  w3=bw3.astype(jnp.bfloat16), b3=bb3.reshape(1, -1)),
        enc_w=enc_w.astype(jnp.bfloat16), enc_b=enc_b.reshape(1, -1),
        enc_g=jnp.ones((1, d_model), jnp.float32),
        enc_beta=jnp.zeros((1, d_model), jnp.float32),
    )


# ----------------------------------------------------------------------------
if __name__ == "__main__":
    B, S, D = 2, 128, 32
    NUM_HEADS, DIM_FF, NUM_LAYERS = 4, 64, 2
    NUM_QUERIES, NUM_CLASSES = 16, 8

    root = jax.random.PRNGKey(0)
    k_par, k_src, k_pos, k_ref = jax.random.split(root, 4)

    params = init_params(k_par, D, NUM_LAYERS, NUM_HEADS, DIM_FF, NUM_QUERIES, NUM_CLASSES)

    src = jax.random.normal(k_src, (B, S, D), jnp.float32)
    pos = jax.random.normal(k_pos, (B, S, D), jnp.float32)
    ref_windows = jax.random.uniform(k_ref, (B, S, 4), jnp.float32, minval=0.02, maxval=0.98)
    src_mask = None           # module supports src_mask=None
    src_shape = None
    src_start_index = None
    src_valid_ratios = None

    output, out_embed, out_ref_windows, out_pos = box_transformer_encoder_forward(
        params, src, pos, src_shape, src_mask, src_start_index, src_valid_ratios, ref_windows,
        num_heads=NUM_HEADS, num_queries=NUM_QUERIES, d_model=D)

    jax.block_until_ready((output, out_embed, out_ref_windows, out_pos))

    assert output.shape == (B, S, D)
    assert out_embed.shape == (B, NUM_QUERIES, D)
    assert out_ref_windows.shape == (B, NUM_QUERIES, 4)
    assert out_pos.shape == (B, NUM_QUERIES, D)
    print("KERNEL_OK")
</pallas_src>

<mosaic_0001>
module attributes {stable_mosaic.version = 11 : i64} {
  func.func @_fused_encoder_kernel(%arg0: i32, %arg1: i32, %arg2: memref<1x128x32xf32, #tpu.memory_space<vmem>>, %arg3: memref<1x128x32xf32, #tpu.memory_space<vmem>>, %arg4: memref<1x32x32xbf16, #tpu.memory_space<vmem>>, %arg5: memref<1x1x32xf32, #tpu.memory_space<vmem>>, %arg6: memref<1x32x32xbf16, #tpu.memory_space<vmem>>, %arg7: memref<1x1x32xf32, #tpu.memory_space<vmem>>, %arg8: memref<1x32x32xbf16, #tpu.memory_space<vmem>>, %arg9: memref<1x1x32xf32, #tpu.memory_space<vmem>>, %arg10: memref<1x32x32xbf16, #tpu.memory_space<vmem>>, %arg11: memref<1x1x32xf32, #tpu.memory_space<vmem>>, %arg12: memref<1x1x32xf32, #tpu.memory_space<vmem>>, %arg13: memref<1x1x32xf32, #tpu.memory_space<vmem>>, %arg14: memref<1x32x64xbf16, #tpu.memory_space<vmem>>, %arg15: memref<1x1x64xf32, #tpu.memory_space<vmem>>, %arg16: memref<1x64x32xbf16, #tpu.memory_space<vmem>>, %arg17: memref<1x1x32xf32, #tpu.memory_space<vmem>>, %arg18: memref<1x1x32xf32, #tpu.memory_space<vmem>>, %arg19: memref<1x1x32xf32, #tpu.memory_space<vmem>>, %arg20: memref<1x32xbf16, #tpu.memory_space<vmem>>, %arg21: memref<1x1xf32, #tpu.memory_space<vmem>>, %arg22: memref<1x128x32xf32, #tpu.memory_space<vmem>>, %arg23: memref<1x1x128xf32, #tpu.memory_space<vmem>>) attributes {dimension_semantics = [#tpu.dimension_semantics<parallel>, #tpu.dimension_semantics<arbitrary>], iteration_bounds = array<i64: 2, 2>, scalar_prefetch = 0 : i64, scratch_operands = 0 : i64, tpu.core_type = #tpu.core_type<tc>, window_params = [{transform_indices = @transform_0, window_bounds = array<i64: 1, 128, 32>}, {transform_indices = @transform_1, window_bounds = array<i64: 1, 128, 32>}, {transform_indices = @transform_2, window_bounds = array<i64: 1, 32, 32>}, {transform_indices = @transform_3, window_bounds = array<i64: 1, 1, 32>}, {transform_indices = @transform_4, window_bounds = array<i64: 1, 32, 32>}, {transform_indices = @transform_5, window_bounds = array<i64: 1, 1, 32>}, {transform_indices = @transform_6, window_bounds = array<i64: 1, 32, 32>}, {transform_indices = @transform_7, window_bounds = array<i64: 1, 1, 32>}, {transform_indices = @transform_8, window_bounds = array<i64: 1, 32, 32>}, {transform_indices = @transform_9, window_bounds = array<i64: 1, 1, 32>}, {transform_indices = @transform_10, window_bounds = array<i64: 1, 1, 32>}, {transform_indices = @transform_11, window_bounds = array<i64: 1, 1, 32>}, {transform_indices = @transform_12, window_bounds = array<i64: 1, 32, 64>}, {transform_indices = @transform_13, window_bounds = array<i64: 1, 1, 64>}, {transform_indices = @transform_14, window_bounds = array<i64: 1, 64, 32>}, {transform_indices = @transform_15, window_bounds = array<i64: 1, 1, 32>}, {transform_indices = @transform_16, window_bounds = array<i64: 1, 1, 32>}, {transform_indices = @transform_17, window_bounds = array<i64: 1, 1, 32>}, {pipeline_mode = #tpu.pipeline_mode<synchronous>, transform_indices = @transform_18, window_bounds = array<i64: 1, 32>}, {pipeline_mode = #tpu.pipeline_mode<synchronous>, transform_indices = @transform_19, window_bounds = array<i64: 1, 1>}, {transform_indices = @transform_20, window_bounds = array<i64: 1, 128, 32>}, {transform_indices = @transform_21, window_bounds = array<i64: 1, 1, 128>}]} {
    %c0_i32 = arith.constant 0 : i32
    %0 = arith.cmpi eq, %arg1, %c0_i32 : i32
    %1 = arith.extui %0 : i1 to i32
    %c0_i32_0 = arith.constant 0 : i32
    %2 = arith.cmpi ne, %1, %c0_i32_0 : i32
    scf.if %2 {
      %c0_91 = arith.constant 0 : index
      %c0_92 = arith.constant 0 : index
      %c0_93 = arith.constant 0 : index
      %187 = vector.load %arg2[%c0_91, %c0_92, %c0_93] : memref<1x128x32xf32, #tpu.memory_space<vmem>>, vector<1x128x32xf32>
      %188 = vector.shape_cast %187 : vector<1x128x32xf32> to vector<128x32xf32>
      %c0_94 = arith.constant 0 : index
      %c0_95 = arith.constant 0 : index
      %c0_96 = arith.constant 0 : index
      %189 = vector.load %arg22[%c0_94, %c0_95, %c0_96] : memref<1x128x32xf32, #tpu.memory_space<vmem>>, vector<1x128x32xf32>
      %190 = vector.shape_cast %189 : vector<1x128x32xf32> to vector<128x32xf32>
      %191 = vector.shape_cast %188 : vector<128x32xf32> to vector<1x128x32xf32>
      tpu.vector_store %arg22[%c0_94, %c0_95, %c0_96], %191 {strides = array<i32>} : memref<1x128x32xf32, #tpu.memory_space<vmem>>, vector<1x128x32xf32>,
    } else {
    }
    %c0 = arith.constant 0 : index
    %c0_1 = arith.constant 0 : index
    %c0_2 = arith.constant 0 : index
    %3 = vector.load %arg22[%c0, %c0_1, %c0_2] : memref<1x128x32xf32, #tpu.memory_space<vmem>>, vector<1x128x32xf32>
    %4 = vector.shape_cast %3 : vector<1x128x32xf32> to vector<128x32xf32>
    %c0_3 = arith.constant 0 : index
    %c0_4 = arith.constant 0 : index
    %c0_5 = arith.constant 0 : index
    %5 = vector.load %arg3[%c0_3, %c0_4, %c0_5] : memref<1x128x32xf32, #tpu.memory_space<vmem>>, vector<1x128x32xf32>
    %6 = vector.shape_cast %5 : vector<1x128x32xf32> to vector<128x32xf32>
    %7 = arith.addf %4, %6 : vector<128x32xf32>
    %8 = arith.truncf %7 : vector<128x32xf32> to vector<128x32xbf16>
    %9 = arith.truncf %4 : vector<128x32xf32> to vector<128x32xbf16>
    %c0_6 = arith.constant 0 : index
    %c0_7 = arith.constant 0 : index
    %c0_8 = arith.constant 0 : index
    %10 = vector.load %arg4[%c0_6, %c0_7, %c0_8] : memref<1x32x32xbf16, #tpu.memory_space<vmem>>, vector<1x32x32xbf16>
    %11 = vector.shape_cast %10 : vector<1x32x32xbf16> to vector<32x32xbf16>
    %cst = arith.constant dense<0.000000e+00> : vector<128x32xf32>
    %12 = tpu.matmul %8, %11, %cst {dimension_numbers = #tpu.dot_dimension_numbers<[1], [0], [0], [1], [0, 0, 1, 1], [], []>} : vector<128x32xbf16>, vector<32x32xbf16>, vector<128x32xf32> -> vector<128x32xf32>
    %c0_9 = arith.constant 0 : index
    %c0_10 = arith.constant 0 : index
    %c0_11 = arith.constant 0 : index
    %13 = vector.load %arg5[%c0_9, %c0_10, %c0_11] : memref<1x1x32xf32, #tpu.memory_space<vmem>>, vector<1x1x32xf32>
    %14 = vector.shape_cast %13 : vector<1x1x32xf32> to vector<1x32xf32>
    %15 = vector.broadcast %14 : vector<1x32xf32> to vector<128x32xf32>
    %16 = arith.addf %12, %15 : vector<128x32xf32>
    %c0_12 = arith.constant 0 : index
    %c0_13 = arith.constant 0 : index
    %c0_14 = arith.constant 0 : index
    %17 = vector.load %arg6[%c0_12, %c0_13, %c0_14] : memref<1x32x32xbf16, #tpu.memory_space<vmem>>, vector<1x32x32xbf16>
    %18 = vector.shape_cast %17 : vector<1x32x32xbf16> to vector<32x32xbf16>
    %cst_15 = arith.constant dense<0.000000e+00> : vector<128x32xf32>
    %19 = tpu.matmul %8, %18, %cst_15 {dimension_numbers = #tpu.dot_dimension_numbers<[1], [0], [0], [1], [0, 0, 1, 1], [], []>} : vector<128x32xbf16>, vector<32x32xbf16>, vector<128x32xf32> -> vector<128x32xf32>
    %c0_16 = arith.constant 0 : index
    %c0_17 = arith.constant 0 : index
    %c0_18 = arith.constant 0 : index
    %20 = vector.load %arg7[%c0_16, %c0_17, %c0_18] : memref<1x1x32xf32, #tpu.memory_space<vmem>>, vector<1x1x32xf32>
    %21 = vector.shape_cast %20 : vector<1x1x32xf32> to vector<1x32xf32>
    %22 = vector.broadcast %21 : vector<1x32xf32> to vector<128x32xf32>
    %23 = arith.addf %19, %22 : vector<128x32xf32>
    %c0_19 = arith.constant 0 : index
    %c0_20 = arith.constant 0 : index
    %c0_21 = arith.constant 0 : index
    %24 = vector.load %arg8[%c0_19, %c0_20, %c0_21] : memref<1x32x32xbf16, #tpu.memory_space<vmem>>, vector<1x32x32xbf16>
    %25 = vector.shape_cast %24 : vector<1x32x32xbf16> to vector<32x32xbf16>
    %cst_22 = arith.constant dense<0.000000e+00> : vector<128x32xf32>
    %26 = tpu.matmul %9, %25, %cst_22 {dimension_numbers = #tpu.dot_dimension_numbers<[1], [0], [0], [1], [0, 0, 1, 1], [], []>} : vector<128x32xbf16>, vector<32x32xbf16>, vector<128x32xf32> -> vector<128x32xf32>
    %c0_23 = arith.constant 0 : index
    %c0_24 = arith.constant 0 : index
    %c0_25 = arith.constant 0 : index
    %27 = vector.load %arg9[%c0_23, %c0_24, %c0_25] : memref<1x1x32xf32, #tpu.memory_space<vmem>>, vector<1x1x32xf32>
    %28 = vector.shape_cast %27 : vector<1x1x32xf32> to vector<1x32xf32>
    %29 = vector.broadcast %28 : vector<1x32xf32> to vector<128x32xf32>
    %30 = arith.addf %26, %29 : vector<128x32xf32>
    %cst_26 = arith.constant 0.353553385 : f32
    %31 = vector.broadcast %cst_26 : f32 to vector<128x32xf32>
    %32 = arith.mulf %16, %31 : vector<128x32xf32>
    %33 = arith.truncf %32 : vector<128x32xf32> to vector<128x32xbf16>
    %34 = arith.truncf %23 : vector<128x32xf32> to vector<128x32xbf16>
    %35 = arith.truncf %30 : vector<128x32xf32> to vector<128x32xbf16>
    %36 = vector.extract_strided_slice %33 {offsets = [0, 0], sizes = [128, 8], strides = [1, 1]} : vector<128x32xbf16> to vector<128x8xbf16>
    %37 = vector.extract_strided_slice %34 {offsets = [0, 0], sizes = [128, 8], strides = [1, 1]} : vector<128x32xbf16> to vector<128x8xbf16>
    %38 = vector.extract_strided_slice %35 {offsets = [0, 0], sizes = [128, 8], strides = [1, 1]} : vector<128x32xbf16> to vector<128x8xbf16>
    %cst_27 = arith.constant dense<0.000000e+00> : vector<128x128xf32>
    %39 = tpu.matmul %36, %37, %cst_27 {dimension_numbers = #tpu.dot_dimension_numbers<[1], [1], [0], [0], [0, 0, 1, 0], [], []>} : vector<128x8xbf16>, vector<128x8xbf16>, vector<128x128xf32> -> vector<128x128xf32>
    %cst_28 = arith.constant dense<0xFF800000> : vector<128xf32>
    %40 = vector.multi_reduction <maximumf>, %39, %cst_28 [1] : vector<128x128xf32> to vector<128xf32>
    %41 = vector.shape_cast %40 : vector<128xf32> to vector<128x1xf32>
    %42 = vector.broadcast %41 : vector<128x1xf32> to vector<128x128xf32>
    %43 = arith.subf %39, %42 : vector<128x128xf32>
    %44 = math.exp %43 : vector<128x128xf32>
    %cst_29 = arith.constant dense<0.000000e+00> : vector<128xf32>
    %45 = vector.multi_reduction <add>, %44, %cst_29 [1] : vector<128x128xf32> to vector<128xf32>
    %46 = vector.shape_cast %45 : vector<128xf32> to vector<128x1xf32>
    %47 = tpu.reciprocal %46 {approx = true} : vector<128x1xf32> -> vector<128x1xf32>
    %48 = vector.broadcast %47 : vector<128x1xf32> to vector<128x128xf32>
    %49 = arith.mulf %44, %48 : vector<128x128xf32>
    %50 = arith.truncf %49 : vector<128x128xf32> to vector<128x128xbf16>
    %cst_30 = arith.constant dense<0.000000e+00> : vector<128x8xf32>
    %51 = tpu.matmul %50, %38, %cst_30 {dimension_numbers = #tpu.dot_dimension_numbers<[1], [0], [0], [1], [0, 0, 1, 1], [], []>} : vector<128x128xbf16>, vector<128x8xbf16>, vector<128x8xf32> -> vector<128x8xf32>
    %52 = vector.extract_strided_slice %33 {offsets = [0, 8], sizes = [128, 8], strides = [1, 1]} : vector<128x32xbf16> to vector<128x8xbf16>
    %53 = vector.extract_strided_slice %34 {offsets = [0, 8], sizes = [128, 8], strides = [1, 1]} : vector<128x32xbf16> to vector<128x8xbf16>
    %54 = vector.extract_strided_slice %35 {offsets = [0, 8], sizes = [128, 8], strides = [1, 1]} : vector<128x32xbf16> to vector<128x8xbf16>
    %cst_31 = arith.constant dense<0.000000e+00> : vector<128x128xf32>
    %55 = tpu.matmul %52, %53, %cst_31 {dimension_numbers = #tpu.dot_dimension_numbers<[1], [1], [0], [0], [0, 0, 1, 0], [], []>} : vector<128x8xbf16>, vector<128x8xbf16>, vector<128x128xf32> -> vector<128x128xf32>
    %cst_32 = arith.constant dense<0xFF800000> : vector<128xf32>
    %56 = vector.multi_reduction <maximumf>, %55, %cst_32 [1] : vector<128x128xf32> to vector<128xf32>
    %57 = vector.shape_cast %56 : vector<128xf32> to vector<128x1xf32>
    %58 = vector.broadcast %57 : vector<128x1xf32> to vector<128x128xf32>
    %59 = arith.subf %55, %58 : vector<128x128xf32>
    %60 = math.exp %59 : vector<128x128xf32>
    %cst_33 = arith.constant dense<0.000000e+00> : vector<128xf32>
    %61 = vector.multi_reduction <add>, %60, %cst_33 [1] : vector<128x128xf32> to vector<128xf32>
    %62 = vector.shape_cast %61 : vector<128xf32> to vector<128x1xf32>
    %63 = tpu.reciprocal %62 {approx = true} : vector<128x1xf32> -> vector<128x1xf32>
    %64 = vector.broadcast %63 : vector<128x1xf32> to vector<128x128xf32>
    %65 = arith.mulf %60, %64 : vector<128x128xf32>
    %66 = arith.truncf %65 : vector<128x128xf32> to vector<128x128xbf16>
    %cst_34 = arith.constant dense<0.000000e+00> : vector<128x8xf32>
    %67 = tpu.matmul %66, %54, %cst_34 {dimension_numbers = #tpu.dot_dimension_numbers<[1], [0], [0], [1], [0, 0, 1, 1], [], []>} : vector<128x128xbf16>, vector<128x8xbf16>, vector<128x8xf32> -> vector<128x8xf32>
    %68 = vector.extract_strided_slice %33 {offsets = [0, 16], sizes = [128, 8], strides = [1, 1]} : vector<128x32xbf16> to vector<128x8xbf16>
    %69 = vector.extract_strided_slice %34 {offsets = [0, 16], sizes = [128, 8], strides = [1, 1]} : vector<128x32xbf16> to vector<128x8xbf16>
    %70 = vector.extract_strided_slice %35 {offsets = [0, 16], sizes = [128, 8], strides = [1, 1]} : vector<128x32xbf16> to vector<128x8xbf16>
    %cst_35 = arith.constant dense<0.000000e+00> : vector<128x128xf32>
    %71 = tpu.matmul %68, %69, %cst_35 {dimension_numbers = #tpu.dot_dimension_numbers<[1], [1], [0], [0], [0, 0, 1, 0], [], []>} : vector<128x8xbf16>, vector<128x8xbf16>, vector<128x128xf32> -> vector<128x128xf32>
    %cst_36 = arith.constant dense<0xFF800000> : vector<128xf32>
    %72 = vector.multi_reduction <maximumf>, %71, %cst_36 [1] : vector<128x128xf32> to vector<128xf32>
    %73 = vector.shape_cast %72 : vector<128xf32> to vector<128x1xf32>
    %74 = vector.broadcast %73 : vector<128x1xf32> to vector<128x128xf32>
    %75 = arith.subf %71, %74 : vector<128x128xf32>
    %76 = math.exp %75 : vector<128x128xf32>
    %cst_37 = arith.constant dense<0.000000e+00> : vector<128xf32>
    %77 = vector.multi_reduction <add>, %76, %cst_37 [1] : vector<128x128xf32> to vector<128xf32>
    %78 = vector.shape_cast %77 : vector<128xf32> to vector<128x1xf32>
    %79 = tpu.reciprocal %78 {approx = true} : vector<128x1xf32> -> vector<128x1xf32>
    %80 = vector.broadcast %79 : vector<128x1xf32> to vector<128x128xf32>
    %81 = arith.mulf %76, %80 : vector<128x128xf32>
    %82 = arith.truncf %81 : vector<128x128xf32> to vector<128x128xbf16>
    %cst_38 = arith.constant dense<0.000000e+00> : vector<128x8xf32>
    %83 = tpu.matmul %82, %70, %cst_38 {dimension_numbers = #tpu.dot_dimension_numbers<[1], [0], [0], [1], [0, 0, 1, 1], [], []>} : vector<128x128xbf16>, vector<128x8xbf16>, vector<128x8xf32> -> vector<128x8xf32>
    %84 = vector.extract_strided_slice %33 {offsets = [0, 24], sizes = [128, 8], strides = [1, 1]} : vector<128x32xbf16> to vector<128x8xbf16>
    %85 = vector.extract_strided_slice %34 {offsets = [0, 24], sizes = [128, 8], strides = [1, 1]} : vector<128x32xbf16> to vector<128x8xbf16>
    %86 = vector.extract_strided_slice %35 {offsets = [0, 24], sizes = [128, 8], strides = [1, 1]} : vector<128x32xbf16> to vector<128x8xbf16>
    %cst_39 = arith.constant dense<0.000000e+00> : vector<128x128xf32>
    %87 = tpu.matmul %84, %85, %cst_39 {dimension_numbers = #tpu.dot_dimension_numbers<[1], [1], [0], [0], [0, 0, 1, 0], [], []>} : vector<128x8xbf16>, vector<128x8xbf16>, vector<128x128xf32> -> vector<128x128xf32>
    %cst_40 = arith.constant dense<0xFF800000> : vector<128xf32>
    %88 = vector.multi_reduction <maximumf>, %87, %cst_40 [1] : vector<128x128xf32> to vector<128xf32>
    %89 = vector.shape_cast %88 : vector<128xf32> to vector<128x1xf32>
    %90 = vector.broadcast %89 : vector<128x1xf32> to vector<128x128xf32>
    %91 = arith.subf %87, %90 : vector<128x128xf32>
    %92 = math.exp %91 : vector<128x128xf32>
    %cst_41 = arith.constant dense<0.000000e+00> : vector<128xf32>
    %93 = vector.multi_reduction <add>, %92, %cst_41 [1] : vector<128x128xf32> to vector<128xf32>
    %94 = vector.shape_cast %93 : vector<128xf32> to vector<128x1xf32>
    %95 = tpu.reciprocal %94 {approx = true} : vector<128x1xf32> -> vector<128x1xf32>
    %96 = vector.broadcast %95 : vector<128x1xf32> to vector<128x128xf32>
    %97 = arith.mulf %92, %96 : vector<128x128xf32>
    %98 = arith.truncf %97 : vector<128x128xf32> to vector<128x128xbf16>
    %cst_42 = arith.constant dense<0.000000e+00> : vector<128x8xf32>
    %99 = tpu.matmul %98, %86, %cst_42 {dimension_numbers = #tpu.dot_dimension_numbers<[1], [0], [0], [1], [0, 0, 1, 1], [], []>} : vector<128x128xbf16>, vector<128x8xbf16>, vector<128x8xf32> -> vector<128x8xf32>
    %100 = tpu.concatenate %51, %67, %83, %99 in 1 : vector<128x8xf32>, vector<128x8xf32>, vector<128x8xf32>, vector<128x8xf32> -> vector<128x32xf32>
    %101 = arith.truncf %100 : vector<128x32xf32> to vector<128x32xbf16>
    %c0_43 = arith.constant 0 : index
    %c0_44 = arith.constant 0 : index
    %c0_45 = arith.constant 0 : index
    %102 = vector.load %arg10[%c0_43, %c0_44, %c0_45] : memref<1x32x32xbf16, #tpu.memory_space<vmem>>, vector<1x32x32xbf16>
    %103 = vector.shape_cast %102 : vector<1x32x32xbf16> to vector<32x32xbf16>
    %cst_46 = arith.constant dense<0.000000e+00> : vector<128x32xf32>
    %104 = tpu.matmul %101, %103, %cst_46 {dimension_numbers = #tpu.dot_dimension_numbers<[1], [0], [0], [1], [0, 0, 1, 1], [], []>} : vector<128x32xbf16>, vector<32x32xbf16>, vector<128x32xf32> -> vector<128x32xf32>
    %c0_47 = arith.constant 0 : index
    %c0_48 = arith.constant 0 : index
    %c0_49 = arith.constant 0 : index
    %105 = vector.load %arg11[%c0_47, %c0_48, %c0_49] : memref<1x1x32xf32, #tpu.memory_space<vmem>>, vector<1x1x32xf32>
    %106 = vector.shape_cast %105 : vector<1x1x32xf32> to vector<1x32xf32>
    %107 = vector.broadcast %106 : vector<1x32xf32> to vector<128x32xf32>
    %108 = arith.addf %104, %107 : vector<128x32xf32>
    %109 = arith.addf %4, %108 : vector<128x32xf32>
    %c0_50 = arith.constant 0 : index
    %c0_51 = arith.constant 0 : index
    %c0_52 = arith.constant 0 : index
    %110 = vector.load %arg12[%c0_50, %c0_51, %c0_52] : memref<1x1x32xf32, #tpu.memory_space<vmem>>, vector<1x1x32xf32>
    %111 = vector.shape_cast %110 : vector<1x1x32xf32> to vector<1x32xf32>
    %c0_53 = arith.constant 0 : index
    %c0_54 = arith.constant 0 : index
    %c0_55 = arith.constant 0 : index
    %112 = vector.load %arg13[%c0_53, %c0_54, %c0_55] : memref<1x1x32xf32, #tpu.memory_space<vmem>>, vector<1x1x32xf32>
    %113 = vector.shape_cast %112 : vector<1x1x32xf32> to vector<1x32xf32>
    %cst_56 = arith.constant dense<0.000000e+00> : vector<128xf32>
    %114 = vector.multi_reduction <add>, %109, %cst_56 [1] : vector<128x32xf32> to vector<128xf32>
    %115 = vector.shape_cast %114 : vector<128xf32> to vector<128x1xf32>
    %cst_57 = arith.constant 3.200000e+01 : f32
    %116 = vector.broadcast %cst_57 : f32 to vector<128x1xf32>
    %117 = arith.divf %115, %116 : vector<128x1xf32>
    %118 = vector.broadcast %117 : vector<128x1xf32> to vector<128x32xf32>
    %119 = arith.subf %109, %118 : vector<128x32xf32>
    %120 = arith.mulf %119, %119 : vector<128x32xf32>
    %cst_58 = arith.constant dense<0.000000e+00> : vector<128xf32>
    %121 = vector.multi_reduction <add>, %120, %cst_58 [1] : vector<128x32xf32> to vector<128xf32>
    %122 = vector.shape_cast %121 : vector<128xf32> to vector<128x1xf32>
    %cst_59 = arith.constant 3.200000e+01 : f32
    %123 = vector.broadcast %cst_59 : f32 to vector<128x1xf32>
    %124 = arith.divf %122, %123 : vector<128x1xf32>
    %125 = vector.broadcast %117 : vector<128x1xf32> to vector<128x32xf32>
    %126 = arith.subf %109, %125 : vector<128x32xf32>
    %cst_60 = arith.constant 9.99999974E-6 : f32
    %127 = vector.broadcast %cst_60 : f32 to vector<128x1xf32>
    %128 = arith.addf %124, %127 : vector<128x1xf32>
    %129 = math.rsqrt %128 : vector<128x1xf32>
    %130 = vector.broadcast %129 : vector<128x1xf32> to vector<128x32xf32>
    %131 = arith.mulf %126, %130 : vector<128x32xf32>
    %132 = vector.broadcast %111 : vector<1x32xf32> to vector<128x32xf32>
    %133 = arith.mulf %131, %132 : vector<128x32xf32>
    %134 = vector.broadcast %113 : vector<1x32xf32> to vector<128x32xf32>
    %135 = arith.addf %133, %134 : vector<128x32xf32>
    %136 = arith.truncf %135 : vector<128x32xf32> to vector<128x32xbf16>
    %c0_61 = arith.constant 0 : index
    %c0_62 = arith.constant 0 : index
    %c0_63 = arith.constant 0 : index
    %137 = vector.load %arg14[%c0_61, %c0_62, %c0_63] : memref<1x32x64xbf16, #tpu.memory_space<vmem>>, vector<1x32x64xbf16>
    %138 = vector.shape_cast %137 : vector<1x32x64xbf16> to vector<32x64xbf16>
    %cst_64 = arith.constant dense<0.000000e+00> : vector<128x64xf32>
    %139 = tpu.matmul %136, %138, %cst_64 {dimension_numbers = #tpu.dot_dimension_numbers<[1], [0], [0], [1], [0, 0, 1, 1], [], []>} : vector<128x32xbf16>, vector<32x64xbf16>, vector<128x64xf32> -> vector<128x64xf32>
    %c0_65 = arith.constant 0 : index
    %c0_66 = arith.constant 0 : index
    %c0_67 = arith.constant 0 : index
    %140 = vector.load %arg15[%c0_65, %c0_66, %c0_67] : memref<1x1x64xf32, #tpu.memory_space<vmem>>, vector<1x1x64xf32>
    %141 = vector.shape_cast %140 : vector<1x1x64xf32> to vector<1x64xf32>
    %142 = vector.broadcast %141 : vector<1x64xf32> to vector<128x64xf32>
    %143 = arith.addf %139, %142 : vector<128x64xf32>
    %cst_68 = arith.constant 0.000000e+00 : f32
    %144 = vector.broadcast %cst_68 : f32 to vector<128x64xf32>
    %145 = arith.maximumf %143, %144 : vector<128x64xf32>
    %146 = arith.truncf %145 : vector<128x64xf32> to vector<128x64xbf16>
    %c0_69 = arith.constant 0 : index
    %c0_70 = arith.constant 0 : index
    %c0_71 = arith.constant 0 : index
    %147 = vector.load %arg16[%c0_69, %c0_70, %c0_71] : memref<1x64x32xbf16, #tpu.memory_space<vmem>>, vector<1x64x32xbf16>
    %148 = vector.shape_cast %147 : vector<1x64x32xbf16> to vector<64x32xbf16>
    %cst_72 = arith.constant dense<0.000000e+00> : vector<128x32xf32>
    %149 = tpu.matmul %146, %148, %cst_72 {dimension_numbers = #tpu.dot_dimension_numbers<[1], [0], [0], [1], [0, 0, 1, 1], [], []>} : vector<128x64xbf16>, vector<64x32xbf16>, vector<128x32xf32> -> vector<128x32xf32>
    %c0_73 = arith.constant 0 : index
    %c0_74 = arith.constant 0 : index
    %c0_75 = arith.constant 0 : index
    %150 = vector.load %arg17[%c0_73, %c0_74, %c0_75] : memref<1x1x32xf32, #tpu.memory_space<vmem>>, vector<1x1x32xf32>
    %151 = vector.shape_cast %150 : vector<1x1x32xf32> to vector<1x32xf32>
    %152 = vector.broadcast %151 : vector<1x32xf32> to vector<128x32xf32>
    %153 = arith.addf %149, %152 : vector<128x32xf32>
    %154 = arith.addf %135, %153 : vector<128x32xf32>
    %c0_76 = arith.constant 0 : index
    %c0_77 = arith.constant 0 : index
    %c0_78 = arith.constant 0 : index
    %155 = vector.load %arg18[%c0_76, %c0_77, %c0_78] : memref<1x1x32xf32, #tpu.memory_space<vmem>>, vector<1x1x32xf32>
    %156 = vector.shape_cast %155 : vector<1x1x32xf32> to vector<1x32xf32>
    %c0_79 = arith.constant 0 : index
    %c0_80 = arith.constant 0 : index
    %c0_81 = arith.constant 0 : index
    %157 = vector.load %arg19[%c0_79, %c0_80, %c0_81] : memref<1x1x32xf32, #tpu.memory_space<vmem>>, vector<1x1x32xf32>
    %158 = vector.shape_cast %157 : vector<1x1x32xf32> to vector<1x32xf32>
    %cst_82 = arith.constant dense<0.000000e+00> : vector<128xf32>
    %159 = vector.multi_reduction <add>, %154, %cst_82 [1] : vector<128x32xf32> to vector<128xf32>
    %160 = vector.shape_cast %159 : vector<128xf32> to vector<128x1xf32>
    %cst_83 = arith.constant 3.200000e+01 : f32
    %161 = vector.broadcast %cst_83 : f32 to vector<128x1xf32>
    %162 = arith.divf %160, %161 : vector<128x1xf32>
    %163 = vector.broadcast %162 : vector<128x1xf32> to vector<128x32xf32>
    %164 = arith.subf %154, %163 : vector<128x32xf32>
    %165 = arith.mulf %164, %164 : vector<128x32xf32>
    %cst_84 = arith.constant dense<0.000000e+00> : vector<128xf32>
    %166 = vector.multi_reduction <add>, %165, %cst_84 [1] : vector<128x32xf32> to vector<128xf32>
    %167 = vector.shape_cast %166 : vector<128xf32> to vector<128x1xf32>
    %cst_85 = arith.constant 3.200000e+01 : f32
    %168 = vector.broadcast %cst_85 : f32 to vector<128x1xf32>
    %169 = arith.divf %167, %168 : vector<128x1xf32>
    %170 = vector.broadcast %162 : vector<128x1xf32> to vector<128x32xf32>
    %171 = arith.subf %154, %170 : vector<128x32xf32>
    %cst_86 = arith.constant 9.99999974E-6 : f32
    %172 = vector.broadcast %cst_86 : f32 to vector<128x1xf32>
    %173 = arith.addf %169, %172 : vector<128x1xf32>
    %174 = math.rsqrt %173 : vector<128x1xf32>
    %175 = vector.broadcast %174 : vector<128x1xf32> to vector<128x32xf32>
    %176 = arith.mulf %171, %175 : vector<128x32xf32>
    %177 = vector.broadcast %156 : vector<1x32xf32> to vector<128x32xf32>
    %178 = arith.mulf %176, %177 : vector<128x32xf32>
    %179 = vector.broadcast %158 : vector<1x32xf32> to vector<128x32xf32>
    %180 = arith.addf %178, %179 : vector<128x32xf32>
    %c0_87 = arith.constant 0 : index
    %c0_88 = arith.constant 0 : index
    %c0_89 = arith.constant 0 : index
    %181 = vector.load %arg22[%c0_87, %c0_88, %c0_89] : memref<1x128x32xf32, #tpu.memory_space<vmem>>, vector<1x128x32xf32>
    %182 = vector.shape_cast %181 : vector<1x128x32xf32> to vector<128x32xf32>
    %183 = vector.shape_cast %180 : vector<128x32xf32> to vector<1x128x32xf32>
    tpu.vector_store %arg22[%c0_87, %c0_88, %c0_89], %183 {strides = array<i32>} : memref<1x128x32xf32, #tpu.memory_space<vmem>>, vector<1x128x32xf32>,
    %c1_i32 = arith.constant 1 : i32
    %184 = arith.cmpi eq, %arg1, %c1_i32 : i32
    %185 = arith.extui %184 : i1 to i32
    %c0_i32_90 = arith.constant 0 : i32
    %186 = arith.cmpi ne, %185, %c0_i32_90 : i32
    scf.if %186 {
      %c0_91 = arith.constant 0 : index
      %c0_92 = arith.constant 0 : index
      %187 = vector.load %arg20[%c0_91, %c0_92] : memref<1x32xbf16, #tpu.memory_space<vmem>>, vector<1x32xbf16>
      %188 = arith.truncf %180 : vector<128x32xf32> to vector<128x32xbf16>
      %cst_93 = arith.constant dense<0.000000e+00> : vector<1x128xf32>
      %189 = tpu.matmul %187, %188, %cst_93 {dimension_numbers = #tpu.dot_dimension_numbers<[1], [1], [0], [0], [0, 0, 1, 0], [], []>} : vector<1x32xbf16>, vector<128x32xbf16>, vector<1x128xf32> -> vector<1x128xf32>
      %c0_94 = arith.constant 0 : index
      %c0_95 = arith.constant 0 : index
      %190 = vector.load %arg21[%c0_94, %c0_95] : memref<1x1xf32, #tpu.memory_space<vmem>>, vector<1x1xf32>
      %191 = vector.broadcast %190 : vector<1x1xf32> to vector<1x128xf32>
      %192 = arith.addf %189, %191 : vector<1x128xf32>
      %c0_96 = arith.constant 0 : index
      %c0_97 = arith.constant 0 : index
      %c0_98 = arith.constant 0 : index
      %193 = vector.load %arg23[%c0_96, %c0_97, %c0_98] : memref<1x1x128xf32, #tpu.memory_space<vmem>>, vector<1x1x128xf32>
      %194 = vector.shape_cast %193 : vector<1x1x128xf32> to vector<1x128xf32>
      %195 = vector.shape_cast %192 : vector<1x128xf32> to vector<1x1x128xf32>
      tpu.vector_store %arg23[%c0_96, %c0_97, %c0_98], %195 {strides = array<i32>} : memref<1x1x128xf32, #tpu.memory_space<vmem>>, vector<1x1x128xf32>,
    } else {
    }
    return
  }
  func.func @transform_0(%arg0: i32, %arg1: i32) -> (i32, i32, i32) {
    %c0_i32 = arith.constant 0 : i32
    %c0_i32_0 = arith.constant 0 : i32
    %c0_i32_1 = arith.constant 0 : i32
    return %arg0, %c0_i32, %c0_i32_0 : i32, i32, i32
  }
  func.func @transform_1(%arg0: i32, %arg1: i32) -> (i32, i32, i32) {
    %c0_i32 = arith.constant 0 : i32
    %c0_i32_0 = arith.constant 0 : i32
    %c0_i32_1 = arith.constant 0 : i32
    return %arg0, %c0_i32, %c0_i32_0 : i32, i32, i32
  }
  func.func @transform_2(%arg0: i32, %arg1: i32) -> (i32, i32, i32) {
    %c0_i32 = arith.constant 0 : i32
    %c0_i32_0 = arith.constant 0 : i32
    %c0_i32_1 = arith.constant 0 : i32
    return %arg1, %c0_i32, %c0_i32_0 : i32, i32, i32
  }
  func.func @transform_3(%arg0: i32, %arg1: i32) -> (i32, i32, i32) {
    %c0_i32 = arith.constant 0 : i32
    %c0_i32_0 = arith.constant 0 : i32
    %c0_i32_1 = arith.constant 0 : i32
    return %arg1, %c0_i32, %c0_i32_0 : i32, i32, i32
  }
  func.func @transform_4(%arg0: i32, %arg1: i32) -> (i32, i32, i32) {
    %c0_i32 = arith.constant 0 : i32
    %c0_i32_0 = arith.constant 0 : i32
    %c0_i32_1 = arith.constant 0 : i32
    return %arg1, %c0_i32, %c0_i32_0 : i32, i32, i32
  }
  func.func @transform_5(%arg0: i32, %arg1: i32) -> (i32, i32, i32) {
    %c0_i32 = arith.constant 0 : i32
    %c0_i32_0 = arith.constant 0 : i32
    %c0_i32_1 = arith.constant 0 : i32
    return %arg1, %c0_i32, %c0_i32_0 : i32, i32, i32
  }
  func.func @transform_6(%arg0: i32, %arg1: i32) -> (i32, i32, i32) {
    %c0_i32 = arith.constant 0 : i32
    %c0_i32_0 = arith.constant 0 : i32
    %c0_i32_1 = arith.constant 0 : i32
    return %arg1, %c0_i32, %c0_i32_0 : i32, i32, i32
  }
  func.func @transform_7(%arg0: i32, %arg1: i32) -> (i32, i32, i32) {
    %c0_i32 = arith.constant 0 : i32
    %c0_i32_0 = arith.constant 0 : i32
    %c0_i32_1 = arith.constant 0 : i32
    return %arg1, %c0_i32, %c0_i32_0 : i32, i32, i32
  }
  func.func @transform_8(%arg0: i32, %arg1: i32) -> (i32, i32, i32) {
    %c0_i32 = arith.constant 0 : i32
    %c0_i32_0 = arith.constant 0 : i32
    %c0_i32_1 = arith.constant 0 : i32
    return %arg1, %c0_i32, %c0_i32_0 : i32, i32, i32
  }
  func.func @transform_9(%arg0: i32, %arg1: i32) -> (i32, i32, i32) {
    %c0_i32 = arith.constant 0 : i32
    %c0_i32_0 = arith.constant 0 : i32
    %c0_i32_1 = arith.constant 0 : i32
    return %arg1, %c0_i32, %c0_i32_0 : i32, i32, i32
  }
  func.func @transform_10(%arg0: i32, %arg1: i32) -> (i32, i32, i32) {
    %c0_i32 = arith.constant 0 : i32
    %c0_i32_0 = arith.constant 0 : i32
    %c0_i32_1 = arith.constant 0 : i32
    return %arg1, %c0_i32, %c0_i32_0 : i32, i32, i32
  }
  func.func @transform_11(%arg0: i32, %arg1: i32) -> (i32, i32, i32) {
    %c0_i32 = arith.constant 0 : i32
    %c0_i32_0 = arith.constant 0 : i32
    %c0_i32_1 = arith.constant 0 : i32
    return %arg1, %c0_i32, %c0_i32_0 : i32, i32, i32
  }
  func.func @transform_12(%arg0: i32, %arg1: i32) -> (i32, i32, i32) {
    %c0_i32 = arith.constant 0 : i32
    %c0_i32_0 = arith.constant 0 : i32
    %c0_i32_1 = arith.constant 0 : i32
    return %arg1, %c0_i32, %c0_i32_0 : i32, i32, i32
  }
  func.func @transform_13(%arg0: i32, %arg1: i32) -> (i32, i32, i32) {
    %c0_i32 = arith.constant 0 : i32
    %c0_i32_0 = arith.constant 0 : i32
    %c0_i32_1 = arith.constant 0 : i32
    return %arg1, %c0_i32, %c0_i32_0 : i32, i32, i32
  }
  func.func @transform_14(%arg0: i32, %arg1: i32) -> (i32, i32, i32) {
    %c0_i32 = arith.constant 0 : i32
    %c0_i32_0 = arith.constant 0 : i32
    %c0_i32_1 = arith.constant 0 : i32
    return %arg1, %c0_i32, %c0_i32_0 : i32, i32, i32
  }
  func.func @transform_15(%arg0: i32, %arg1: i32) -> (i32, i32, i32) {
    %c0_i32 = arith.constant 0 : i32
    %c0_i32_0 = arith.constant 0 : i32
    %c0_i32_1 = arith.constant 0 : i32
    return %arg1, %c0_i32, %c0_i32_0 : i32, i32, i32
  }
  func.func @transform_16(%arg0: i32, %arg1: i32) -> (i32, i32, i32) {
    %c0_i32 = arith.constant 0 : i32
    %c0_i32_0 = arith.constant 0 : i32
    %c0_i32_1 = arith.constant 0 : i32
    return %arg1, %c0_i32, %c0_i32_0 : i32, i32, i32
  }
  func.func @transform_17(%arg0: i32, %arg1: i32) -> (i32, i32, i32) {
    %c0_i32 = arith.constant 0 : i32
    %c0_i32_0 = arith.constant 0 : i32
    %c0_i32_1 = arith.constant 0 : i32
    return %arg1, %c0_i32, %c0_i32_0 : i32, i32, i32
  }
  func.func @transform_18(%arg0: i32, %arg1: i32) -> (i32, i32) {
    %c0_i32 = arith.constant 0 : i32
    %c0_i32_0 = arith.constant 0 : i32
    %c0_i32_1 = arith.constant 0 : i32
    return %c0_i32, %c0_i32_0 : i32, i32
  }
  func.func @transform_19(%arg0: i32, %arg1: i32) -> (i32, i32) {
    %c0_i32 = arith.constant 0 : i32
    %c0_i32_0 = arith.constant 0 : i32
    %c0_i32_1 = arith.constant 0 : i32
    return %c0_i32, %c0_i32_0 : i32, i32
  }
  func.func @transform_20(%arg0: i32, %arg1: i32) -> (i32, i32, i32) {
    %c0_i32 = arith.constant 0 : i32
    %c0_i32_0 = arith.constant 0 : i32
    %c0_i32_1 = arith.constant 0 : i32
    return %arg0, %c0_i32, %c0_i32_0 : i32, i32, i32
  }
  func.func @transform_21(%arg0: i32, %arg1: i32) -> (i32, i32, i32) {
    %c0_i32 = arith.constant 0 : i32
    %c0_i32_0 = arith.constant 0 : i32
    %c0_i32_1 = arith.constant 0 : i32
    return %arg0, %c0_i32, %c0_i32_0 : i32, i32, i32
  }
}

module attributes {stable_mosaic.version = 11 : i64} {
  func.func @_proposal_head_kernel(%arg0: i32, %arg1: memref<32x32xf32, #tpu.memory_space<vmem>>, %arg2: memref<32x32xbf16, #tpu.memory_space<vmem>>, %arg3: memref<1x32xf32, #tpu.memory_space<vmem>>, %arg4: memref<1x32xf32, #tpu.memory_space<vmem>>, %arg5: memref<1x32xf32, #tpu.memory_space<vmem>>, %arg6: memref<32x32xbf16, #tpu.memory_space<vmem>>, %arg7: memref<1x32xf32, #tpu.memory_space<vmem>>, %arg8: memref<32x32xbf16, #tpu.memory_space<vmem>>, %arg9: memref<1x32xf32, #tpu.memory_space<vmem>>, %arg10: memref<32x4xbf16, #tpu.memory_space<vmem>>, %arg11: memref<1x4xf32, #tpu.memory_space<vmem>>, %arg12: memref<32x32xf32, #tpu.memory_space<vmem>>, %arg13: memref<32x4xf32, #tpu.memory_space<vmem>>) attributes {dimension_semantics = [#tpu.dimension_semantics<arbitrary>], iteration_bounds = array<i64: 1>, scalar_prefetch = 0 : i64, scratch_operands = 0 : i64, tpu.core_type = #tpu.core_type<tc>, window_params = [{pipeline_mode = #tpu.pipeline_mode<synchronous>, transform_indices = @transform_0, window_bounds = array<i64: 32, 32>}, {pipeline_mode = #tpu.pipeline_mode<synchronous>, transform_indices = @transform_1, window_bounds = array<i64: 32, 32>}, {pipeline_mode = #tpu.pipeline_mode<synchronous>, transform_indices = @transform_2, window_bounds = array<i64: 1, 32>}, {pipeline_mode = #tpu.pipeline_mode<synchronous>, transform_indices = @transform_3, window_bounds = array<i64: 1, 32>}, {pipeline_mode = #tpu.pipeline_mode<synchronous>, transform_indices = @transform_4, window_bounds = array<i64: 1, 32>}, {pipeline_mode = #tpu.pipeline_mode<synchronous>, transform_indices = @transform_5, window_bounds = array<i64: 32, 32>}, {pipeline_mode = #tpu.pipeline_mode<synchronous>, transform_indices = @transform_6, window_bounds = array<i64: 1, 32>}, {pipeline_mode = #tpu.pipeline_mode<synchronous>, transform_indices = @transform_7, window_bounds = array<i64: 32, 32>}, {pipeline_mode = #tpu.pipeline_mode<synchronous>, transform_indices = @transform_8, window_bounds = array<i64: 1, 32>}, {pipeline_mode = #tpu.pipeline_mode<synchronous>, transform_indices = @transform_9, window_bounds = array<i64: 32, 4>}, {pipeline_mode = #tpu.pipeline_mode<synchronous>, transform_indices = @transform_10, window_bounds = array<i64: 1, 4>}, {pipeline_mode = #tpu.pipeline_mode<synchronous>, transform_indices = @transform_11, window_bounds = array<i64: 32, 32>}, {pipeline_mode = #tpu.pipeline_mode<synchronous>, transform_indices = @transform_12, window_bounds = array<i64: 32, 4>}]} {
    %c0 = arith.constant 0 : index
    %c0_0 = arith.constant 0 : index
    %0 = vector.load %arg1[%c0, %c0_0] : memref<32x32xf32, #tpu.memory_space<vmem>>, vector<32x32xf32>
    %1 = arith.truncf %0 : vector<32x32xf32> to vector<32x32xbf16>
    %c0_1 = arith.constant 0 : index
    %c0_2 = arith.constant 0 : index
    %2 = vector.load %arg2[%c0_1, %c0_2] : memref<32x32xbf16, #tpu.memory_space<vmem>>, vector<32x32xbf16>
    %cst = arith.constant dense<0.000000e+00> : vector<32x32xf32>
    %3 = tpu.matmul %1, %2, %cst {dimension_numbers = #tpu.dot_dimension_numbers<[1], [0], [0], [1], [0, 0, 1, 1], [], []>} : vector<32x32xbf16>, vector<32x32xbf16>, vector<32x32xf32> -> vector<32x32xf32>
    %c0_3 = arith.constant 0 : index
    %c0_4 = arith.constant 0 : index
    %4 = vector.load %arg3[%c0_3, %c0_4] : memref<1x32xf32, #tpu.memory_space<vmem>>, vector<1x32xf32>
    %5 = vector.broadcast %4 : vector<1x32xf32> to vector<32x32xf32>
    %6 = arith.addf %3, %5 : vector<32x32xf32>
    %c0_5 = arith.constant 0 : index
    %c0_6 = arith.constant 0 : index
    %7 = vector.load %arg4[%c0_5, %c0_6] : memref<1x32xf32, #tpu.memory_space<vmem>>, vector<1x32xf32>
    %c0_7 = arith.constant 0 : index
    %c0_8 = arith.constant 0 : index
    %8 = vector.load %arg5[%c0_7, %c0_8] : memref<1x32xf32, #tpu.memory_space<vmem>>, vector<1x32xf32>
    %cst_9 = arith.constant dense<0.000000e+00> : vector<32xf32>
    %9 = vector.multi_reduction <add>, %6, %cst_9 [1] : vector<32x32xf32> to vector<32xf32>
    %10 = vector.shape_cast %9 : vector<32xf32> to vector<32x1xf32>
    %cst_10 = arith.constant 3.200000e+01 : f32
    %11 = vector.broadcast %cst_10 : f32 to vector<32x1xf32>
    %12 = arith.divf %10, %11 : vector<32x1xf32>
    %13 = vector.broadcast %12 : vector<32x1xf32> to vector<32x32xf32>
    %14 = arith.subf %6, %13 : vector<32x32xf32>
    %15 = arith.mulf %14, %14 : vector<32x32xf32>
    %cst_11 = arith.constant dense<0.000000e+00> : vector<32xf32>
    %16 = vector.multi_reduction <add>, %15, %cst_11 [1] : vector<32x32xf32> to vector<32xf32>
    %17 = vector.shape_cast %16 : vector<32xf32> to vector<32x1xf32>
    %cst_12 = arith.constant 3.200000e+01 : f32
    %18 = vector.broadcast %cst_12 : f32 to vector<32x1xf32>
    %19 = arith.divf %17, %18 : vector<32x1xf32>
    %20 = vector.broadcast %12 : vector<32x1xf32> to vector<32x32xf32>
    %21 = arith.subf %6, %20 : vector<32x32xf32>
    %cst_13 = arith.constant 9.99999974E-6 : f32
    %22 = vector.broadcast %cst_13 : f32 to vector<32x1xf32>
    %23 = arith.addf %19, %22 : vector<32x1xf32>
    %24 = math.rsqrt %23 : vector<32x1xf32>
    %25 = vector.broadcast %24 : vector<32x1xf32> to vector<32x32xf32>
    %26 = arith.mulf %21, %25 : vector<32x32xf32>
    %27 = vector.broadcast %7 : vector<1x32xf32> to vector<32x32xf32>
    %28 = arith.mulf %26, %27 : vector<32x32xf32>
    %29 = vector.broadcast %8 : vector<1x32xf32> to vector<32x32xf32>
    %30 = arith.addf %28, %29 : vector<32x32xf32>
    %c0_14 = arith.constant 0 : index
    %c0_15 = arith.constant 0 : index
    %31 = vector.load %arg12[%c0_14, %c0_15] : memref<32x32xf32, #tpu.memory_space<vmem>>, vector<32x32xf32>
    tpu.vector_store %arg12[%c0_14, %c0_15], %30 {strides = array<i32>} : memref<32x32xf32, #tpu.memory_space<vmem>>, vector<32x32xf32>,
    %c0_16 = arith.constant 0 : index
    %c0_17 = arith.constant 0 : index
    %32 = vector.load %arg6[%c0_16, %c0_17] : memref<32x32xbf16, #tpu.memory_space<vmem>>, vector<32x32xbf16>
    %cst_18 = arith.constant dense<0.000000e+00> : vector<32x32xf32>
    %33 = tpu.matmul %1, %32, %cst_18 {dimension_numbers = #tpu.dot_dimension_numbers<[1], [0], [0], [1], [0, 0, 1, 1], [], []>} : vector<32x32xbf16>, vector<32x32xbf16>, vector<32x32xf32> -> vector<32x32xf32>
    %c0_19 = arith.constant 0 : index
    %c0_20 = arith.constant 0 : index
    %34 = vector.load %arg7[%c0_19, %c0_20] : memref<1x32xf32, #tpu.memory_space<vmem>>, vector<1x32xf32>
    %35 = vector.broadcast %34 : vector<1x32xf32> to vector<32x32xf32>
    %36 = arith.addf %33, %35 : vector<32x32xf32>
    %cst_21 = arith.constant 0.000000e+00 : f32
    %37 = vector.broadcast %cst_21 : f32 to vector<32x32xf32>
    %38 = arith.maximumf %36, %37 : vector<32x32xf32>
    %39 = arith.truncf %38 : vector<32x32xf32> to vector<32x32xbf16>
    %c0_22 = arith.constant 0 : index
    %c0_23 = arith.constant 0 : index
    %40 = vector.load %arg8[%c0_22, %c0_23] : memref<32x32xbf16, #tpu.memory_space<vmem>>, vector<32x32xbf16>
    %cst_24 = arith.constant dense<0.000000e+00> : vector<32x32xf32>
    %41 = tpu.matmul %39, %40, %cst_24 {dimension_numbers = #tpu.dot_dimension_numbers<[1], [0], [0], [1], [0, 0, 1, 1], [], []>} : vector<32x32xbf16>, vector<32x32xbf16>, vector<32x32xf32> -> vector<32x32xf32>
    %c0_25 = arith.constant 0 : index
    %c0_26 = arith.constant 0 : index
    %42 = vector.load %arg9[%c0_25, %c0_26] : memref<1x32xf32, #tpu.memory_space<vmem>>, vector<1x32xf32>
    %43 = vector.broadcast %42 : vector<1x32xf32> to vector<32x32xf32>
    %44 = arith.addf %41, %43 : vector<32x32xf32>
    %cst_27 = arith.constant 0.000000e+00 : f32
    %45 = vector.broadcast %cst_27 : f32 to vector<32x32xf32>
    %46 = arith.maximumf %44, %45 : vector<32x32xf32>
    %47 = arith.truncf %46 : vector<32x32xf32> to vector<32x32xbf16>
    %c0_28 = arith.constant 0 : index
    %c0_29 = arith.constant 0 : index
    %48 = vector.load %arg10[%c0_28, %c0_29] : memref<32x4xbf16, #tpu.memory_space<vmem>>, vector<32x4xbf16>
    %cst_30 = arith.constant dense<0.000000e+00> : vector<32x4xf32>
    %49 = tpu.matmul %47, %48, %cst_30 {dimension_numbers = #tpu.dot_dimension_numbers<[1], [0], [0], [1], [0, 0, 1, 1], [], []>} : vector<32x32xbf16>, vector<32x4xbf16>, vector<32x4xf32> -> vector<32x4xf32>
    %c0_31 = arith.constant 0 : index
    %c0_32 = arith.constant 0 : index
    %50 = vector.load %arg11[%c0_31, %c0_32] : memref<1x4xf32, #tpu.memory_space<vmem>>, vector<1x4xf32>
    %51 = vector.broadcast %50 : vector<1x4xf32> to vector<32x4xf32>
    %52 = arith.addf %49, %51 : vector<32x4xf32>
    %c0_33 = arith.constant 0 : index
    %c0_34 = arith.constant 0 : index
    %53 = vector.load %arg13[%c0_33, %c0_34] : memref<32x4xf32, #tpu.memory_space<vmem>>, vector<32x4xf32>
    tpu.vector_store %arg13[%c0_33, %c0_34], %52 {strides = array<i32>} : memref<32x4xf32, #tpu.memory_space<vmem>>, vector<32x4xf32>,
    return
  }
  func.func @transform_0(%arg0: i32) -> (i32, i32) {
    %c0_i32 = arith.constant 0 : i32
    %c0_i32_0 = arith.constant 0 : i32
    %c0_i32_1 = arith.constant 0 : i32
    return %c0_i32, %c0_i32_0 : i32, i32
  }
  func.func @transform_1(%arg0: i32) -> (i32, i32) {
    %c0_i32 = arith.constant 0 : i32
    %c0_i32_0 = arith.constant 0 : i32
    %c0_i32_1 = arith.constant 0 : i32
    return %c0_i32, %c0_i32_0 : i32, i32
  }
  func.func @transform_2(%arg0: i32) -> (i32, i32) {
    %c0_i32 = arith.constant 0 : i32
    %c0_i32_0 = arith.constant 0 : i32
    %c0_i32_1 = arith.constant 0 : i32
    return %c0_i32, %c0_i32_0 : i32, i32
  }
  func.func @transform_3(%arg0: i32) -> (i32, i32) {
    %c0_i32 = arith.constant 0 : i32
    %c0_i32_0 = arith.constant 0 : i32
    %c0_i32_1 = arith.constant 0 : i32
    return %c0_i32, %c0_i32_0 : i32, i32
  }
  func.func @transform_4(%arg0: i32) -> (i32, i32) {
    %c0_i32 = arith.constant 0 : i32
    %c0_i32_0 = arith.constant 0 : i32
    %c0_i32_1 = arith.constant 0 : i32
    return %c0_i32, %c0_i32_0 : i32, i32
  }
  func.func @transform_5(%arg0: i32) -> (i32, i32) {
    %c0_i32 = arith.constant 0 : i32
    %c0_i32_0 = arith.constant 0 : i32
    %c0_i32_1 = arith.constant 0 : i32
    return %c0_i32, %c0_i32_0 : i32, i32
  }
  func.func @transform_6(%arg0: i32) -> (i32, i32) {
    %c0_i32 = arith.constant 0 : i32
    %c0_i32_0 = arith.constant 0 : i32
    %c0_i32_1 = arith.constant 0 : i32
    return %c0_i32, %c0_i32_0 : i32, i32
  }
  func.func @transform_7(%arg0: i32) -> (i32, i32) {
    %c0_i32 = arith.constant 0 : i32
    %c0_i32_0 = arith.constant 0 : i32
    %c0_i32_1 = arith.constant 0 : i32
    return %c0_i32, %c0_i32_0 : i32, i32
  }
  func.func @transform_8(%arg0: i32) -> (i32, i32) {
    %c0_i32 = arith.constant 0 : i32
    %c0_i32_0 = arith.constant 0 : i32
    %c0_i32_1 = arith.constant 0 : i32
    return %c0_i32, %c0_i32_0 : i32, i32
  }
  func.func @transform_9(%arg0: i32) -> (i32, i32) {
    %c0_i32 = arith.constant 0 : i32
    %c0_i32_0 = arith.constant 0 : i32
    %c0_i32_1 = arith.constant 0 : i32
    return %c0_i32, %c0_i32_0 : i32, i32
  }
  func.func @transform_10(%arg0: i32) -> (i32, i32) {
    %c0_i32 = arith.constant 0 : i32
    %c0_i32_0 = arith.constant 0 : i32
    %c0_i32_1 = arith.constant 0 : i32
    return %c0_i32, %c0_i32_0 : i32, i32
  }
  func.func @transform_11(%arg0: i32) -> (i32, i32) {
    %c0_i32 = arith.constant 0 : i32
    %c0_i32_0 = arith.constant 0 : i32
    %c0_i32_1 = arith.constant 0 : i32
    return %c0_i32, %c0_i32_0 : i32, i32
  }
  func.func @transform_12(%arg0: i32) -> (i32, i32) {
    %c0_i32 = arith.constant 0 : i32
    %c0_i32_0 = arith.constant 0 : i32
    %c0_i32_1 = arith.constant 0 : i32
    return %c0_i32, %c0_i32_0 : i32, i32
  }
}

</mosaic_0001>

<bundles_post_ra>
// kernel: box_transformer_encoder_forward.3
= control target key start
LH: loop header
LB: loop body
LE: loop exit
PB: predicated region body
PF: predicated region fallthrough
CT: control target
= control target key end

     0   :  { %vm71_vm0 = vcmask 261120   ;;  %s750_s0 = inlined_call_operand.vmem [shape: f32[32,32], index: 0, kind: input, shape index: {}]   ;;  %s751_s1 = inlined_call_operand.vmem [shape: bf16[32,32], index: 1, kind: input, shape index: {}]   ;;  %s752_s2 = inlined_call_operand.vmem [shape: f32[1,32], index: 2, kind: input, shape index: {}]   ;;  %s753_s3 = inlined_call_operand.vmem [shape: f32[1,32], index: 3, kind: input, shape index: {}]   ;;  %s754_s4 = inlined_call_operand.vmem [shape: f32[1,32], index: 4, kind: input, shape index: {}]   ;;  %s755_s5 = inlined_call_operand.vmem [shape: bf16[32,32], index: 5, kind: input, shape index: {}]   ;;  %s756_s6 = inlined_call_operand.vmem [shape: f32[1,32], index: 6, kind: input, shape index: {}]   ;;  %s757_s7 = inlined_call_operand.vmem [shape: bf16[32,32], index: 7, kind: input, shape index: {}]   ;;  %s758_s8 = inlined_call_operand.vmem [shape: f32[1,32], index: 8, kind: input, shape index: {}]   ;;  %s759_s9 = inlined_call_operand.vmem [shape: bf16[32,4], index: 9, kind: input, shape index: {}]   ;;  %s760_s10 = inlined_call_operand.vmem [shape: f32[1,4], index: 10, kind: input, shape index: {}]   ;;  %s761_s11 = inlined_call_operand.hbm [shape: f32[32,32], index: 11, kind: output, shape index: {0}]   ;;  %s762_s12 = inlined_call_operand.vmem [shape: f32[32,4], index: 12, kind: output, shape index: {1}]  }
   0x1   :  { %v544_v0 = vld [vmem:[%s751_s1] sm:$0xff]   ;;  %v546_v2 = vld [vmem:[%s751_s1 + $0x8] sm:$0xff]   ;;  %v44_v6 = vld [vmem:[%s750_s0 + $0x10] sm:$0xff] }
   0x2   :  { %v545_v1 = vld [vmem:[%s755_s5] sm:$0xff]   ;;  %509 = vmatprep.subr.bf16.mxu0 %v544_v0  ;;  %v547_v3 = vld [vmem:[%s755_s5 + $0x8] sm:$0xff]   ;;  %v45_v8 = vld [vmem:[%s750_s0 + $0x18] sm:$0xff] }
   0x3   :  { %517 = vmatprep.subr.bf16.mxu1 %v545_v1  ;;  %510 = vmatpush3.bf16.msra.mxu0 %v544_v0  ;;  %v42_v4 = vld [vmem:[%s750_s0] sm:$0xff]  ;;  %v43_v5 = vld [vmem:[%s750_s0 + $0x8] sm:$0xff]  ;;  %v47_v9 = vpack.c.bf16 %v45_v8, %v44_v6 }
   0x4   :  { %518 = vmatpush3.bf16.msra.mxu1 %v545_v1  ;;  %511 = vmatprep.subr.bf16.mxu0 %v546_v2  ;;  %v46_v7 = vpack.c.bf16 %v43_v5, %v42_v4 }
   0x5   :  { %519 = vmatprep.subr.bf16.mxu1 %v547_v3 }
   0x6   :  { %513 = vmatprep.mubr.msk.bf16.mxu0 %vm71_vm0, %v46_v7  ;;  %521 = vmatprep.mubr.msk.bf16.mxu1 %vm71_vm0, %v46_v7 }
   0x7   :  { %512 = vmatpush3.bf16.msra.mxu0 %v546_v2 }
   0x8   :  { %520 = vmatpush3.bf16.msra.mxu1 %v547_v3 }
   0x9   :  { %18 = vsyncpa [#allocation3], 0  ;;  %v548_v10 = vld [vmem:[%s757_s7] sm:$0xff]   ;;  %v549_v11 = vld [vmem:[%s757_s7 + $0x8] sm:$0xff]  }
   0xa   :  { %514 = vmatmul.mubr.msk.bf16.vlgmr.msra.gmra.mrb[0].mxu0 %vm71_vm0, %v47_v9  ;;  %525 = vmatprep.subr.bf16.mxu0 %v548_v10  ;;  %v471_v12 = vld [vmem:[%s752_s2] ss:$0 sm:$0xff]  ;;  %v551_v41 = vld [vmem:[%s759_s9 + $0x8] sm:$0xff]  }
   0xb   :  { %522 = vmatmul.mubr.msk.bf16.vlgmr.msra.gmra.mrb[0].mxu1 %vm71_vm0, %v47_v9  ;;  %526 = vmatpush3.bf16.msra.mxu0 %v548_v10  ;;  %v478_v13 = vld [vmem:[%s756_s6] ss:$0 sm:$0xff] }
   0xc   :  { %527 = vmatprep.subr.bf16.mxu0 %v549_v11  ;;  %v550_v40 = vld [vmem:[%s759_s9] sm:$0xff]  }
   0xd   :  { %533 = vmatprep.subr.bf16.mxu1 %v550_v40  ;;  %v483_v62 = vld [vmem:[%s758_s8] ss:$0 sm:$0xff] }
   0xe   :  { %534 = vmatpush3.bf16.msra.mxu1 %v550_v40 }
   0xf   :  { %528 = vmatpush3.bf16.msra.mxu0 %v549_v11  ;;  %535 = vmatprep.subr.bf16.mxu1 %v551_v41 }
  0x12   :  { %536 = vmatpush3.bf16.msra.mxu1 %v551_v41 }
  0xdd   :  { %v515_v14 = vpop.f32.mrb[0].mxu0 }
  0xde   :  { %v121_v15 = vadd.f32 %v515_v14, %v471_v12  ;;  %v523_v16 = vpop.f32.mrb[0].mxu1  ;;  %v112_v17 = vpop.f32.mrb[1].mxu0 }
  0xdf   :  { %v272_v18 = vadd.f32 %v523_v16, %v478_v13  ;;  %v113_v19 = vadd.f32 %v471_v12, %v112_v17  ;;  %v263_v20 = vpop.f32.mrb[1].mxu1  ;;  %v516_v21 = vpop.f32.mrb[2].mxu0 }
  0xe0   :  { %v264_v22 = vadd.f32 %v478_v13, %v263_v20  ;;  %v524_v23 = vpop.f32.mrb[2].mxu1  ;;  %v135_v24 = vsel %vm71_vm0, %v121_v15, 0.0  ;;  %v124_v25 = vadd.f32 %v516_v21, %v471_v12  ;;  %v115_v26 = vpop.f32.mrb[3].mxu0 }
  0xe1   :  { %v275_v27 = vadd.f32 %v524_v23, %v478_v13  ;;  %v266_v28 = vpop.f32.mrb[3].mxu1  ;;  %136 = vadd.xlane.f32.xlu1 %v135_v24  ;;  %v116_v29 = vadd.f32 %v471_v12, %v115_v26  ;;  %v129_v30 = vsel %vm71_vm0, %v113_v19, 0.0  ;;  %v280_v33 = vmax.f32 %v272_v18, 0.0  ;;  %v476_v26 = vld [vmem:[%s753_s3] ss:$0 sm:$0xff]  ;;  %s584_s3 = smov [#allocation2]  }
  0xe2   :  { %v267_v31 = vadd.f32 %v478_v13, %v266_v28  ;;  %130 = vadd.xlane.f32.xlu0 %v129_v30  ;;  %v138_v32 = vsel %vm71_vm0, %v124_v25, 0.0  ;;  %v278_v36 = vmax.f32 %v264_v22, 0.0  ;;  %v477_v28 = vld [vmem:[%s754_s4] ss:$0 sm:$0xff]  ;;  %s456_s29 = sshll.u32 %s584_s3, 4  ;;  %s457_s29 = int_to_ptr.vmem [resolvable:$true] %s456_s29 }
  0xe3   :  { %v281_v34 = vmax.f32 %v275_v27, 0.0  ;;  %v132_v35 = vsel %vm71_vm0, %v116_v29, 0.0  ;;  %s560_s4 = scalar_lea.vmem %s457_s29, 512  ;;  %p565_p1 = scmp.lt.s32.totalorder %s457_s29, %s457_s29 }
  0xe4   :  { %v279_v37 = vmax.f32 %v267_v31, 0.0  ;;  %p561_p0 = scmp.ne.s32.totalorder %s457_s29, %s560_s4  ;;  %p566_p2 = scmp.lt.s32.totalorder %s560_s4, %s560_s4 }
  0xe5   :  { %v283_v38 = vpack.c.bf16 %v281_v34, %v280_v33  ;;  %139 = vadd.xlane.f32.xlu1 %v138_v32 }
  0xe6   :  { %v282_v39 = vpack.c.bf16 %v279_v37, %v278_v36  ;;  %133 = vadd.xlane.f32.xlu0 %v132_v35  ;;  %p567_p3 = por %p566_p2, %p565_p1 }
  0xe8   :  { %529 = vmatprep.mubr.msk.bf16.mxu0 %vm71_vm0, %v282_v39  ;;  %p568_p4 = pnand %p567_p3, %p561_p0 }
  0xe9   :  { %530 = vmatmul.mubr.msk.bf16.vlgmr.msra.gmra.mrb[4].mxu0 %vm71_vm0, %v283_v38 }
 0x16e   :  { %v137_v42 = vpop.xlane.xlu1 %136 }
 0x16f   :  { %v144_v43 = vmul.f32 0.03125, %v137_v42  ;;  %v131_v44 = vpop.xlane.xlu0 %130 }
 0x170   :  { %v142_v45 = vmul.f32 0.03125, %v131_v44 }
 0x171   :  { %v148_v46 = vsub.f32 %v121_v15, %v144_v43 }
 0x172   :  { %v146_v47 = vsub.f32 %v113_v19, %v142_v45  ;;  %v140_v48 = vpop.xlane.xlu1 %139 }
 0x173   :  { %v145_v49 = vmul.f32 0.03125, %v140_v48  ;;  %v134_v50 = vpop.xlane.xlu0 %133  ;;  %v152_v56 = vmul.f32 %v148_v46, %v148_v46 }
 0x174   :  { %v143_v51 = vmul.f32 0.03125, %v134_v50  ;;  %v150_v52 = vmul.f32 %v146_v47, %v146_v47 }
 0x175   :  { %v149_v53 = vsub.f32 %v124_v25, %v145_v49  ;;  %v160_v58 = vsel %vm71_vm0, %v152_v56, 0.0 }
 0x176   :  { %v147_v54 = vsub.f32 %v116_v29, %v143_v51  ;;  %v154_v55 = vsel %vm71_vm0, %v150_v52, 0.0 }
 0x177   :  { %155 = vadd.xlane.f32.xlu0 %v154_v55  ;;  %v153_v60 = vmul.f32 %v149_v53, %v149_v53 }
 0x178   :  { %v151_v57 = vmul.f32 %v147_v54, %v147_v54 }
 0x179   :  { %v163_v61 = vsel %vm71_vm0, %v153_v60, 0.0 }
 0x17a   :  { %v157_v59 = vsel %vm71_vm0, %v151_v57, 0.0 }
 0x17b   :  { %161 = vadd.xlane.f32.xlu0 %v160_v58  ;;  %158 = vadd.xlane.f32.xlu1 %v157_v59 }
 0x17f   :  { %164 = vadd.xlane.f32.xlu1 %v163_v61 }
 0x1bc   :  { %v531_v63 = vpop.f32.mrb[4].mxu0 }
 0x1bd   :  { %v356_v0 = vadd.f32 %v531_v63, %v483_v62  ;;  %v347_v1 = vpop.f32.mrb[5].mxu0 }
 0x1be   :  { %v348_v2 = vadd.f32 %v483_v62, %v347_v1  ;;  %v532_v3 = vpop.f32.mrb[6].mxu0 }
 0x1bf   :  { %v359_v4 = vadd.f32 %v532_v3, %v483_v62  ;;  %v350_v5 = vpop.f32.mrb[7].mxu0  ;;  %v364_v7 = vmax.f32 %v356_v0, 0.0 }
 0x1c0   :  { %v351_v6 = vadd.f32 %v483_v62, %v350_v5  ;;  %v362_v9 = vmax.f32 %v348_v2, 0.0 }
 0x1c1   :  { %v365_v8 = vmax.f32 %v359_v4, 0.0 }
 0x1c2   :  { %v363_v10 = vmax.f32 %v351_v6, 0.0 }
 0x1c3   :  { %v367_v11 = vpack.c.bf16 %v365_v8, %v364_v7 }
 0x1c4   :  { %v366_v12 = vpack.c.bf16 %v363_v10, %v362_v9 }
 0x1c6   :  { %537 = vmatprep.mubr.msk.bf16.mxu1 %vm71_vm0, %v366_v12 }
 0x1c7   :  { %538 = vmatmul.mubr.msk.bf16.vlgmr.msra.gmra.mrb[4].mxu1 %vm71_vm0, %v367_v11 }
 0x204   :  { %v156_v13 = vpop.xlane.xlu0 %155 }
 0x205   :  { %v166_v14 = vmul.f32 0.03125, %v156_v13 }
 0x207   :  { %v170_v15 = vadd.f32 1e-05, %v166_v14 }
 0x208   :  { %v159_v16 = vpop.xlane.xlu1 %158  ;;  %v162_v17 = vpop.xlane.xlu0 %161 }
 0x209   :  { %552 = vrsqrt.f32 %v170_v15  ;;  %v167_v18 = vmul.f32 0.03125, %v159_v16  ;;  %v168_v19 = vmul.f32 0.03125, %v162_v17 }
 0x20b   :  { %v171_v20 = vadd.f32 1e-05, %v167_v18  ;;  %v172_v21 = vadd.f32 1e-05, %v168_v19 }
 0x20c   :  { %v165_v22 = vpop.xlane.xlu1 %164 }
 0x20d   :  { %554 = vrsqrt.f32 %v171_v20  ;;  %v169_v23 = vmul.f32 0.03125, %v165_v22 }
 0x20e   :  { %556 = vrsqrt.f32 %v172_v21 }
 0x20f   :  { %v173_v24 = vadd.f32 1e-05, %v169_v23 }
 0x211   :  { %558 = vrsqrt.f32 %v173_v24 }
 0x213   :  { %v553_v25 = vpop.eup %552 }
 0x214   :  { %v178_v27 = vmul.f32 %v553_v25, %v146_v47 }
 0x216   :  { %v188_v29 = vmul.f32 %v476_v26, %v178_v27 }
 0x217   :  { %v555_v30 = vpop.eup %554 }
 0x218   :  { %v557_v31 = vpop.eup %556  ;;  %v198_v32 = vadd.f32 %v477_v28, %v188_v29  ;;  %v179_v33 = vmul.f32 %v555_v30, %v147_v54 }
 0x219   :  { %v180_v34 = vmul.f32 %v557_v31, %v148_v46 }
 0x21a   :  { %202 = vst.msk [vmem:[#allocation2] sm:$0xff] %vm71_vm0, %v198_v32  ;;  %v189_v35 = vmul.f32 %v476_v26, %v179_v33 }
 0x21b   :  { %v559_v36 = vpop.eup %558  ;;  %v190_v37 = vmul.f32 %v476_v26, %v180_v34 }
 0x21c   :  { %v199_v38 = vadd.f32 %v477_v28, %v189_v35  ;;  %v181_v39 = vmul.f32 %v559_v36, %v149_v53 }
 0x21d   :  { %v200_v40 = vadd.f32 %v477_v28, %v190_v37 }
 0x21e   :  { %203 = vst.msk [vmem:[#allocation2 + $0x8] sm:$0xff] %vm71_vm0, %v199_v38  ;;  %v191_v41 = vmul.f32 %v476_v26, %v181_v39 }
 0x21f   :  { %204 = vst.msk [vmem:[#allocation2 + $0x10] sm:$0xff] %vm71_vm0, %v200_v40 }
 0x220   :  { %v201_v42 = vadd.f32 %v477_v28, %v191_v41 }
 0x222   :  { %205 = vst.msk [vmem:[#allocation2 + $0x18] sm:$0xff] %vm71_vm0, %v201_v42 }
 0x223   :  { %571 = shalt.err (!%p568_p4)
}
 0x224   :  { %s572_s14 = scalar_lea.hbm %s761_s11, 512 }
 0x225   :  { %p573_p5 = scmp.ne.s32.totalorder %s761_s11, %s572_s14  ;;  %p576_p6 = scmp.lt.u32.totalorder %s572_s14, %s761_s11 }
 0x227   :  { %p578_p7 = pnand %p576_p6, %p573_p5 }
 0x229   :  { %581 = shalt.err (!%p578_p7)
}
 0x22a   :  { %s585_s5 = smov 128   ;;  %s586_s18 = smov 8   ;;  %v488_v43 = vld [vmem:[%s760_s10] ss:$0 sm:$0xff]  ;;  %vm446_vm1 = vcmask 31744  }
 0x22b   :  { %462 = dma.vmem_to_hbm [thread:$0]  %s457_s29, 512, %s761_s11, [#allocation3], %s585_s5, %s585_s5, %s586_s18  }
 0x29a   :  { %v539_v44 = vpop.f32.mrb[4].mxu1 }
 0x29b   :  { %v440_v45 = vadd.f32 %v539_v44, %v488_v43  ;;  %v431_v46 = vpop.f32.mrb[5].mxu1 }
 0x29c   :  { %v432_v47 = vadd.f32 %v488_v43, %v431_v46  ;;  %v540_v48 = vpop.f32.mrb[6].mxu1 }
 0x29d   :  { %449 = vst.msk [vmem:[%s762_s12 + $0x10] sm:$0xff] %vm446_vm1, %v440_v45  ;;  %v443_v49 = vadd.f32 %v540_v48, %v488_v43  ;;  %v434_v50 = vpop.f32.mrb[7].mxu1 }
 0x29e   :  { %447 = vst.msk [vmem:[%s762_s12] sm:$0xff] %vm446_vm1, %v432_v47  ;;  %v435_v51 = vadd.f32 %v488_v43, %v434_v50 }
 0x29f   :  { %450 = vst.msk [vmem:[%s762_s12 + $0x18] sm:$0xff] %vm446_vm1, %v443_v49 }
 0x2a0   :  { %448 = vst.msk [vmem:[%s762_s12 + $0x8] sm:$0xff] %vm446_vm1, %v435_v51 }
 0x2a1   :  { %582 = dma.done.wait [#allocation3], 512  }
 0x2a2   :  { %583 = vsyncadd [#allocation3], 4294966784 }
 0x2a3   :  { %470 = vsyncpa [#allocation3], 1 }

// kernel: box_transformer_encoder_forward.2
= control target key start
LH: loop header
LB: loop body
LE: loop exit
PB: predicated region body
PF: predicated region fallthrough
CT: control target
= control target key end

     0   :  { %s6378_s26 = smov 0   ;;  %s6380_s27 = smov 0   ;;  %s8478_s0 = inlined_call_operand.vmem [shape: f32[2,128,32], index: 0, kind: input, shape index: {}]   ;;  %s8479_s1 = inlined_call_operand.vmem [shape: f32[2,128,32], index: 1, kind: input, shape index: {}]   ;;  %s8480_s2 = inlined_call_operand.vmem [shape: bf16[2,32,32], index: 2, kind: input, shape index: {}]   ;;  %s8481_s3 = inlined_call_operand.vmem [shape: f32[2,1,32], index: 3, kind: input, shape index: {}]   ;;  %s8482_s4 = inlined_call_operand.vmem [shape: bf16[2,32,32], index: 4, kind: input, shape index: {}]   ;;  %s8483_s5 = inlined_call_operand.vmem [shape: f32[2,1,32], index: 5, kind: input, shape index: {}]   ;;  %s8484_s6 = inlined_call_operand.vmem [shape: bf16[2,32,32], index: 6, kind: input, shape index: {}]   ;;  %s8485_s7 = inlined_call_operand.vmem [shape: f32[2,1,32], index: 7, kind: input, shape index: {}]   ;;  %s8486_s8 = inlined_call_operand.vmem [shape: bf16[2,32,32], index: 8, kind: input, shape index: {}]   ;;  %s8487_s9 = inlined_call_operand.vmem [shape: f32[2,1,32], index: 9, kind: input, shape index: {}]   ;;  %s8488_s10 = inlined_call_operand.vmem [shape: f32[2,1,32], index: 10, kind: input, shape index: {}]   ;;  %s8489_s11 = inlined_call_operand.vmem [shape: f32[2,1,32], index: 11, kind: input, shape index: {}]   ;;  %s8490_s12 = inlined_call_operand.vmem [shape: bf16[2,32,64], index: 12, kind: input, shape index: {}]   ;;  %s8491_s13 = inlined_call_operand.vmem [shape: f32[2,1,64], index: 13, kind: input, shape index: {}]   ;;  %s8492_s14 = inlined_call_operand.vmem [shape: bf16[2,64,32], index: 14, kind: input, shape index: {}]   ;;  %s8493_s15 = inlined_call_operand.vmem [shape: f32[2,1,32], index: 15, kind: input, shape index: {}]   ;;  %s8494_s16 = inlined_call_operand.vmem [shape: f32[2,1,32], index: 16, kind: input, shape index: {}]   ;;  %s8495_s17 = inlined_call_operand.vmem [shape: f32[2,1,32], index: 17, kind: input, shape index: {}]   ;;  %s8496_s18 = inlined_call_operand.vmem [shape: bf16[1,32], index: 18, kind: input, shape index: {}]   ;;  %s8497_s19 = inlined_call_operand.<no memory space> [shape: f32[1,1], index: 19, kind: input, shape index: {}]   ;;  %s8498_s20 = inlined_call_operand.vmem [shape: f32[2,128,32], index: 20, kind: output, shape index: {0}]   ;;  %s8499_s21 = inlined_call_operand.vmem [shape: f32[2,1,128], index: 21, kind: output, shape index: {1}]  }
   0x1   :  { %8513 = sst [smem:[#allocation34_spill]] %s8478_s0  ;;  %v27_v0 = vstv %s8497_s19  ;;  %s6384_s28 = smov 0  }
   0x2   :  { %8514 = sst [smem:[#allocation35_spill]] %s8479_s1  ;;  %28 = vst [vmem:[#allocation2] sm:$0x1] %v27_v0  ;;  %s6386_s29 = smov 0  }
   0x3   :  { %8515 = sst [smem:[#allocation36_spill]] %s8480_s2 }
   0x4   :  { %8516 = sst [smem:[#allocation37_spill]] %s8481_s3  ;;  %s6382_s3 = smov 0  }
   0x5   :  { %8517 = sst [smem:[#allocation38_spill]] %s8482_s4 }
   0x6   :  { %8518 = sst [smem:[#allocation39_spill]] %s8483_s5 }
   0x7   :  { %8519 = sst [smem:[#allocation40_spill]] %s8484_s6 }
   0x8   :  { %8520 = sst [smem:[#allocation41_spill]] %s8486_s8 }
   0x9   :  { %8521 = sst [smem:[#allocation42_spill]] %s8489_s11 }
   0xa   :  { %8522 = sst [smem:[#allocation43_spill]] %s8490_s12 }
   0xb   :  { %8523 = sst [smem:[#allocation44_spill]] %s8491_s13 }
   0xc   :  { %8524 = sst [smem:[#allocation45_spill]] %s8494_s16 }
   0xd   :  { %8525 = sst [smem:[#allocation46_spill]] %s8495_s17 }
   0xe   :  { %8526 = sst [smem:[#allocation47_spill]] %s8496_s18 }
   0xf   :  { %8527 = sst [smem:[#allocation48_spill]] %s8498_s20 }
  0x10   :  { %8528 = sst [smem:[#allocation49_spill]] %s8499_s21 }
  0x11 LB: > { %8529 = sst [smem:[#allocation3_spill]] %s6238_s26  ;;  %s43_s19 = sadd.s32 1, %s6246_s3  ;;  %s6254_s29 = sphi %s6386_s29, %s34_s29   ;;  %s6250_s28 = sphi %s6384_s28, %s8635_s28   ;;  %s6246_s3 = sphi %s6382_s3, %s8634_s3   ;;  %s6242_s27 = sphi %s6380_s27, %s8633_s27   ;;  %s6238_s26 = sphi %s6378_s26, %s8632_s26  }
  0x12   : > { %8530 = sst [smem:[#allocation4_spill]] %s6246_s3  ;;  %s46_s0 = sadd.s32 1, %s6250_s28 }
  0x13   : > { %8531 = sst [smem:[#allocation5_spill]] %s6250_s28  ;;  %p44_p0 = scmp.ge.s32.totalorder %s43_s19, 2 }
  0x14   : > { %8532 = sst [smem:[#allocation6_spill]] %s6254_s29  ;;  %p4928_p1 = scmp.ge.s32.totalorder %s6254_s29, 1 }
  0x15   : > { %p754_p2 = scmp.lt.s32.totalorder %s6254_s29, 5  ;;  %s8637_s19 = smov (%p44_p0, %s43_s19), 0 }
  0x16   : > { %8533 = sst [smem:[#allocation7_spill]] %s8637_s19  ;;  %s8639_s0 = smov (!%p44_p0, %s46_s0), %s6250_s28 }
  0x17   : > { %p755_p3 = pnand %p4928_p1, %p754_p2  ;;  %p48_p4 = scmp.ge.s32.totalorder %s8639_s0, 2 }
  0x19   : > { %s8641_s0 = smov (%p48_p4, %s8639_s0), 0  ;;  %758 = sbr.rel (%p755_p3) target bundleno = 4751 (0x128f), region = 100 }
  0x1a   : > { %8534 = sst [smem:[#allocation8_spill]] %s8641_s0 }
  0x20   : > { %p882_p5 = scmp.lt.s32.totalorder %s6242_s27, 1  ;;  %p892_p6 = scmp.lt.s32.totalorder %s6238_s26, 1 }
  0x21   : > { %s8537_s2 = sld [smem:[#allocation34_spill]]  ;;  %s8539_s28 = sld [smem:[#allocation35_spill]] }
  0x22   : > { %s8643_s27 = smov (!%p882_p5, %s6242_s27), 1  ;;  %s8542_s21 = sld [smem:[#allocation36_spill]] }
  0x23   : > { %8535 = sst [smem:[#allocation9_spill]] %s8643_s27  ;;  %s5056_s30 = sshll.u32 %s8643_s27, 7 }
  0x24   : > { %s6414_s4 = scalar_select %p892_p6, %s6238_s26, 1 }
  0x25   : > { %s8543_s27 = sld [smem:[#allocation38_spill]]  ;;  %s8545_s6 = sld [smem:[#allocation40_spill]] }
  0x26   : > { %s5058_s29 = sshll.u32 %s6414_s4, 4  ;;  %s8546_s8 = sld [smem:[#allocation41_spill]] }
  0x27   : > { %s6424_s25 = scalar_lea.vmem %s8537_s2, %s5056_s30  ;;  %s6429_s3 = scalar_lea.vmem %s8539_s28, %s5056_s30 }
  0x28   : > { %8538 = sst [smem:[#allocation10_spill]] %s6424_s25  ;;  %s6439_s1 = scalar_lea.vmem %s8542_s21, %s5058_s29 }
  0x29   : > { %8540 = sst [smem:[#allocation11_spill]] %s6429_s3  ;;  %s8548_s12 = sld [smem:[#allocation43_spill]] }
  0x2a   : > { %s945_s16 = scalar_lea.vmem %s8493_s15, %s6414_s4  ;;  %s8550_s0 = sld [smem:[#allocation45_spill]] }
  0x2b   : > { %s6444_s25 = scalar_lea.vmem %s8543_s27, %s5058_s29  ;;  %s6453_s18 = scalar_lea.vmem %s8545_s6, %s5058_s29 }
  0x2c   : > { %s6462_s5 = scalar_lea.vmem %s8546_s8, %s5058_s29  ;;  %s5063_s8 = sshll.u32 %s6414_s4, 5 }
  0x2d   : > { %s6489_s2 = scalar_lea.vmem %s8492_s14, %s5063_s8  ;;  %s8552_s23 = sld [smem:[#allocation48_spill]] }
  0x2e   : > { %s8553_s27 = sld [smem:[#allocation3_spill]] }
  0x2f   : > { %s6479_s26 = scalar_lea.vmem %s8548_s12, %s5058_s29  ;;  %s8551_s12 = sld [smem:[#allocation46_spill]] }
  0x30   : > { %s948_s6 = scalar_lea.vmem %s8550_s0, %s6414_s4 }
  0x33   : > { %s6506_s13 = scalar_lea.vmem %s8552_s23, %s5056_s30 }
  0x34   : > { %p4947_p7 = scmp.ne.s32.totalorder %s8553_s27, 0 }
  0x35   : > { %s951_s11 = scalar_lea.vmem %s8551_s12, %s6414_s4  ;;  %s8554_s8 = sld [smem:[#allocation10_spill]] (!%p4947_p7)  ;;  %vm981_vm0 = vcmask (!%p4947_p7), 261120  }
  0x36   : > { %964 = sbr.rel (%p4947_p7) target bundleno = 68 (0x44), region = 104 }
  0x3b   : > { %v965_v1 = vld [vmem:[%s8554_s8] sm:$0xff] (!%p4947_p7)  ;;  %v966_v2 = vld [vmem:[%s8554_s8 + $0x8] sm:$0xff] (!%p4947_p7)  ;;  %v967_v3 = vld [vmem:[%s8554_s8 + $0x10] sm:$0xff] (!%p4947_p7) }
  0x3c   : > { %982 = vst.msk [vmem:[%s6506_s13] sm:$0xff] (!%p4947_p7), %vm981_vm0, %v965_v1  ;;  %983 = vst.msk [vmem:[%s6506_s13 + $0x8] sm:$0xff] (!%p4947_p7), %vm981_vm0, %v966_v2  ;;  %v968_v4 = vld [vmem:[%s8554_s8 + $0x18] sm:$0xff] (!%p4947_p7)  ;;  %v969_v5 = vld [vmem:[%s8554_s8 + $0x20] sm:$0xff] (!%p4947_p7) }
  0x3d   : > { %984 = vst.msk [vmem:[%s6506_s13 + $0x10] sm:$0xff] %vm981_vm0, %v967_v3  ;;  %v970_v6 = vld [vmem:[%s8554_s8 + $0x28] sm:$0xff]  ;;  %985 = vst.msk [vmem:[%s6506_s13 + $0x18] sm:$0xff] %vm981_vm0, %v968_v4  ;;  %v971_v7 = vld [vmem:[%s8554_s8 + $0x30] sm:$0xff] }
  0x3e   : > { %986 = vst.msk [vmem:[%s6506_s13 + $0x20] sm:$0xff] %vm981_vm0, %v969_v5  ;;  %987 = vst.msk [vmem:[%s6506_s13 + $0x28] sm:$0xff] %vm981_vm0, %v970_v6  ;;  %v972_v8 = vld [vmem:[%s8554_s8 + $0x38] sm:$0xff]  ;;  %v973_v9 = vld [vmem:[%s8554_s8 + $0x40] sm:$0xff] }
  0x3f   : > { %988 = vst.msk [vmem:[%s6506_s13 + $0x30] sm:$0xff] %vm981_vm0, %v971_v7  ;;  %989 = vst.msk [vmem:[%s6506_s13 + $0x38] sm:$0xff] %vm981_vm0, %v972_v8  ;;  %v974_v10 = vld [vmem:[%s8554_s8 + $0x48] sm:$0xff]  ;;  %v975_v11 = vld [vmem:[%s8554_s8 + $0x50] sm:$0xff] }
  0x40   : > { %990 = vst.msk [vmem:[%s6506_s13 + $0x40] sm:$0xff] %vm981_vm0, %v973_v9  ;;  %v976_v12 = vld [vmem:[%s8554_s8 + $0x58] sm:$0xff]  ;;  %991 = vst.msk [vmem:[%s6506_s13 + $0x48] sm:$0xff] %vm981_vm0, %v974_v10  ;;  %v977_v13 = vld [vmem:[%s8554_s8 + $0x60] sm:$0xff] }
  0x41   : > { %992 = vst.msk [vmem:[%s6506_s13 + $0x50] sm:$0xff] %vm981_vm0, %v975_v11  ;;  %993 = vst.msk [vmem:[%s6506_s13 + $0x58] sm:$0xff] %vm981_vm0, %v976_v12  ;;  %v978_v14 = vld [vmem:[%s8554_s8 + $0x68] sm:$0xff]  ;;  %v979_v15 = vld [vmem:[%s8554_s8 + $0x70] sm:$0xff] }
  0x42   : > { %994 = vst.msk [vmem:[%s6506_s13 + $0x60] sm:$0xff] %vm981_vm0, %v977_v13  ;;  %995 = vst.msk [vmem:[%s6506_s13 + $0x68] sm:$0xff] %vm981_vm0, %v978_v14  ;;  %v980_v16 = vld [vmem:[%s8554_s8 + $0x78] sm:$0xff] }
  0x43   : > { %996 = vst.msk [vmem:[%s6506_s13 + $0x70] sm:$0xff] %vm981_vm0, %v979_v15  ;;  %997 = vst.msk [vmem:[%s6506_s13 + $0x78] sm:$0xff] %vm981_vm0, %v980_v16 }
  0x44 PF: > { %s8555_s12 = sld [smem:[#allocation11_spill]]  ;;  %v5865_v17 = vld [vmem:[%s6444_s25] sm:$0xff]   ;;  %v5866_v18 = vld [vmem:[%s6444_s25 + $0x8] sm:$0xff]   ;;  %vm1085_vm1 = vcmask 261120   ;;  %s8556_s25 = sld [smem:[#allocation39_spill]]  ;;  %vm1511_vm2 = vcmask 64512  }
  0x45   : > { %5284 = vmatprep.subr.bf16.mxu1 %v5865_v17  ;;  %v6578_v29 = vld [vmem:[%s6506_s13 + $0x20] sm:$0xff]  ;;  %v6583_v32 = vld [vmem:[%s6506_s13 + $0x28] sm:$0xff]  ;;  %s8558_s24 = sld [smem:[#allocation37_spill]]  ;;  %s8560_s29 = scalar_lea.vmem %s8485_s7, %s6414_s4  ;;  %vm3488_vm3 = vcmask 130048   ;;  %vm3505_vm4 = vcmask 195584   ;;  %vm4160_vm5 = vcmask 523264  }
  0x46   : > { %5285 = vmatpush3.bf16.msra.mxu1 %v5865_v17  ;;  %v6590_v38 = vld [vmem:[%s6506_s13 + $0x30] sm:$0xff]  ;;  %v6593_v39 = vld [vmem:[%s6506_s13 + $0x38] sm:$0xff]  ;;  %v5867_v52 = vld [vmem:[%s6439_s1] sm:$0xff]   ;;  %v1056_v17 = vpack.c.bf16 %v6583_v32, %v6578_v29  ;;  %s6257_s20 = smov 112   ;;  %s6258_s21 = smov 104  }
  0x47   : > { %5286 = vmatprep.subr.bf16.mxu1 %v5866_v18  ;;  %v6598_v43 = vld [vmem:[%s6506_s13 + $0x40] sm:$0xff]  ;;  %v6602_v45 = vld [vmem:[%s6506_s13 + $0x48] sm:$0xff]  ;;  %5264 = vmatprep.subr.bf16.mxu0 %v5867_v52  ;;  %s6259_s22 = smov 8   ;;  %s6260_s27 = smov 16  }
  0x48   : > { %v1008_v53 = vld [vmem:[%s6506_s13 + $0x50] sm:$0xff]  ;;  %v1009_v54 = vld [vmem:[%s6506_s13 + $0x58] sm:$0xff]  ;;  %v5868_v61 = vld [vmem:[%s6439_s1 + $0x8] sm:$0xff]   ;;  %5265 = vmatpush3.bf16.msra.mxu0 %v5867_v52  ;;  %s6261_s8 = smov 24   ;;  %s8618_s3 = scalar_lea.vmem %s8487_s9, %s6414_s4 }
  0x49   : > { %v1010_v58 = vld [vmem:[%s6506_s13 + $0x60] sm:$0xff]  ;;  %v1011_v59 = vld [vmem:[%s6506_s13 + $0x68] sm:$0xff]  ;;  %5266 = vmatprep.subr.bf16.mxu0 %v5868_v61  ;;  %s8620_s23 = sld [smem:[#allocation42_spill]]  ;;  %s8622_s19 = sld [smem:[#allocation44_spill]] }
  0x4a   : > { %v6560_v19 = vld [vmem:[%s6506_s13] sm:$0xff]  ;;  %v6563_v20 = vld [vmem:[%s6506_s13 + $0x8] sm:$0xff]  ;;  %v1016_v27 = vld [vmem:[%s8555_s12 + $0x10] sm:$0xff]  ;;  %5287 = vmatpush3.bf16.msra.mxu1 %v5866_v18  ;;  %v1057_v18 = vpack.c.bf16 %v6593_v39, %v6590_v38  ;;  %s8557_s1 = scalar_lea.vmem %s8556_s25, %s6414_s4  ;;  %s8619_s25 = scalar_lea.vmem %s8488_s10, %s6414_s4 }
  0x4b   : > { %v1014_v21 = vld [vmem:[%s8555_s12] sm:$0xff]  ;;  %v1015_v22 = vld [vmem:[%s8555_s12 + $0x8] sm:$0xff]  ;;  %v6569_v24 = vld [vmem:[%s6506_s13 + $0x10] sm:$0xff]  ;;  %v1054_v15 = vpack.c.bf16 %v6563_v20, %v6560_v19  ;;  %s8559_s28 = scalar_lea.vmem %s8558_s24, %s6414_s4 }
  0x4c   : > { %v1030_v23 = vadd.f32 %v1014_v21, %v6560_v19  ;;  %v6572_v25 = vld [vmem:[%s6506_s13 + $0x18] sm:$0xff]  ;;  %v1031_v26 = vadd.f32 %v1015_v22, %v6563_v20  ;;  %v1032_v30 = vadd.f32 %v1016_v27, %v6569_v24  ;;  %v1018_v33 = vld [vmem:[%s8555_s12 + $0x20] sm:$0xff]  ;;  %v1019_v34 = vld [vmem:[%s8555_s12 + $0x28] sm:$0xff]  ;;  %5267 = vmatpush3.bf16.msra.mxu0 %v5868_v61  ;;  %v1058_v19 = vpack.c.bf16 %v6602_v45, %v6598_v43 }
  0x4d   : > { %v1017_v28 = vld [vmem:[%s8555_s12 + $0x18] sm:$0xff]  ;;  %v1034_v36 = vadd.f32 %v1018_v33, %v6578_v29  ;;  %v1035_v37 = vadd.f32 %v1019_v34, %v6583_v32  ;;  %v1020_v41 = vld [vmem:[%s8555_s12 + $0x30] sm:$0xff]  ;;  %v1022_v46 = vld [vmem:[%s8555_s12 + $0x40] sm:$0xff]  ;;  %v1055_v16 = vpack.c.bf16 %v6572_v25, %v6569_v24  ;;  %v1059_v20 = vpack.c.bf16 %v1009_v54, %v1008_v53 }
  0x4e   : > { %v1033_v31 = vadd.f32 %v1017_v28, %v6572_v25  ;;  %v1046_v35 = vpack.c.bf16 %v1031_v26, %v1030_v23  ;;  %v1021_v42 = vld [vmem:[%s8555_s12 + $0x38] sm:$0xff]  ;;  %v1023_v47 = vld [vmem:[%s8555_s12 + $0x48] sm:$0xff]  ;;  %v1036_v48 = vadd.f32 %v1020_v41, %v6590_v38  ;;  %v1038_v50 = vadd.f32 %v1022_v46, %v6598_v43  ;;  %v1024_v55 = vld [vmem:[%s8555_s12 + $0x50] sm:$0xff] }
  0x4f   : > { %v1048_v44 = vpack.c.bf16 %v1035_v37, %v1034_v36  ;;  %v1037_v49 = vadd.f32 %v1021_v42, %v6593_v39  ;;  %v1039_v51 = vadd.f32 %v1023_v47, %v6602_v45  ;;  %v1025_v56 = vld [vmem:[%s8555_s12 + $0x58] sm:$0xff]  ;;  %v1026_v60 = vld [vmem:[%s8555_s12 + $0x60] sm:$0xff]  ;;  %v1027_v63 = vld [vmem:[%s8555_s12 + $0x68] sm:$0xff]  ;;  %v1040_v1 = vadd.f32 %v1024_v55, %v1008_v53  ;;  %s8621_s0 = scalar_lea.vmem %s8620_s23, %s6414_s4  ;;  %s8623_s17 = scalar_lea.vmem %s8622_s19, %s6414_s4 }
  0x50   : > { %v1047_v40 = vpack.c.bf16 %v1033_v31, %v1032_v30  ;;  %5288 = vmatprep.mubr.msk.bf16.mxu1 %vm1085_vm1, %v1046_v35  ;;  %5268 = vmatprep.mubr.msk.bf16.mxu0 %vm1085_vm1, %v1046_v35  ;;  %v5869_v0 = vld [vmem:[%s6453_s18] sm:$0xff]   ;;  %v1041_v2 = vadd.f32 %v1025_v56, %v1009_v54  ;;  %v5870_v3 = vld [vmem:[%s6453_s18 + $0x8] sm:$0xff]   ;;  %v1042_v4 = vadd.f32 %v1026_v60, %v1010_v58  ;;  %v1012_v7 = vld [vmem:[%s6506_s13 + $0x70] sm:$0xff]  ;;  %s6256_s18 = smov 120  }
  0x51   : > { %v1049_v57 = vpack.c.bf16 %v1037_v49, %v1036_v48  ;;  %v1050_v62 = vpack.c.bf16 %v1039_v51, %v1038_v50  ;;  %v1043_v5 = vadd.f32 %v1027_v63, %v1011_v59  ;;  %5304 = vmatprep.subr.bf16.mxu0 %v5869_v0  ;;  %v1013_v9 = vld [vmem:[%s6506_s13 + $0x78] sm:$0xff]  ;;  %v1028_v10 = vld [vmem:[%s8555_s12 + $0x70] sm:$0xff]  ;;  %v1060_v21 = vpack.c.bf16 %v1011_v59, %v1010_v58  ;;  %v6664_v24 = vld [vmem:[%s8557_s1] ss:$0 sm:$0xff] }
  0x52   : > { %5289 = vmatmul.mubr.msk.bf16.vlgmr.msra.gmra.mrb[0].mxu1 %vm1085_vm1, %v1047_v40  ;;  %v1051_v6 = vpack.c.bf16 %v1041_v2, %v1040_v1  ;;  %5269 = vmatmul.mubr.msk.bf16.vlgmr.msra.gmra.mrb[0].mxu0 %vm1085_vm1, %v1047_v40  ;;  %v1029_v11 = vld [vmem:[%s8555_s12 + $0x78] sm:$0xff]  ;;  %v1044_v12 = vadd.f32 %v1028_v10, %v1012_v7  ;;  %v1061_v22 = vpack.c.bf16 %v1013_v9, %v1012_v7  ;;  %v6691_v40 = vld [vmem:[%s8559_s28] ss:$0 sm:$0xff] }
  0x53   : > { %5292 = vmatprep.mubr.msk.bf16.mxu1 %vm1085_vm1, %v1048_v44  ;;  %v1052_v8 = vpack.c.bf16 %v1043_v5, %v1042_v4  ;;  %5272 = vmatprep.mubr.msk.bf16.mxu0 %vm1085_vm1, %v1048_v44  ;;  %v1045_v13 = vadd.f32 %v1029_v11, %v1013_v9 }
  0x54   : > { %5305 = vmatpush3.bf16.msra.mxu0 %v5869_v0 }
  0x55   : > { %5306 = vmatprep.subr.bf16.mxu0 %v5870_v3  ;;  %v1053_v14 = vpack.c.bf16 %v1045_v13, %v1044_v12 }
  0x58   : > { %5307 = vmatpush3.bf16.msra.mxu0 %v5870_v3 }
  0x5a   : > { %5293 = vmatmul.mubr.msk.bf16.gmra.mrb[4].mxu1 %vm1085_vm1, %v1049_v57  ;;  %5273 = vmatmul.mubr.msk.bf16.gmra.mrb[4].mxu0 %vm1085_vm1, %v1049_v57 }
  0x5b   : > { %5296 = vmatprep.mubr.msk.bf16.mxu1 %vm1085_vm1, %v1050_v62  ;;  %5276 = vmatprep.mubr.msk.bf16.mxu0 %vm1085_vm1, %v1050_v62 }
  0x62   : > { %5297 = vmatmul.mubr.msk.bf16.gmra.mrb[8].mxu1 %vm1085_vm1, %v1051_v6  ;;  %5277 = vmatmul.mubr.msk.bf16.gmra.mrb[8].mxu0 %vm1085_vm1, %v1051_v6 }
  0x63   : > { %5300 = vmatprep.mubr.msk.bf16.mxu1 %vm1085_vm1, %v1052_v8  ;;  %5280 = vmatprep.mubr.msk.bf16.mxu0 %vm1085_vm1, %v1052_v8 }
  0x6a   : > { %5301 = vmatmul.mubr.msk.bf16.gmra.mrb[12].mxu1 %vm1085_vm1, %v1053_v14  ;;  %5281 = vmatmul.mubr.msk.bf16.gmra.mrb[12].mxu0 %vm1085_vm1, %v1053_v14 }
  0x6b   : > { %5308 = vmatprep.mubr.msk.bf16.mxu0 %vm1085_vm1, %v1054_v15 }
  0x72   : > { %5309 = vmatmul.mubr.msk.bf16.vlgmr.msra.gmra.mrb[16].mxu0 %vm1085_vm1, %v1055_v16 }
  0x73   : > { %5312 = vmatprep.mubr.msk.bf16.mxu0 %vm1085_vm1, %v1056_v17 }
  0x7a   : > { %5313 = vmatmul.mubr.msk.bf16.gmra.mrb[20].mxu0 %vm1085_vm1, %v1057_v18 }
  0x7b   : > { %5316 = vmatprep.mubr.msk.bf16.mxu0 %vm1085_vm1, %v1058_v19 }
  0x82   : > { %5317 = vmatmul.mubr.msk.bf16.gmra.mrb[24].mxu0 %vm1085_vm1, %v1059_v20 }
  0x83   : > { %5320 = vmatprep.mubr.msk.bf16.mxu0 %vm1085_vm1, %v1060_v21 }
  0x8a   : > { %5321 = vmatmul.mubr.msk.bf16.gmra.mrb[28].mxu0 %vm1085_vm1, %v1061_v22 }
 0x125   : > { %v5290_v23 = vpop.f32.mrb[0].mxu1  ;;  %v5270_v44 = vpop.f32.mrb[0].mxu0 }
 0x126   : > { %v1264_v25 = vpop.f32.mrb[1].mxu1  ;;  %v1273_v27 = vadd.f32 %v5290_v23, %v6664_v24  ;;  %v1153_v46 = vadd.f32 %v5270_v44, %v6691_v40  ;;  %v1144_v47 = vpop.f32.mrb[1].mxu0 }
 0x127   : > { %v5291_v26 = vpop.f32.mrb[2].mxu1  ;;  %v1265_v30 = vadd.f32 %v6664_v24, %v1264_v25  ;;  %v1145_v49 = vadd.f32 %v6691_v40, %v1144_v47  ;;  %v5271_v50 = vpop.f32.mrb[2].mxu0 }
 0x128   : > { %v1276_v28 = vadd.f32 %v5291_v26, %v6664_v24  ;;  %v1267_v29 = vpop.f32.mrb[3].mxu1  ;;  %v1473_v51 = vmul.f32 0.35355338, %v1153_v46  ;;  %v1156_v52 = vadd.f32 %v5271_v50, %v6691_v40  ;;  %v1147_v53 = vpop.f32.mrb[3].mxu0 }
 0x129   : > { %v1268_v31 = vadd.f32 %v6664_v24, %v1267_v29  ;;  %v1471_v56 = vmul.f32 0.35355338, %v1145_v49  ;;  %v1148_v57 = vadd.f32 %v6691_v40, %v1147_v53 }
 0x12a   : > { %v6670_v32 = vpack.c.bf16 %v1276_v28, %v1273_v27  ;;  %v1474_v60 = vmul.f32 0.35355338, %v1156_v52 }
 0x12b   : > { %v6672_v33 = vpack.c.bf16 %v1268_v31, %v1265_v30  ;;  %v1472_v63 = vmul.f32 0.35355338, %v1148_v57 }
 0x12c   : > { %1940 = vrot.lane.b32.xlu1 %v6670_v32, %s6256_s18  ;;  %v1540_v54 = vsel %vm1511_vm2, %v6670_v32, 0  ;;  %v6710_v2 = vpack.c.bf16 %v1474_v60, %v1473_v51 }
 0x12d   : > { %1938 = vrot.lane.b32.xlu0 %v6672_v33, %s6256_s18  ;;  %5664 = vmatprep.subr.msk.bf16.mxu1 %vm1511_vm2, %v6672_v33  ;;  %v1537_v34 = vsel %vm1511_vm2, %v6672_v33, 0  ;;  %v5294_v35 = vpop.f32.mrb[4].mxu1  ;;  %v6713_v4 = vpack.c.bf16 %v1472_v63, %v1471_v56  ;;  %v5274_v5 = vpop.f32.mrb[4].mxu0 }
 0x12e   : > { %5325 = vmatpush3.bf16.xpose.msra.mxu1 %v1537_v34  ;;  %v1289_v36 = vadd.f32 %v5294_v35, %v6664_v24  ;;  %v1280_v37 = vpop.f32.mrb[5].mxu1  ;;  %v1169_v7 = vadd.f32 %v5274_v5, %v6691_v40  ;;  %v1160_v8 = vpop.f32.mrb[5].mxu0 }
 0x12f   : > { %5665 = vmatprep.subr.msk.bf16.mxu1 %vm1511_vm2, %v6670_v32  ;;  %v1281_v38 = vadd.f32 %v6664_v24, %v1280_v37  ;;  %v5295_v39 = vpop.f32.mrb[6].mxu1  ;;  %5340 = vmatprep.mubr.msk.bf16.mxu1 %vm1511_vm2, %v6713_v4  ;;  %v1161_v10 = vadd.f32 %v6691_v40, %v1160_v8  ;;  %v5275_v11 = vpop.f32.mrb[6].mxu0 }
 0x130   : > { %v1292_v41 = vadd.f32 %v5295_v39, %v6664_v24  ;;  %v1283_v42 = vpop.f32.mrb[7].mxu1  ;;  %v1477_v12 = vmul.f32 0.35355338, %v1169_v7  ;;  %v1172_v13 = vadd.f32 %v5275_v11, %v6691_v40  ;;  %v1163_v14 = vpop.f32.mrb[7].mxu0 }
 0x131   : > { %v1284_v43 = vadd.f32 %v6664_v24, %v1283_v42  ;;  %v1475_v17 = vmul.f32 0.35355338, %v1161_v10  ;;  %v1164_v18 = vadd.f32 %v6691_v40, %v1163_v14 }
 0x132   : > { %v6695_v45 = vpack.c.bf16 %v1292_v41, %v1289_v36  ;;  %v1478_v21 = vmul.f32 0.35355338, %v1172_v13 }
 0x133   : > { %v6698_v48 = vpack.c.bf16 %v1284_v43, %v1281_v38  ;;  %v1476_v25 = vmul.f32 0.35355338, %v1164_v18 }
 0x134   : > { %v6732_v28 = vpack.c.bf16 %v1478_v21, %v1477_v12 }
 0x135   : > { %v5298_v55 = vpop.f32.mrb[8].mxu1  ;;  %v1543_v15 = vsel %vm1511_vm2, %v6698_v48, 0  ;;  %v6735_v30 = vpack.c.bf16 %v1476_v25, %v1475_v17  ;;  %v5278_v31 = vpop.f32.mrb[8].mxu0 }
 0x136   : > { %5327 = vmatpush3.bf16.xpose.msra.mxu1 %v1540_v54  ;;  %v1305_v58 = vadd.f32 %v5298_v55, %v6664_v24  ;;  %v1296_v59 = vpop.f32.mrb[9].mxu1  ;;  %v1185_v35 = vadd.f32 %v5278_v31, %v6691_v40  ;;  %v1176_v36 = vpop.f32.mrb[9].mxu0 }
 0x137   : > { %5666 = vmatprep.subr.msk.bf16.mxu1 %vm1511_vm2, %v6698_v48  ;;  %v1297_v61 = vadd.f32 %v6664_v24, %v1296_v59  ;;  %v5299_v62 = vpop.f32.mrb[10].mxu1  ;;  %v1177_v38 = vadd.f32 %v6691_v40, %v1176_v36  ;;  %v5279_v39 = vpop.f32.mrb[10].mxu0 }
 0x138   : > { %v1308_v0 = vadd.f32 %v5299_v62, %v6664_v24  ;;  %v1299_v1 = vpop.f32.mrb[11].mxu1  ;;  %v1481_v41 = vmul.f32 0.35355338, %v1185_v35  ;;  %v1188_v42 = vadd.f32 %v5279_v39, %v6691_v40  ;;  %v1179_v43 = vpop.f32.mrb[11].mxu0 }
 0x139   : > { %v1300_v3 = vadd.f32 %v6664_v24, %v1299_v1  ;;  %v1479_v44 = vmul.f32 0.35355338, %v1177_v38  ;;  %v1180_v46 = vadd.f32 %v6691_v40, %v1179_v43 }
 0x13a   : > { %v6715_v6 = vpack.c.bf16 %v1308_v0, %v1305_v58  ;;  %v1482_v47 = vmul.f32 0.35355338, %v1188_v42 }
 0x13b   : > { %v6718_v9 = vpack.c.bf16 %v1300_v3, %v1297_v61  ;;  %v1480_v49 = vmul.f32 0.35355338, %v1180_v46  ;;  %v4970_v3 = vld [vmem:[%s8560_s29] ss:$0 sm:$0xff] }
 0x13c   : > { %v6749_v50 = vpack.c.bf16 %v1482_v47, %v1481_v41  ;;  %v1552_v14 = vsel %vm1511_vm2, %v6715_v6, 0 }
 0x13d   : > { %v5302_v16 = vpop.f32.mrb[12].mxu1  ;;  %v6751_v51 = vpack.c.bf16 %v1480_v49, %v1479_v44  ;;  %v5282_v52 = vpop.f32.mrb[12].mxu0  ;;  %v1549_v60 = vsel %vm1511_vm2, %v6718_v9, 0 }
 0x13e   : > { %5329 = vmatpush3.bf16.xpose.msra.mxu1 %v1543_v15  ;;  %v1321_v19 = vadd.f32 %v5302_v16, %v6664_v24  ;;  %v1312_v20 = vpop.f32.mrb[13].mxu1  ;;  %v1201_v53 = vadd.f32 %v5282_v52, %v6691_v40  ;;  %v1192_v54 = vpop.f32.mrb[13].mxu0 }
 0x13f   : > { %5667 = vmatprep.subr.msk.bf16.mxu1 %vm1511_vm2, %v6695_v45  ;;  %v1313_v22 = vadd.f32 %v6664_v24, %v1312_v20  ;;  %v5303_v23 = vpop.f32.mrb[14].mxu1  ;;  %v1193_v55 = vadd.f32 %v6691_v40, %v1192_v54  ;;  %v5283_v56 = vpop.f32.mrb[14].mxu0 }
 0x140   : > { %v1324_v26 = vadd.f32 %v5303_v23, %v6664_v24  ;;  %v1315_v27 = vpop.f32.mrb[15].mxu1  ;;  %v1485_v57 = vmul.f32 0.35355338, %v1201_v53  ;;  %v1204_v58 = vadd.f32 %v5283_v56, %v6691_v40  ;;  %v1195_v59 = vpop.f32.mrb[15].mxu0 }
 0x141   : > { %v1316_v29 = vadd.f32 %v6664_v24, %v1315_v27  ;;  %v1546_v24 = vsel %vm1511_vm2, %v6695_v45, 0  ;;  %v1483_v61 = vmul.f32 0.35355338, %v1193_v55  ;;  %v1196_v62 = vadd.f32 %v6691_v40, %v1195_v59 }
 0x142   : > { %v6737_v34 = vpack.c.bf16 %v1324_v26, %v1321_v19  ;;  %v1486_v63 = vmul.f32 0.35355338, %v1204_v58 }
 0x143   : > { %v6740_v37 = vpack.c.bf16 %v1316_v29, %v1313_v22  ;;  %v1484_v0 = vmul.f32 0.35355338, %v1196_v62 }
 0x144   : > { %v6761_v1 = vpack.c.bf16 %v1486_v63, %v1485_v57 }
 0x145   : > { %v6768_v5 = vpack.c.bf16 %v1484_v0, %v1483_v61  ;;  %v5310_v7 = vpop.f32.mrb[16].mxu0  ;;  %v1555_v26 = vsel %vm1511_vm2, %v6740_v37, 0 }
 0x146   : > { %5331 = vmatpush3.bf16.xpose.msra.mxu1 %v1546_v24  ;;  %v1417_v8 = vadd.f32 %v5310_v7, %v4970_v3  ;;  %v1408_v10 = vpop.f32.mrb[17].mxu0  ;;  %v1558_v24 = vsel %vm1511_vm2, %v6737_v34, 0 }
 0x147   : > { %5668 = vmatprep.subr.msk.bf16.mxu1 %vm1511_vm2, %v6718_v9  ;;  %v1409_v11 = vadd.f32 %v4970_v3, %v1408_v10  ;;  %v5311_v40 = vpop.f32.mrb[18].mxu0 }
 0x148   : > { %v1420_v12 = vadd.f32 %v5311_v40, %v4970_v3  ;;  %v1411_v13 = vpop.f32.mrb[19].mxu0 }
 0x149   : > { %v1412_v15 = vadd.f32 %v4970_v3, %v1411_v13 }
 0x14a   : > { %v6772_v16 = vpack.c.bf16 %v1420_v12, %v1417_v8 }
 0x14b   : > { %v6776_v17 = vpack.c.bf16 %v1412_v15, %v1409_v11 }
 0x14d   : > { %v5314_v18 = vpop.f32.mrb[20].mxu0  ;;  %5356 = vmatprep.subr.bf16.mxu0 %v6776_v17 }
 0x14e   : > { %5333 = vmatpush3.bf16.xpose.msra.mxu1 %v1549_v60  ;;  %v1433_v19 = vadd.f32 %v5314_v18, %v4970_v3  ;;  %v1424_v20 = vpop.f32.mrb[21].mxu0  ;;  %5357 = vmatpush3.bf16.msra.mxu0 %v6776_v17 }
 0x14f   : > { %5669 = vmatprep.subr.msk.bf16.mxu1 %vm1511_vm2, %v6715_v6  ;;  %v1425_v21 = vadd.f32 %v4970_v3, %v1424_v20  ;;  %v5315_v22 = vpop.f32.mrb[22].mxu0  ;;  %5358 = vmatprep.subr.bf16.mxu0 %v6772_v16 }
 0x150   : > { %v1436_v23 = vadd.f32 %v5315_v22, %v4970_v3  ;;  %v1427_v25 = vpop.f32.mrb[23].mxu0 }
 0x151   : > { %v1428_v27 = vadd.f32 %v4970_v3, %v1427_v25 }
 0x152   : > { %v6783_v29 = vpack.c.bf16 %v1436_v23, %v1433_v19  ;;  %5359 = vmatpush3.bf16.msra.mxu0 %v6772_v16 }
 0x153   : > { %v6788_v31 = vpack.c.bf16 %v1428_v27, %v1425_v21 }
 0x155   : > { %v5318_v35 = vpop.f32.mrb[24].mxu0  ;;  %5360 = vmatprep.subr.bf16.mxu0 %v6788_v31 }
 0x156   : > { %5335 = vmatpush3.bf16.xpose.msra.mxu1 %v1552_v14  ;;  %v1449_v36 = vadd.f32 %v5318_v35, %v4970_v3  ;;  %v1440_v38 = vpop.f32.mrb[25].mxu0  ;;  %5361 = vmatpush3.bf16.msra.mxu0 %v6788_v31 }
 0x157   : > { %5670 = vmatprep.subr.msk.bf16.mxu1 %vm1511_vm2, %v6740_v37  ;;  %v1441_v39 = vadd.f32 %v4970_v3, %v1440_v38  ;;  %v5319_v41 = vpop.f32.mrb[26].mxu0  ;;  %5362 = vmatprep.subr.bf16.mxu0 %v6783_v29 }
 0x158   : > { %v1452_v42 = vadd.f32 %v5319_v41, %v4970_v3  ;;  %v1443_v43 = vpop.f32.mrb[27].mxu0 }
 0x159   : > { %v1444_v44 = vadd.f32 %v4970_v3, %v1443_v43 }
 0x15a   : > { %v6795_v46 = vpack.c.bf16 %v1452_v42, %v1449_v36  ;;  %5363 = vmatpush3.bf16.msra.mxu0 %v6783_v29 }
 0x15b   : > { %v6798_v47 = vpack.c.bf16 %v1444_v44, %v1441_v39 }
 0x15d   : > { %v5322_v49 = vpop.f32.mrb[28].mxu0  ;;  %5364 = vmatprep.subr.bf16.mxu0 %v6798_v47 }
 0x15e   : > { %5337 = vmatpush3.bf16.xpose.msra.mxu1 %v1555_v26  ;;  %v1465_v52 = vadd.f32 %v5322_v49, %v4970_v3  ;;  %v1456_v53 = vpop.f32.mrb[29].mxu0  ;;  %5365 = vmatpush3.bf16.msra.mxu0 %v6798_v47 }
 0x15f   : > { %5671 = vmatprep.subr.msk.bf16.mxu1 %vm1511_vm2, %v6737_v34  ;;  %v1457_v54 = vadd.f32 %v4970_v3, %v1456_v53  ;;  %v5323_v55 = vpop.f32.mrb[30].mxu0  ;;  %5366 = vmatprep.subr.bf16.mxu0 %v6795_v46 }
 0x160   : > { %v1468_v56 = vadd.f32 %v5323_v55, %v4970_v3  ;;  %v1459_v57 = vpop.f32.mrb[31].mxu0 }
 0x161   : > { %v1460_v58 = vadd.f32 %v4970_v3, %v1459_v57 }
 0x162   : > { %v6807_v59 = vpack.c.bf16 %v1468_v56, %v1465_v52  ;;  %5367 = vmatpush3.bf16.msra.mxu0 %v6795_v46 }
 0x163   : > { %v6810_v60 = vpack.c.bf16 %v1460_v58, %v1457_v54 }
 0x165   : > { %5368 = vmatprep.subr.bf16.mxu0 %v6810_v60 }
 0x166   : > { %5339 = vmatpush3.bf16.xpose.msra.mxu1 %v1558_v24  ;;  %5369 = vmatpush3.bf16.msra.mxu0 %v6810_v60 }
 0x167   : > { %5370 = vmatprep.subr.bf16.mxu0 %v6807_v59 }
 0x16a   : > { %5371 = vmatpush3.bf16.msra.mxu0 %v6807_v59 }
 0x16d   : > { %5341 = vmatmul.mubr.msk.bf16.vlgmr.msra.gmra.mrb[16].mxu1 %vm1511_vm2, %v6710_v2 }
 0x16e   : > { %5344 = vmatprep.mubr.msk.bf16.mxu1 %vm1511_vm2, %v6735_v30 }
 0x175   : > { %5345 = vmatmul.mubr.msk.bf16.gmra.mrb[20].mxu1 %vm1511_vm2, %v6732_v28 }
 0x176   : > { %5348 = vmatprep.mubr.msk.bf16.mxu1 %vm1511_vm2, %v6751_v51 }
 0x17d   : > { %5349 = vmatmul.mubr.msk.bf16.gmra.mrb[24].mxu1 %vm1511_vm2, %v6749_v50 }
 0x17e   : > { %5352 = vmatprep.mubr.msk.bf16.mxu1 %vm1511_vm2, %v6768_v5 }
 0x185   : > { %5353 = vmatmul.mubr.msk.bf16.gmra.mrb[28].mxu1 %vm1511_vm2, %v6761_v1 }
 0x19e   : > { %v6864_v21 = vpop.permute.xlu1 %1940 }
 0x19f   : > { %v6826_v61 = vpop.permute.xlu0 %1938 }
 0x1a0   : > { %5672 = vmatprep.subr.msk.bf16.mxu0 %vm1511_vm2, %v6826_v61 }
 0x240   : > { %v5342_v62 = vpop.f32.mrb[16].mxu1 }
 0x241   : > { %1661 = vmax.xlane.f32.xlu1 %v5342_v62  ;;  %v1594_v63 = vpop.f32.mrb[17].mxu1 }
 0x242   : > { %1657 = vmax.xlane.f32.xlu0 %v1594_v63  ;;  %v5343_v0 = vpop.f32.mrb[18].mxu1 }
 0x243   : > { %v1597_v3 = vpop.f32.mrb[19].mxu1 }
 0x245   : > { %1663 = vmax.xlane.f32.xlu1 %v5343_v0 }
 0x246   : > { %1659 = vmax.xlane.f32.xlu0 %v1597_v3 }
 0x248   : > { %v5346_v7 = vpop.f32.mrb[20].mxu1 }
 0x249   : > { %v6830_v8 = vpop.f32.mrb[21].mxu1 }
 0x24a   : > { %1669 = vmax.xlane.f32.xlu0 %v5346_v7  ;;  %v6832_v10 = vpop.f32.mrb[22].mxu1 }
 0x24b   : > { %1671 = vmax.xlane.f32.xlu1 %v6832_v10  ;;  %v6835_v11 = vpop.f32.mrb[23].mxu1 }
 0x24e   : > { %1665 = vmax.xlane.f32.xlu0 %v6830_v8 }
 0x24f   : > { %1667 = vmax.xlane.f32.xlu1 %v6835_v11 }
 0x250   : > { %v6839_v40 = vpop.f32.mrb[24].mxu1 }
 0x251   : > { %v6841_v12 = vpop.f32.mrb[25].mxu1 }
 0x252   : > { %1677 = vmax.xlane.f32.xlu0 %v6839_v40  ;;  %v6844_v13 = vpop.f32.mrb[26].mxu1 }
 0x253   : > { %1679 = vmax.xlane.f32.xlu1 %v6844_v13  ;;  %v6847_v14 = vpop.f32.mrb[27].mxu1 }
 0x256   : > { %1673 = vmax.xlane.f32.xlu0 %v6841_v12 }
 0x257   : > { %1675 = vmax.xlane.f32.xlu1 %v6847_v14 }
 0x258   : > { %v5354_v15 = vpop.f32.mrb[28].mxu1 }
 0x259   : > { %v6851_v18 = vpop.f32.mrb[29].mxu1 }
 0x25a   : > { %1685 = vmax.xlane.f32.xlu0 %v5354_v15  ;;  %v6853_v19 = vpop.f32.mrb[30].mxu1 }
 0x25b   : > { %v6855_v20 = vpop.f32.mrb[31].mxu1 }
 0x25e   : > { %1681 = vmax.xlane.f32.xlu0 %v6851_v18 }
 0x268   : > { %1944 = vrot.lane.b32.xlu1 %v6695_v45, %s6256_s18 }
 0x274   : > { %1942 = vrot.lane.b32.xlu0 %v6698_v48, %s6256_s18 }
 0x28c   : > { %1687 = vmax.xlane.f32.xlu1 %v6853_v19 }
 0x290   : > { %1683 = vmax.xlane.f32.xlu1 %v6855_v20 }
 0x2ce   : > { %v1662_v22 = vpop.xlane.xlu1 %1661 }
 0x2cf   : > { %v1691_v23 = vsub.f32 %v5342_v62, %v1662_v22  ;;  %v1658_v25 = vpop.xlane.xlu0 %1657 }
 0x2d0   : > { %v1689_v26 = vsub.f32 %v1594_v63, %v1658_v25 }
 0x2d1   : > { %v1709_v27 = vmul.f32 1.442695, %v1691_v23 }
 0x2d2   : > { %v1705_v35 = vmul.f32 1.442695, %v1689_v26  ;;  %v1664_v36 = vpop.xlane.xlu1 %1663 }
 0x2d3   : > { %5879 = vpow2.f32 %v1709_v27  ;;  %v1692_v38 = vsub.f32 %v5343_v0, %v1664_v36  ;;  %v1660_v39 = vpop.xlane.xlu0 %1659 }
 0x2d4   : > { %v1690_v41 = vsub.f32 %v1597_v3, %v1660_v39  ;;  %5881 = vpow2.f32 %v1705_v35 }
 0x2d5   : > { %v1711_v42 = vmul.f32 1.442695, %v1692_v38 }
 0x2d6   : > { %v1707_v43 = vmul.f32 1.442695, %v1690_v41 }
 0x2d7   : > { %5883 = vpow2.f32 %v1711_v42  ;;  %v1670_v53 = vpop.xlane.xlu0 %1669 }
 0x2d8   : > { %5885 = vpow2.f32 %v1707_v43  ;;  %v1672_v56 = vpop.xlane.xlu1 %1671  ;;  %v1695_v62 = vsub.f32 %v5346_v7, %v1670_v53 }
 0x2d9   : > { %v1696_v25 = vsub.f32 %v6832_v10, %v1672_v56 }
 0x2da   : > { %v1717_v3 = vmul.f32 1.442695, %v1695_v62 }
 0x2db   : > { %v1666_v54 = vpop.xlane.xlu0 %1665  ;;  %v1719_v38 = vmul.f32 1.442695, %v1696_v25 }
 0x2dc   : > { %v1668_v58 = vpop.xlane.xlu1 %1667  ;;  %v1693_v63 = vsub.f32 %v6830_v8, %v1666_v54  ;;  %5887 = vpow2.f32 %v1717_v3 }
 0x2dd   : > { %v6866_v24 = vpop.eup %5879  ;;  %v1694_v22 = vsub.f32 %v6835_v11, %v1668_v58 }
 0x2de   : > { %1741 = vadd.xlane.f32.xlu0 %v6866_v24  ;;  %v6869_v44 = vpop.eup %5881  ;;  %v1713_v26 = vmul.f32 1.442695, %v1693_v63 }
 0x2df   : > { %v1678_v55 = vpop.xlane.xlu0 %1677  ;;  %v1715_v27 = vmul.f32 1.442695, %v1694_v22 }
 0x2e0   : > { %v1680_v23 = vpop.xlane.xlu1 %1679  ;;  %5889 = vpow2.f32 %v1713_v26  ;;  %v1699_v39 = vsub.f32 %v6839_v40, %v1678_v55 }
 0x2e1   : > { %v6871_v49 = vpop.eup %5883  ;;  %5891 = vpow2.f32 %v1715_v27  ;;  %v1700_v40 = vsub.f32 %v6844_v13, %v1680_v23 }
 0x2e2   : > { %1737 = vadd.xlane.f32.xlu0 %v6869_v44  ;;  %1743 = vadd.xlane.f32.xlu1 %v6871_v49  ;;  %v6875_v52 = vpop.eup %5885  ;;  %5893 = vpow2.f32 %v1719_v38  ;;  %v1725_v42 = vmul.f32 1.442695, %v1699_v39 }
 0x2e3   : > { %v1674_v57 = vpop.xlane.xlu0 %1673  ;;  %v1727_v56 = vmul.f32 1.442695, %v1700_v40 }
 0x2e4   : > { %v1676_v41 = vpop.xlane.xlu1 %1675  ;;  %v1697_v11 = vsub.f32 %v6841_v12, %v1674_v57 }
 0x2e5   : > { %v1698_v57 = vsub.f32 %v6847_v14, %v1676_v41 }
 0x2e6   : > { %1739 = vadd.xlane.f32.xlu1 %v6875_v52  ;;  %v6890_v53 = vpop.eup %5887 }
 0x2e7   : > { %v1686_v0 = vpop.xlane.xlu0 %1685 }
 0x2e8   : > { %v1703_v35 = vsub.f32 %v5354_v15, %v1686_v0  ;;  %v6888_v43 = vpop.permute.xlu1 %1944  ;;  %v1721_v15 = vmul.f32 1.442695, %v1697_v11 }
 0x2ea   : > { %v1733_v7 = vmul.f32 1.442695, %v1703_v35  ;;  %v6894_v54 = vpop.eup %5889 }
 0x2eb   : > { %v1682_v36 = vpop.xlane.xlu0 %1681  ;;  %v6896_v55 = vpop.eup %5891 }
 0x2ec   : > { %v1701_v8 = vsub.f32 %v6851_v18, %v1682_v36  ;;  %5895 = vpow2.f32 %v1733_v7  ;;  %v6902_v62 = vpop.eup %5893 }
 0x2ed   : > { %5897 = vpow2.f32 %v1725_v42 }
 0x2ee   : > { %v1729_v10 = vmul.f32 1.442695, %v1701_v8 }
 0x2ef   : > { %v1943_v35 = vpop.permute.xlu0 %1942 }
 0x2f0   : > { %5899 = vpow2.f32 %v1729_v10 }
 0x2f1   : > { %5901 = vpow2.f32 %v1721_v15 }
 0x2f6   : > { %v6904_v63 = vpop.eup %5895 }
 0x2f7   : > { %1948 = vrot.lane.b32.xlu1 %v6715_v6, %s6256_s18  ;;  %v6909_v3 = vpop.eup %5897 }
 0x2f8   : > { %1946 = vrot.lane.b32.xlu0 %v6718_v9, %s6256_s18 }
 0x2fa   : > { %v6911_v22 = vpop.eup %5899 }
 0x2fb   : > { %v6915_v23 = vpop.eup %5901 }
 0x317   : > { %1749 = vadd.xlane.f32.xlu0 %v6890_v53 }
 0x319   : > { %v1688_v18 = vpop.xlane.xlu1 %1687 }
 0x31a   : > { %v1704_v12 = vsub.f32 %v6853_v19, %v1688_v18  ;;  %v1723_v19 = vmul.f32 1.442695, %v1698_v57  ;;  %v1979_v57 = vsel %vm1511_vm2, %v6826_v61, 0 }
 0x31b   : > { %1747 = vadd.xlane.f32.xlu0 %v6896_v55  ;;  %1745 = vadd.xlane.f32.xlu1 %v6894_v54 }
 0x31c   : > { %v1735_v58 = vmul.f32 1.442695, %v1704_v12 }
 0x31d   : > { %v1684_v13 = vpop.xlane.xlu1 %1683 }
 0x31e   : > { %5903 = vpow2.f32 %v1735_v58  ;;  %v1702_v0 = vsub.f32 %v6855_v20, %v1684_v13 }
 0x31f   : > { %1765 = vadd.xlane.f32.xlu0 %v6904_v63  ;;  %1751 = vadd.xlane.f32.xlu1 %v6902_v62  ;;  %5905 = vpow2.f32 %v1727_v56 }
 0x320   : > { %5907 = vpow2.f32 %v1723_v19  ;;  %v1731_v14 = vmul.f32 1.442695, %v1702_v0 }
 0x322   : > { %5909 = vpow2.f32 %v1731_v14 }
 0x323   : > { %1761 = vadd.xlane.f32.xlu0 %v6911_v22  ;;  %1757 = vadd.xlane.f32.xlu1 %v6909_v3 }
 0x327   : > { %1753 = vadd.xlane.f32.xlu1 %v6915_v23 }
 0x328   : > { %v6918_v25 = vpop.eup %5903 }
 0x329   : > { %1767 = vadd.xlane.f32.xlu0 %v6918_v25  ;;  %v6921_v20 = vpop.eup %5905 }
 0x32a   : > { %v6924_v26 = vpop.eup %5907 }
 0x32b   : > { %1759 = vadd.xlane.f32.xlu1 %v6921_v20 }
 0x32c   : > { %v6927_v27 = vpop.eup %5909 }
 0x32f   : > { %1755 = vadd.xlane.f32.xlu1 %v6924_v26 }
 0x333   : > { %1763 = vadd.xlane.f32.xlu1 %v6927_v27 }
 0x33f   : > { %1950 = vrot.lane.b32.xlu0 %v6740_v37, %s6256_s18 }
 0x343   : > { %1914 = vrot.lane.b32.xlu0 %v6713_v4, %s6256_s18 }
 0x344   : > { %1952 = vrot.lane.b32.xlu1 %v6737_v34, %s6256_s18 }
 0x347   : > { %1918 = vrot.lane.b32.xlu0 %v6735_v30, %s6256_s18 }
 0x348   : > { %1916 = vrot.lane.b32.xlu1 %v6710_v2, %s6256_s18 }
 0x34b   : > { %1922 = vrot.lane.b32.xlu0 %v6751_v51, %s6256_s18 }
 0x34c   : > { %1920 = vrot.lane.b32.xlu1 %v6732_v28, %s6256_s18 }
 0x34f   : > { %1926 = vrot.lane.b32.xlu0 %v6768_v5, %s6256_s18 }
 0x350   : > { %1924 = vrot.lane.b32.xlu1 %v6749_v50, %s6256_s18 }
 0x353   : > { %2259 = vrot.lane.b32.xlu0 %v6776_v17, %s6256_s18 }
 0x354   : > { %1928 = vrot.lane.b32.xlu1 %v6761_v1, %s6256_s18 }
 0x357   : > { %2263 = vrot.lane.b32.xlu0 %v6788_v31, %s6256_s18 }
 0x358   : > { %2261 = vrot.lane.b32.xlu1 %v6772_v16, %s6256_s18 }
 0x35b   : > { %2267 = vrot.lane.b32.xlu0 %v6798_v47, %s6256_s18 }
 0x35c   : > { %2265 = vrot.lane.b32.xlu1 %v6783_v29, %s6256_s18 }
 0x35f   : > { %2271 = vrot.lane.b32.xlu0 %v6810_v60, %s6256_s18 }
 0x360   : > { %2269 = vrot.lane.b32.xlu1 %v6795_v46, %s6256_s18 }
 0x363   : > { %2396 = vrot.lane.b32.xlu0 %v6672_v33, %s6257_s20 }
 0x364   : > { %2273 = vrot.lane.b32.xlu1 %v6807_v59, %s6256_s18 }
 0x368   : > { %2398 = vrot.lane.b32.xlu1 %v6670_v32, %s6257_s20 }
 0x36b   : > { %v1742_v36 = vpop.xlane.xlu0 %1741 }
 0x36f   : > { %v1738_v38 = vpop.xlane.xlu0 %1737  ;;  %v1744_v39 = vpop.xlane.xlu1 %1743 }
 0x370   : > { %5911 = vrcp.f32 %v1744_v39 }
 0x371   : > { %5913 = vrcp.f32 %v1738_v38 }
 0x372   : > { %5915 = vrcp.f32 %v1742_v36 }
 0x373   : > { %v1740_v41 = vpop.xlane.xlu1 %1739  ;;  %v1947_v61 = vpop.permute.xlu0 %1946 }
 0x374   : > { %5917 = vrcp.f32 %v1740_v41 }
 0x37a   : > { %v5912_v7 = vpop.eup %5911 }
 0x37b   : > { %v5914_v8 = vpop.eup %5913  ;;  %v1788_v10 = vmul.f32 %v5912_v7, %v6871_v49  ;;  %v1982_v49 = vsel %vm1511_vm2, %v6864_v21, 0 }
 0x37c   : > { %v5916_v42 = vpop.eup %5915  ;;  %v1785_v40 = vmul.f32 %v5914_v8, %v6869_v44  ;;  %v1985_v44 = vsel %vm1511_vm2, %v1943_v35, 0 }
 0x37d   : > { %v1787_v18 = vmul.f32 %v5916_v42, %v6866_v24  ;;  %v1988_v24 = vsel %vm1511_vm2, %v6888_v43, 0 }
 0x37e   : > { %v5918_v11 = vpop.eup %5917 }
 0x37f   : > { %v1786_v15 = vmul.f32 %v5918_v11, %v6875_v52  ;;  %v1802_v56 = vpack.c.bf16 %v1788_v10, %v1787_v18  ;;  %v1949_v52 = vpop.permute.xlu1 %1948 }
 0x380   : > { %v1994_v14 = vsel %vm1511_vm2, %v1949_v52, 0 }
 0x381   : > { %v1801_v12 = vpack.c.bf16 %v1786_v15, %v1785_v40 }
 0x383   : > { %5372 = vmatprep.mubr.bf16.mxu0 %v1801_v12 }
 0x384   : > { %5373 = vmatmul.mubr.bf16.vlgmr.msra.gmra.mrb[32].mxu0 %v1802_v56 }
 0x385   : > { %5389 = vmatpush3.bf16.xpose.msra.mxu0 %v1979_v57 }
 0x386   : > { %5673 = vmatprep.subr.msk.bf16.mxu0 %vm1511_vm2, %v6864_v21  ;;  %v1991_v21 = vsel %vm1511_vm2, %v1947_v61, 0 }
 0x38d   : > { %5391 = vmatpush3.bf16.xpose.msra.mxu0 %v1982_v49 }
 0x38e   : > { %5674 = vmatprep.subr.msk.bf16.mxu0 %vm1511_vm2, %v1943_v35 }
 0x395   : > { %5393 = vmatpush3.bf16.xpose.msra.mxu0 %v1985_v44 }
 0x396   : > { %5675 = vmatprep.subr.msk.bf16.mxu0 %vm1511_vm2, %v6888_v43 }
 0x39d   : > { %5395 = vmatpush3.bf16.xpose.msra.mxu0 %v1988_v24 }
 0x39e   : > { %5676 = vmatprep.subr.msk.bf16.mxu0 %vm1511_vm2, %v1947_v61 }
 0x3a4   : > { %v1750_v58 = vpop.xlane.xlu0 %1749 }
 0x3a5   : > { %5397 = vmatpush3.bf16.xpose.msra.mxu0 %v1991_v21 }
 0x3a6   : > { %5677 = vmatprep.subr.msk.bf16.mxu0 %vm1511_vm2, %v1949_v52 }
 0x3a8   : > { %v1748_v13 = vpop.xlane.xlu0 %1747  ;;  %v1746_v19 = vpop.xlane.xlu1 %1745 }
 0x3a9   : > { %5919 = vrcp.f32 %v1748_v13 }
 0x3aa   : > { %5921 = vrcp.f32 %v1746_v19 }
 0x3ab   : > { %5923 = vrcp.f32 %v1750_v58 }
 0x3ac   : > { %v1766_v0 = vpop.xlane.xlu0 %1765  ;;  %v1752_v43 = vpop.xlane.xlu1 %1751 }
 0x3ad   : > { %5399 = vmatpush3.bf16.xpose.msra.mxu0 %v1994_v14  ;;  %5925 = vrcp.f32 %v1752_v43 }
 0x3b0   : > { %v1758_v35 = vpop.xlane.xlu1 %1757  ;;  %v1762_v36 = vpop.xlane.xlu0 %1761 }
 0x3b3   : > { %v5920_v38 = vpop.eup %5919 }
 0x3b4   : > { %v5922_v39 = vpop.eup %5921  ;;  %v1754_v41 = vpop.xlane.xlu1 %1753  ;;  %v1790_v7 = vmul.f32 %v5920_v38, %v6896_v55 }
 0x3b5   : > { %v1789_v8 = vmul.f32 %v5922_v39, %v6894_v54  ;;  %v5924_v42 = vpop.eup %5923 }
 0x3b6   : > { %v1768_v11 = vpop.xlane.xlu0 %1767  ;;  %v1791_v18 = vmul.f32 %v5924_v42, %v6890_v53 }
 0x3b7   : > { %v1803_v10 = vpack.c.bf16 %v1790_v7, %v1789_v8  ;;  %v5926_v40 = vpop.eup %5925 }
 0x3b8   : > { %v1760_v15 = vpop.xlane.xlu1 %1759  ;;  %v1792_v12 = vmul.f32 %v5926_v40, %v6902_v62 }
 0x3b9   : > { %5376 = vmatprep.mubr.bf16.mxu0 %v1803_v10  ;;  %5927 = vrcp.f32 %v1760_v15 }
 0x3ba   : > { %v1951_v56 = vpop.permute.xlu0 %1950  ;;  %5929 = vrcp.f32 %v1754_v41  ;;  %v1804_v57 = vpack.c.bf16 %v1792_v12, %v1791_v18 }
 0x3bb   : > { %5678 = vmatprep.subr.msk.bf16.mxu0 %vm1511_vm2, %v1951_v56  ;;  %v1997_v55 = vsel %vm1511_vm2, %v1951_v56, 0  ;;  %5931 = vrcp.f32 %v1758_v35 }
 0x3bc   : > { %5401 = vmatpush3.bf16.xpose.msra.mxu0 %v1997_v55  ;;  %v1756_v54 = vpop.xlane.xlu1 %1755 }
 0x3bd   : > { %5377 = vmatmul.mubr.bf16.gmra.mrb[36].mxu0 %v1804_v57  ;;  %5933 = vrcp.f32 %v1756_v54 }
 0x3be   : > { %v1915_v49 = vpop.permute.xlu0 %1914  ;;  %5935 = vrcp.f32 %v1762_v36 }
 0x3c0   : > { %v1764_v44 = vpop.xlane.xlu1 %1763 }
 0x3c1   : > { %5937 = vrcp.f32 %v1764_v44 }
 0x3c2   : > { %5939 = vrcp.f32 %v1768_v11  ;;  %v1919_v53 = vpop.permute.xlu0 %1918 }
 0x3c3   : > { %v5928_v62 = vpop.eup %5927  ;;  %5941 = vrcp.f32 %v1766_v0 }
 0x3c4   : > { %v1953_v24 = vpop.permute.xlu1 %1952  ;;  %v5930_v61 = vpop.eup %5929  ;;  %v1796_v19 = vmul.f32 %v5928_v62, %v6921_v20 }
 0x3c5   : > { %5679 = vmatprep.subr.msk.bf16.mxu0 %vm1511_vm2, %v1953_v24  ;;  %v2000_v52 = vsel %vm1511_vm2, %v1953_v24, 0  ;;  %v5932_v58 = vpop.eup %5931  ;;  %v1793_v43 = vmul.f32 %v5930_v61, %v6915_v23 }
 0x3c6   : > { %v1923_v21 = vpop.permute.xlu0 %1922  ;;  %5403 = vmatpush3.bf16.xpose.msra.mxu0 %v2000_v52  ;;  %v1795_v0 = vmul.f32 %v5932_v58, %v6909_v3 }
 0x3c7   : > { %v5934_v13 = vpop.eup %5933 }
 0x3c8   : > { %v1917_v14 = vpop.permute.xlu1 %1916  ;;  %v1794_v35 = vmul.f32 %v5934_v13, %v6924_v26  ;;  %v5936_v36 = vpop.eup %5935  ;;  %v1806_v7 = vpack.c.bf16 %v1796_v19, %v1795_v0 }
 0x3c9   : > { %v1797_v11 = vmul.f32 %v5936_v36, %v6911_v22 }
 0x3ca   : > { %v1927_v38 = vpop.permute.xlu0 %1926  ;;  %v1805_v39 = vpack.c.bf16 %v1794_v35, %v1793_v43 }
 0x3cb   : > { %v5938_v41 = vpop.eup %5937 }
 0x3cc   : > { %v5940_v8 = vpop.eup %5939  ;;  %5380 = vmatprep.mubr.bf16.mxu0 %v1805_v39  ;;  %v1921_v42 = vpop.permute.xlu1 %1920  ;;  %v1798_v10 = vmul.f32 %v5938_v41, %v6927_v27 }
 0x3cd   : > { %5381 = vmatmul.mubr.bf16.gmra.mrb[40].mxu0 %v1806_v7  ;;  %v5942_v20 = vpop.eup %5941  ;;  %v1800_v26 = vmul.f32 %v5940_v8, %v6918_v25 }
 0x3ce   : > { %v2260_v40 = vpop.permute.xlu0 %2259  ;;  %v1807_v23 = vpack.c.bf16 %v1798_v10, %v1797_v11  ;;  %v1799_v15 = vmul.f32 %v5942_v20, %v6904_v63 }
 0x3cf   : > { %5420 = vmatprep.subr.bf16.mxu1 %v2260_v40 }
 0x3d0   : > { %5384 = vmatprep.mubr.bf16.mxu0 %v1807_v23  ;;  %v1925_v3 = vpop.permute.xlu1 %1924  ;;  %5421 = vmatpush3.bf16.msra.mxu1 %v2260_v40  ;;  %v1808_v18 = vpack.c.bf16 %v1800_v26, %v1799_v15 }
 0x3d2   : > { %v2264_v27 = vpop.permute.xlu0 %2263 }
 0x3d4   : > { %v1929_v12 = vpop.permute.xlu1 %1928 }
 0x3d5   : > { %5385 = vmatmul.mubr.bf16.gmra.mrb[44].mxu0 %v1808_v18 }
 0x3d6   : > { %5404 = vmatprep.mubr.msk.bf16.mxu0 %vm1511_vm2, %v1915_v49  ;;  %v2268_v25 = vpop.permute.xlu0 %2267 }
 0x3d8   : > { %v2262_v22 = vpop.permute.xlu1 %2261 }
 0x3d9   : > { %5422 = vmatprep.subr.bf16.mxu1 %v2262_v22 }
 0x3da   : > { %5423 = vmatpush3.bf16.msra.mxu1 %v2262_v22  ;;  %v2272_v57 = vpop.permute.xlu0 %2271 }
 0x3db   : > { %5424 = vmatprep.subr.bf16.mxu1 %v2264_v27 }
 0x3dc   : > { %v2266_v56 = vpop.permute.xlu1 %2265 }
 0x3dd   : > { %5405 = vmatmul.mubr.msk.bf16.vlgmr.msra.gmra.mrb[48].mxu0 %vm1511_vm2, %v1917_v14 }
 0x3de   : > { %5408 = vmatprep.mubr.msk.bf16.mxu0 %vm1511_vm2, %v1919_v53  ;;  %5425 = vmatpush3.bf16.msra.mxu1 %v2264_v27  ;;  %v7013_v54 = vpop.permute.xlu0 %2396 }
 0x3df   : > { %5426 = vmatprep.subr.bf16.mxu1 %v2266_v56 }
 0x3e0   : > { %v2270_v63 = vpop.permute.xlu1 %2269 }
 0x3e2   : > { %5427 = vmatpush3.bf16.msra.mxu1 %v2266_v56 }
 0x3e3   : > { %5428 = vmatprep.subr.bf16.mxu1 %v2268_v25 }
 0x3e4   : > { %v2274_v55 = vpop.permute.xlu1 %2273 }
 0x3e5   : > { %5409 = vmatmul.mubr.msk.bf16.gmra.mrb[52].mxu0 %vm1511_vm2, %v1921_v42 }
 0x3e6   : > { %5412 = vmatprep.mubr.msk.bf16.mxu0 %vm1511_vm2, %v1923_v21  ;;  %5429 = vmatpush3.bf16.msra.mxu1 %v2268_v25 }
 0x3e7   : > { %5430 = vmatprep.subr.bf16.mxu1 %v2270_v63 }
 0x3e8   : > { %v7087_v22 = vpop.permute.xlu1 %2398 }
 0x3ea   : > { %5431 = vmatpush3.bf16.msra.mxu1 %v2270_v63 }
 0x3eb   : > { %5432 = vmatprep.subr.bf16.mxu1 %v2272_v57 }
 0x3ed   : > { %5413 = vmatmul.mubr.msk.bf16.gmra.mrb[56].mxu0 %vm1511_vm2, %v1925_v3 }
 0x3ee   : > { %5416 = vmatprep.mubr.msk.bf16.mxu0 %vm1511_vm2, %v1927_v38  ;;  %5433 = vmatpush3.bf16.msra.mxu1 %v2272_v57 }
 0x3ef   : > { %5434 = vmatprep.subr.bf16.mxu1 %v2274_v55 }
 0x3f2   : > { %5435 = vmatpush3.bf16.msra.mxu1 %v2274_v55 }
 0x3f3   : > { %5680 = vmatprep.subr.msk.bf16.mxu1 %vm1511_vm2, %v7013_v54 }
 0x3f5   : > { %5417 = vmatmul.mubr.msk.bf16.gmra.mrb[60].mxu0 %vm1511_vm2, %v1929_v12 }
 0x457   : > { %v7018_v49 = vpop.f32.mrb[32].mxu0 }
 0x458   : > { %8561 = vst [vmem:[#allocation12_spill] sm:$0xff] %v7018_v49  ;;  %v7020_v44 = vpop.f32.mrb[33].mxu0 }
 0x459   : > { %8562 = vst [vmem:[#allocation13_spill] sm:$0xff] %v7020_v44  ;;  %v7022_v53 = vpop.f32.mrb[34].mxu0 }
 0x45a   : > { %8563 = vst [vmem:[#allocation14_spill] sm:$0xff] %v7022_v53  ;;  %v7024_v62 = vpop.f32.mrb[35].mxu0 }
 0x45b   : > { %8564 = vst [vmem:[#allocation15_spill] sm:$0xff] %v7024_v62 }
 0x490   : > { %v7026_v24 = vpop.f32.mrb[36].mxu0 }
 0x491   : > { %8565 = vst [vmem:[#allocation16_spill] sm:$0xff] %v7026_v24  ;;  %v7028_v61 = vpop.f32.mrb[37].mxu0 }
 0x492   : > { %8566 = vst [vmem:[#allocation17_spill] sm:$0xff] %v7028_v61  ;;  %v7030_v52 = vpop.f32.mrb[38].mxu0 }
 0x493   : > { %8567 = vst [vmem:[#allocation18_spill] sm:$0xff] %v7030_v52  ;;  %v7032_v58 = vpop.f32.mrb[39].mxu0 }
 0x494   : > { %8568 = vst [vmem:[#allocation19_spill] sm:$0xff] %v7032_v58 }
 0x4a0   : > { %v7034_v21 = vpop.f32.mrb[40].mxu0 }
 0x4a1   : > { %8569 = vst [vmem:[#allocation20_spill] sm:$0xff] %v7034_v21  ;;  %v7036_v13 = vpop.f32.mrb[41].mxu0 }
 0x4a2   : > { %8570 = vst [vmem:[#allocation21_spill] sm:$0xff] %v7036_v13  ;;  %v7038_v19 = vpop.f32.mrb[42].mxu0 }
 0x4a3   : > { %8571 = vst [vmem:[#allocation22_spill] sm:$0xff] %v7038_v19  ;;  %v7040_v14 = vpop.f32.mrb[43].mxu0 }
 0x4a4   : > { %8572 = vst [vmem:[#allocation23_spill] sm:$0xff] %v7040_v14 }
 0x4a8   : > { %v7042_v43 = vpop.f32.mrb[44].mxu0 }
 0x4a9   : > { %8573 = vst [vmem:[#allocation24_spill] sm:$0xff] %v7042_v43  ;;  %v7044_v35 = vpop.f32.mrb[45].mxu0 }
 0x4aa   : > { %8574 = vst [vmem:[#allocation25_spill] sm:$0xff] %v7044_v35  ;;  %v7046_v36 = vpop.f32.mrb[46].mxu0 }
 0x4ab   : > { %8575 = vst [vmem:[#allocation26_spill] sm:$0xff] %v7046_v36  ;;  %v7048_v0 = vpop.f32.mrb[47].mxu0 }
 0x4ac   : > { %8576 = vst [vmem:[#allocation27_spill] sm:$0xff] %v7048_v0 }
 0x4b0   : > { %v5406_v38 = vpop.f32.mrb[48].mxu0 }
 0x4b1   : > { %2103 = vmax.xlane.f32.xlu0 %v5406_v38  ;;  %v2036_v39 = vpop.f32.mrb[49].mxu0 }
 0x4b2   : > { %v5407_v41 = vpop.f32.mrb[50].mxu0 }
 0x4b3   : > { %v2039_v7 = vpop.f32.mrb[51].mxu0 }
 0x4b4   : > { %2101 = vmax.xlane.f32.xlu1 %v2039_v7 }
 0x4b5   : > { %2099 = vmax.xlane.f32.xlu0 %v2036_v39 }
 0x4b8   : > { %v5410_v8 = vpop.f32.mrb[52].mxu0 }
 0x4b9   : > { %2105 = vmax.xlane.f32.xlu0 %v5407_v41  ;;  %v7050_v42 = vpop.f32.mrb[53].mxu0 }
 0x4ba   : > { %v7052_v11 = vpop.f32.mrb[54].mxu0 }
 0x4bb   : > { %2113 = vmax.xlane.f32.xlu1 %v7052_v11  ;;  %v7055_v10 = vpop.f32.mrb[55].mxu0 }
 0x4bd   : > { %2111 = vmax.xlane.f32.xlu0 %v5410_v8 }
 0x4bf   : > { %2109 = vmax.xlane.f32.xlu1 %v7055_v10 }
 0x4c0   : > { %v7058_v20 = vpop.f32.mrb[56].mxu0 }
 0x4c1   : > { %2107 = vmax.xlane.f32.xlu0 %v7050_v42  ;;  %v7061_v40 = vpop.f32.mrb[57].mxu0 }
 0x4c2   : > { %v7063_v23 = vpop.f32.mrb[58].mxu0 }
 0x4c3   : > { %2121 = vmax.xlane.f32.xlu1 %v7063_v23  ;;  %v7066_v26 = vpop.f32.mrb[59].mxu0 }
 0x4c5   : > { %2119 = vmax.xlane.f32.xlu0 %v7058_v20 }
 0x4c7   : > { %2117 = vmax.xlane.f32.xlu1 %v7066_v26 }
 0x4c8   : > { %v7070_v3 = vpop.f32.mrb[60].mxu0 }
 0x4c9   : > { %2115 = vmax.xlane.f32.xlu0 %v7061_v40  ;;  %v7073_v15 = vpop.f32.mrb[61].mxu0 }
 0x4ca   : > { %v7075_v18 = vpop.f32.mrb[62].mxu0 }
 0x4cb   : > { %v7077_v12 = vpop.f32.mrb[63].mxu0 }
 0x4cd   : > { %2127 = vmax.xlane.f32.xlu0 %v7070_v3 }
 0x4d1   : > { %2123 = vmax.xlane.f32.xlu0 %v7073_v15 }
 0x4d8   : > { %2402 = vrot.lane.b32.xlu1 %v6695_v45, %s6257_s20 }
 0x4e7   : > { %2400 = vrot.lane.b32.xlu0 %v6698_v48, %s6257_s20 }
 0x4fc   : > { %2129 = vmax.xlane.f32.xlu1 %v7075_v18 }
 0x500   : > { %2125 = vmax.xlane.f32.xlu1 %v7077_v12 }
 0x53e   : > { %v2104_v27 = vpop.xlane.xlu0 %2103 }
 0x53f   : > { %v2133_v56 = vsub.f32 %v5406_v38, %v2104_v27 }
 0x541   : > { %v2151_v25 = vmul.f32 1.442695, %v2133_v56  ;;  %v2102_v63 = vpop.xlane.xlu1 %2101 }
 0x542   : > { %v2132_v57 = vsub.f32 %v2039_v7, %v2102_v63  ;;  %v2100_v55 = vpop.xlane.xlu0 %2099 }
 0x543   : > { %5943 = vpow2.f32 %v2151_v25  ;;  %v2131_v35 = vsub.f32 %v2036_v39, %v2100_v55 }
 0x544   : > { %v2149_v0 = vmul.f32 1.442695, %v2132_v57 }
 0x545   : > { %v2147_v43 = vmul.f32 1.442695, %v2131_v35 }
 0x546   : > { %5945 = vpow2.f32 %v2149_v0  ;;  %v2106_v36 = vpop.xlane.xlu0 %2105 }
 0x547   : > { %5947 = vpow2.f32 %v2147_v43  ;;  %v2134_v13 = vsub.f32 %v5407_v41, %v2106_v36 }
 0x549   : > { %v2153_v14 = vmul.f32 1.442695, %v2134_v13 }
 0x54a   : > { %v2112_v43 = vpop.xlane.xlu0 %2111 }
 0x54b   : > { %5949 = vpow2.f32 %v2153_v14  ;;  %v2114_v14 = vpop.xlane.xlu1 %2113  ;;  %v2137_v36 = vsub.f32 %v5410_v8, %v2112_v43 }
 0x54c   : > { %v2138_v57 = vsub.f32 %v7052_v11, %v2114_v14 }
 0x54d   : > { %v7089_v21 = vpop.eup %5943  ;;  %v2159_v7 = vmul.f32 1.442695, %v2137_v36 }
 0x54e   : > { %2183 = vadd.xlane.f32.xlu1 %v7089_v21  ;;  %v2108_v13 = vpop.xlane.xlu0 %2107  ;;  %v2161_v52 = vmul.f32 1.442695, %v2138_v57 }
 0x54f   : > { %v2110_v0 = vpop.xlane.xlu1 %2109  ;;  %v2135_v27 = vsub.f32 %v7050_v42, %v2108_v13  ;;  %5951 = vpow2.f32 %v2159_v7 }
 0x550   : > { %v7092_v19 = vpop.eup %5945  ;;  %v2136_v56 = vsub.f32 %v7055_v10, %v2110_v0 }
 0x551   : > { %v7094_v38 = vpop.eup %5947  ;;  %2181 = vadd.xlane.f32.xlu0 %v7092_v19  ;;  %v2155_v55 = vmul.f32 1.442695, %v2135_v27 }
 0x552   : > { %2179 = vadd.xlane.f32.xlu1 %v7094_v38  ;;  %v2120_v35 = vpop.xlane.xlu0 %2119  ;;  %v2157_v61 = vmul.f32 1.442695, %v2136_v56 }
 0x553   : > { %v2122_v25 = vpop.xlane.xlu1 %2121  ;;  %v2141_v58 = vsub.f32 %v7058_v20, %v2120_v35  ;;  %5953 = vpow2.f32 %v2155_v55 }
 0x554   : > { %5955 = vpow2.f32 %v2157_v61  ;;  %v2142_v11 = vsub.f32 %v7063_v23, %v2122_v25 }
 0x555   : > { %v7098_v39 = vpop.eup %5949  ;;  %v2167_v43 = vmul.f32 1.442695, %v2141_v58  ;;  %5957 = vpow2.f32 %v2161_v52 }
 0x556   : > { %2185 = vadd.xlane.f32.xlu1 %v7098_v39  ;;  %v2116_v41 = vpop.xlane.xlu0 %2115  ;;  %v2169_v58 = vmul.f32 1.442695, %v2142_v11 }
 0x557   : > { %v2118_v24 = vpop.xlane.xlu1 %2117  ;;  %v2139_v42 = vsub.f32 %v7061_v40, %v2116_v41  ;;  %5959 = vpow2.f32 %v2167_v43 }
 0x558   : > { %v2140_v40 = vsub.f32 %v7066_v26, %v2118_v24 }
 0x559   : > { %v2163_v14 = vmul.f32 1.442695, %v2139_v42  ;;  %v7113_v0 = vpop.eup %5951 }
 0x55a   : > { %v2128_v63 = vpop.xlane.xlu0 %2127  ;;  %v2165_v35 = vmul.f32 1.442695, %v2140_v40 }
 0x55b   : > { %v2145_v8 = vsub.f32 %v7070_v3, %v2128_v63  ;;  %v7115_v20 = vpop.permute.xlu1 %2402 }
 0x55d   : > { %v2175_v10 = vmul.f32 1.442695, %v2145_v8  ;;  %v7119_v52 = vpop.eup %5953 }
 0x55e   : > { %v2124_v13 = vpop.xlane.xlu0 %2123 }
 0x55f   : > { %v2143_v36 = vsub.f32 %v7073_v15, %v2124_v13  ;;  %5961 = vpow2.f32 %v2175_v10  ;;  %v7121_v15 = vpop.eup %5955 }
 0x560   : > { %5963 = vpow2.f32 %v2163_v14  ;;  %v7126_v7 = vpop.eup %5957 }
 0x561   : > { %v2171_v61 = vmul.f32 1.442695, %v2143_v36  ;;  %v7128_v24 = vpop.eup %5959 }
 0x562   : > { %v2401_v43 = vpop.permute.xlu0 %2400 }
 0x563   : > { %5965 = vpow2.f32 %v2171_v61 }
 0x564   : > { %5967 = vpow2.f32 %v2169_v58 }
 0x567   : > { %2406 = vrot.lane.b32.xlu1 %v6715_v6, %s6257_s20  ;;  %2404 = vrot.lane.b32.xlu0 %v6718_v9, %s6257_s20 }
 0x569   : > { %v7133_v56 = vpop.eup %5961 }
 0x56a   : > { %v7135_v25 = vpop.eup %5963 }
 0x56d   : > { %v7139_v63 = vpop.eup %5965 }
 0x56e   : > { %v7141_v57 = vpop.eup %5967 }
 0x586   : > { %2191 = vadd.xlane.f32.xlu0 %v7113_v0 }
 0x589   : > { %v2130_v3 = vpop.xlane.xlu1 %2129 }
 0x58a   : > { %v2146_v23 = vsub.f32 %v7075_v18, %v2130_v3  ;;  %2187 = vadd.xlane.f32.xlu0 %v7119_v52 }
 0x58b   : > { %2189 = vadd.xlane.f32.xlu1 %v7121_v15 }
 0x58c   : > { %v2177_v41 = vmul.f32 1.442695, %v2146_v23 }
 0x58d   : > { %v2126_v27 = vpop.xlane.xlu1 %2125 }
 0x58e   : > { %5969 = vpow2.f32 %v2177_v41  ;;  %v2144_v26 = vsub.f32 %v7077_v12, %v2126_v27  ;;  %2193 = vadd.xlane.f32.xlu0 %v7126_v7  ;;  %v2437_v41 = vsel %vm1511_vm2, %v7013_v54, 0 }
 0x58f   : > { %2199 = vadd.xlane.f32.xlu1 %v7128_v24  ;;  %5971 = vpow2.f32 %v2165_v35 }
 0x590   : > { %v2173_v18 = vmul.f32 1.442695, %v2144_v26 }
 0x592   : > { %2207 = vadd.xlane.f32.xlu0 %v7133_v56  ;;  %5973 = vpow2.f32 %v2173_v18 }
 0x593   : > { %2195 = vadd.xlane.f32.xlu1 %v7135_v25 }
 0x596   : > { %2203 = vadd.xlane.f32.xlu0 %v7139_v63 }
 0x597   : > { %2201 = vadd.xlane.f32.xlu1 %v7141_v57 }
 0x598   : > { %v7145_v12 = vpop.eup %5969 }
 0x599   : > { %v7147_v55 = vpop.eup %5971 }
 0x59a   : > { %2209 = vadd.xlane.f32.xlu0 %v7145_v12 }
 0x59b   : > { %2197 = vadd.xlane.f32.xlu1 %v7147_v55 }
 0x59c   : > { %v7151_v8 = vpop.eup %5973 }
 0x59f   : > { %2205 = vadd.xlane.f32.xlu1 %v7151_v8 }
 0x5b0   : > { %2408 = vrot.lane.b32.xlu0 %v6740_v37, %s6257_s20  ;;  %2410 = vrot.lane.b32.xlu1 %v6737_v34, %s6257_s20 }
 0x5b4   : > { %2380 = vrot.lane.b32.xlu0 %v6713_v4, %s6257_s20  ;;  %2382 = vrot.lane.b32.xlu1 %v6710_v2, %s6257_s20 }
 0x5b8   : > { %2384 = vrot.lane.b32.xlu0 %v6735_v30, %s6257_s20  ;;  %2386 = vrot.lane.b32.xlu1 %v6732_v28, %s6257_s20 }
 0x5bc   : > { %2388 = vrot.lane.b32.xlu0 %v6751_v51, %s6257_s20  ;;  %2390 = vrot.lane.b32.xlu1 %v6749_v50, %s6257_s20 }
 0x5c0   : > { %2392 = vrot.lane.b32.xlu0 %v6768_v5, %s6257_s20  ;;  %2394 = vrot.lane.b32.xlu1 %v6761_v1, %s6257_s20 }
 0x5c4   : > { %2709 = vrot.lane.b32.xlu0 %v6776_v17, %s6257_s20  ;;  %2711 = vrot.lane.b32.xlu1 %v6772_v16, %s6257_s20 }
 0x5c8   : > { %2713 = vrot.lane.b32.xlu0 %v6788_v31, %s6257_s20  ;;  %2715 = vrot.lane.b32.xlu1 %v6783_v29, %s6257_s20 }
 0x5cc   : > { %2717 = vrot.lane.b32.xlu0 %v6798_v47, %s6257_s20  ;;  %2719 = vrot.lane.b32.xlu1 %v6795_v46, %s6257_s20 }
 0x5d0   : > { %2721 = vrot.lane.b32.xlu0 %v6810_v60, %s6257_s20  ;;  %2723 = vrot.lane.b32.xlu1 %v6807_v59, %s6257_s20 }
 0x5d4   : > { %2846 = vrot.lane.b32.xlu0 %v6672_v33, %s6258_s21  ;;  %2848 = vrot.lane.b32.xlu1 %v6670_v32, %s6258_s21 }
 0x5db   : > { %v2184_v42 = vpop.xlane.xlu1 %2183 }
 0x5de   : > { %v2182_v13 = vpop.xlane.xlu0 %2181 }
 0x5df   : > { %5975 = vrcp.f32 %v2182_v13  ;;  %v2180_v10 = vpop.xlane.xlu1 %2179 }
 0x5e0   : > { %5977 = vrcp.f32 %v2180_v10 }
 0x5e1   : > { %5979 = vrcp.f32 %v2184_v42 }
 0x5e2   : > { %v2405_v54 = vpop.permute.xlu0 %2404 }
 0x5e3   : > { %v2186_v36 = vpop.xlane.xlu1 %2185  ;;  %v2449_v27 = vsel %vm1511_vm2, %v2405_v54, 0 }
 0x5e4   : > { %5981 = vrcp.f32 %v2186_v36 }
 0x5e9   : > { %v5976_v11 = vpop.eup %5975 }
 0x5ea   : > { %v5978_v14 = vpop.eup %5977  ;;  %v2228_v61 = vmul.f32 %v5976_v11, %v7092_v19  ;;  %v2440_v19 = vsel %vm1511_vm2, %v7087_v22, 0 }
 0x5eb   : > { %v2227_v58 = vmul.f32 %v5978_v14, %v7094_v38  ;;  %v5980_v40 = vpop.eup %5979  ;;  %v2446_v38 = vsel %vm1511_vm2, %v7115_v20, 0 }
 0x5ec   : > { %v2229_v32 = vmul.f32 %v5980_v40, %v7089_v21  ;;  %v2443_v21 = vsel %vm1511_vm2, %v2401_v43, 0 }
 0x5ed   : > { %v2243_v33 = vpack.c.bf16 %v2228_v61, %v2227_v58 }
 0x5ee   : > { %v5982_v3 = vpop.eup %5981 }
 0x5ef   : > { %v2230_v23 = vmul.f32 %v5982_v3, %v7098_v39  ;;  %5436 = vmatprep.mubr.bf16.mxu1 %v2243_v33 }
 0x5f1   : > { %v2244_v35 = vpack.c.bf16 %v2230_v23, %v2229_v32 }
 0x5f3   : > { %5437 = vmatmul.mubr.bf16.vlgmr.msra.gmra.mrb[32].mxu1 %v2244_v35 }
 0x5f4   : > { %5453 = vmatpush3.bf16.xpose.msra.mxu1 %v2437_v41 }
 0x5f5   : > { %5681 = vmatprep.subr.msk.bf16.mxu1 %vm1511_vm2, %v7087_v22  ;;  %v2407_v22 = vpop.permute.xlu1 %2406 }
 0x5f6   : > { %v2452_v42 = vsel %vm1511_vm2, %v2407_v22, 0 }
 0x5fc   : > { %5455 = vmatpush3.bf16.xpose.msra.mxu1 %v2440_v19 }
 0x5fd   : > { %5682 = vmatprep.subr.msk.bf16.mxu1 %vm1511_vm2, %v2401_v43 }
 0x604   : > { %5457 = vmatpush3.bf16.xpose.msra.mxu1 %v2443_v21 }
 0x605   : > { %5683 = vmatprep.subr.msk.bf16.mxu1 %vm1511_vm2, %v7115_v20 }
 0x60c   : > { %5459 = vmatpush3.bf16.xpose.msra.mxu1 %v2446_v38 }
 0x60d   : > { %5684 = vmatprep.subr.msk.bf16.mxu1 %vm1511_vm2, %v2405_v54 }
 0x613   : > { %v2192_v39 = vpop.xlane.xlu0 %2191 }
 0x614   : > { %5461 = vmatpush3.bf16.xpose.msra.mxu1 %v2449_v27 }
 0x615   : > { %5685 = vmatprep.subr.msk.bf16.mxu1 %vm1511_vm2, %v2407_v22 }
 0x617   : > { %v2188_v26 = vpop.xlane.xlu0 %2187 }
 0x618   : > { %5983 = vrcp.f32 %v2188_v26  ;;  %v2190_v18 = vpop.xlane.xlu1 %2189 }
 0x619   : > { %5985 = vrcp.f32 %v2190_v18 }
 0x61a   : > { %5987 = vrcp.f32 %v2192_v39 }
 0x61b   : > { %v2194_v43 = vpop.xlane.xlu0 %2193 }
 0x61c   : > { %5989 = vrcp.f32 %v2194_v43  ;;  %5463 = vmatpush3.bf16.xpose.msra.mxu1 %v2452_v42  ;;  %v2200_v20 = vpop.xlane.xlu1 %2199 }
 0x61f   : > { %v2208_v13 = vpop.xlane.xlu0 %2207 }
 0x620   : > { %v2196_v10 = vpop.xlane.xlu1 %2195 }
 0x622   : > { %v5984_v36 = vpop.eup %5983 }
 0x623   : > { %v5986_v11 = vpop.eup %5985  ;;  %v2204_v14 = vpop.xlane.xlu0 %2203  ;;  %v2231_v61 = vmul.f32 %v5984_v36, %v7119_v52 }
 0x624   : > { %v5988_v58 = vpop.eup %5987  ;;  %v2202_v40 = vpop.xlane.xlu1 %2201  ;;  %v2232_v33 = vmul.f32 %v5986_v11, %v7121_v15 }
 0x625   : > { %5991 = vrcp.f32 %v2202_v40  ;;  %v2233_v35 = vmul.f32 %v5988_v58, %v7113_v0 }
 0x626   : > { %v5990_v3 = vpop.eup %5989  ;;  %v2245_v32 = vpack.c.bf16 %v2232_v33, %v2231_v61  ;;  %5993 = vrcp.f32 %v2196_v10 }
 0x627   : > { %v2210_v23 = vpop.xlane.xlu0 %2209  ;;  %v2234_v41 = vmul.f32 %v5990_v3, %v7126_v7  ;;  %5995 = vrcp.f32 %v2200_v20 }
 0x628   : > { %5440 = vmatprep.mubr.bf16.mxu1 %v2245_v32  ;;  %v2198_v19 = vpop.xlane.xlu1 %2197 }
 0x629   : > { %5997 = vrcp.f32 %v2198_v19  ;;  %v2246_v21 = vpack.c.bf16 %v2234_v41, %v2233_v35 }
 0x62a   : > { %5999 = vrcp.f32 %v2204_v14 }
 0x62b   : > { %v2409_v52 = vpop.permute.xlu0 %2408  ;;  %5441 = vmatmul.mubr.bf16.gmra.mrb[36].mxu1 %v2246_v21 }
 0x62c   : > { %5686 = vmatprep.subr.msk.bf16.mxu1 %vm1511_vm2, %v2409_v52  ;;  %v2206_v15 = vpop.xlane.xlu1 %2205  ;;  %v2455_v38 = vsel %vm1511_vm2, %v2409_v52, 0 }
 0x62d   : > { %6001 = vrcp.f32 %v2206_v15  ;;  %5465 = vmatpush3.bf16.xpose.msra.mxu1 %v2455_v38 }
 0x62e   : > { %6003 = vrcp.f32 %v2210_v23 }
 0x62f   : > { %v2381_v54 = vpop.permute.xlu0 %2380  ;;  %v5992_v0 = vpop.eup %5991  ;;  %6005 = vrcp.f32 %v2208_v13 }
 0x630   : > { %v2411_v7 = vpop.permute.xlu1 %2410  ;;  %v5994_v39 = vpop.eup %5993  ;;  %v2238_v18 = vmul.f32 %v5992_v0, %v7141_v57 }
 0x631   : > { %5687 = vmatprep.subr.msk.bf16.mxu1 %vm1511_vm2, %v2411_v7  ;;  %v5996_v27 = vpop.eup %5995  ;;  %v2458_v42 = vsel %vm1511_vm2, %v2411_v7, 0  ;;  %v2235_v20 = vmul.f32 %v5994_v39, %v7135_v25 }
 0x632   : > { %v2237_v13 = vmul.f32 %v5996_v27, %v7128_v24 }
 0x633   : > { %v5998_v22 = vpop.eup %5997  ;;  %v2385_v26 = vpop.permute.xlu0 %2384 }
 0x634   : > { %v2383_v43 = vpop.permute.xlu1 %2382  ;;  %v2236_v10 = vmul.f32 %v5998_v22, %v7147_v55  ;;  %v6000_v36 = vpop.eup %5999  ;;  %v2248_v58 = vpack.c.bf16 %v2238_v18, %v2237_v13 }
 0x635   : > { %5467 = vmatpush3.bf16.xpose.msra.mxu1 %v2458_v42  ;;  %v2239_v57 = vmul.f32 %v6000_v36, %v7139_v63 }
 0x636   : > { %v2247_v11 = vpack.c.bf16 %v2236_v10, %v2235_v20 }
 0x637   : > { %v6002_v14 = vpop.eup %6001  ;;  %v2389_v61 = vpop.permute.xlu0 %2388 }
 0x638   : > { %v6004_v40 = vpop.eup %6003  ;;  %5444 = vmatprep.mubr.bf16.mxu1 %v2247_v11  ;;  %v2387_v33 = vpop.permute.xlu1 %2386  ;;  %v2240_v3 = vmul.f32 %v6002_v14, %v7151_v8 }
 0x639   : > { %5445 = vmatmul.mubr.bf16.gmra.mrb[40].mxu1 %v2248_v58  ;;  %v6006_v32 = vpop.eup %6005  ;;  %v2242_v55 = vmul.f32 %v6004_v40, %v7145_v12 }
 0x63a   : > { %v2249_v25 = vpack.c.bf16 %v2240_v3, %v2239_v57  ;;  %v2241_v24 = vmul.f32 %v6006_v32, %v7133_v56 }
 0x63b   : > { %v2393_v23 = vpop.permute.xlu0 %2392 }
 0x63c   : > { %5448 = vmatprep.mubr.bf16.mxu1 %v2249_v25  ;;  %v2391_v35 = vpop.permute.xlu1 %2390  ;;  %v2250_v19 = vpack.c.bf16 %v2242_v55, %v2241_v24 }
 0x63f   : > { %v2710_v41 = vpop.permute.xlu0 %2709 }
 0x640   : > { %5484 = vmatprep.subr.bf16.mxu0 %v2710_v41  ;;  %v2395_v21 = vpop.permute.xlu1 %2394 }
 0x641   : > { %5449 = vmatmul.mubr.bf16.gmra.mrb[44].mxu1 %v2250_v19  ;;  %5485 = vmatpush3.bf16.msra.mxu0 %v2710_v41 }
 0x642   : > { %5468 = vmatprep.mubr.msk.bf16.mxu1 %vm1511_vm2, %v2381_v54 }
 0x643   : > { %v2714_v8 = vpop.permute.xlu0 %2713 }
 0x644   : > { %v2712_v63 = vpop.permute.xlu1 %2711 }
 0x645   : > { %5486 = vmatprep.subr.bf16.mxu0 %v2712_v63 }
 0x646   : > { %5487 = vmatpush3.bf16.msra.mxu0 %v2712_v63 }
 0x647   : > { %5488 = vmatprep.subr.bf16.mxu0 %v2714_v8  ;;  %v2718_v56 = vpop.permute.xlu0 %2717 }
 0x648   : > { %v2716_v12 = vpop.permute.xlu1 %2715 }
 0x649   : > { %5469 = vmatmul.mubr.msk.bf16.vlgmr.msra.gmra.mrb[48].mxu1 %vm1511_vm2, %v2383_v43 }
 0x64a   : > { %5472 = vmatprep.mubr.msk.bf16.mxu1 %vm1511_vm2, %v2385_v26  ;;  %5489 = vmatpush3.bf16.msra.mxu0 %v2714_v8 }
 0x64b   : > { %5490 = vmatprep.subr.bf16.mxu0 %v2716_v12  ;;  %v2722_v15 = vpop.permute.xlu0 %2721 }
 0x64c   : > { %v2720_v52 = vpop.permute.xlu1 %2719 }
 0x64e   : > { %5491 = vmatpush3.bf16.msra.mxu0 %v2716_v12 }
 0x64f   : > { %5492 = vmatprep.subr.bf16.mxu0 %v2718_v56  ;;  %v7237_v54 = vpop.permute.xlu0 %2846 }
 0x650   : > { %v2724_v38 = vpop.permute.xlu1 %2723 }
 0x651   : > { %5473 = vmatmul.mubr.msk.bf16.gmra.mrb[52].mxu1 %vm1511_vm2, %v2387_v33 }
 0x652   : > { %5476 = vmatprep.mubr.msk.bf16.mxu1 %vm1511_vm2, %v2389_v61  ;;  %5493 = vmatpush3.bf16.msra.mxu0 %v2718_v56 }
 0x653   : > { %5494 = vmatprep.subr.bf16.mxu0 %v2720_v52 }
 0x654   : > { %v7327_v36 = vpop.permute.xlu1 %2848 }
 0x656   : > { %5495 = vmatpush3.bf16.msra.mxu0 %v2720_v52 }
 0x657   : > { %5496 = vmatprep.subr.bf16.mxu0 %v2722_v15 }
 0x659   : > { %5477 = vmatmul.mubr.msk.bf16.gmra.mrb[56].mxu1 %vm1511_vm2, %v2391_v35 }
 0x65a   : > { %5480 = vmatprep.mubr.msk.bf16.mxu1 %vm1511_vm2, %v2393_v23  ;;  %5497 = vmatpush3.bf16.msra.mxu0 %v2722_v15 }
 0x65b   : > { %5498 = vmatprep.subr.bf16.mxu0 %v2724_v38 }
 0x65e   : > { %5499 = vmatpush3.bf16.msra.mxu0 %v2724_v38 }
 0x65f   : > { %5688 = vmatprep.subr.msk.bf16.mxu0 %vm1511_vm2, %v7237_v54 }
 0x661   : > { %5481 = vmatmul.mubr.msk.bf16.gmra.mrb[60].mxu1 %vm1511_vm2, %v2395_v21 }
 0x6c6   : > { %v7242_v0 = vpop.f32.mrb[32].mxu1 }
 0x6c7   : > { %v7244_v7 = vpop.f32.mrb[33].mxu1 }
 0x6c8   : > { %v7246_v39 = vpop.f32.mrb[34].mxu1 }
 0x6c9   : > { %v7250_v22 = vpop.f32.mrb[35].mxu1 }
 0x6fe   : > { %v7254_v18 = vpop.f32.mrb[36].mxu1 }
 0x6ff   : > { %v7256_v43 = vpop.f32.mrb[37].mxu1 }
 0x700   : > { %v7258_v42 = vpop.f32.mrb[38].mxu1 }
 0x701   : > { %v7262_v10 = vpop.f32.mrb[39].mxu1 }
 0x70c   : > { %v7266_v13 = vpop.f32.mrb[40].mxu1 }
 0x70d   : > { %v7268_v11 = vpop.f32.mrb[41].mxu1 }
 0x70e   : > { %8577 = vst [vmem:[#allocation28_spill] sm:$0xff] %v7268_v11  ;;  %v7270_v14 = vpop.f32.mrb[42].mxu1 }
 0x70f   : > { %v7274_v58 = vpop.f32.mrb[43].mxu1 }
 0x710   : > { %8578 = vst [vmem:[#allocation29_spill] sm:$0xff] %v7274_v58 }
 0x714   : > { %v7278_v33 = vpop.f32.mrb[44].mxu1 }
 0x715   : > { %8579 = vst [vmem:[#allocation30_spill] sm:$0xff] %v7278_v33  ;;  %v7280_v57 = vpop.f32.mrb[45].mxu1 }
 0x716   : > { %8580 = vst [vmem:[#allocation31_spill] sm:$0xff] %v7280_v57  ;;  %v7282_v3 = vpop.f32.mrb[46].mxu1 }
 0x717   : > { %8581 = vst [vmem:[#allocation32_spill] sm:$0xff] %v7282_v3  ;;  %v7286_v25 = vpop.f32.mrb[47].mxu1 }
 0x718   : > { %8582 = vst [vmem:[#allocation33_spill] sm:$0xff] %v7286_v25 }
 0x71c   : > { %v5470_v55 = vpop.f32.mrb[48].mxu1 }
 0x71d   : > { %2561 = vmax.xlane.f32.xlu0 %v5470_v55  ;;  %v2494_v35 = vpop.f32.mrb[49].mxu1 }
 0x71e   : > { %v5471_v24 = vpop.f32.mrb[50].mxu1 }
 0x71f   : > { %v2497_v41 = vpop.f32.mrb[51].mxu1 }
 0x720   : > { %2559 = vmax.xlane.f32.xlu1 %v2497_v41 }
 0x721   : > { %2557 = vmax.xlane.f32.xlu0 %v2494_v35 }
 0x724   : > { %v5474_v19 = vpop.f32.mrb[52].mxu1 }
 0x725   : > { %2563 = vmax.xlane.f32.xlu0 %v5471_v24  ;;  %v7290_v21 = vpop.f32.mrb[53].mxu1 }
 0x726   : > { %v7292_v63 = vpop.f32.mrb[54].mxu1 }
 0x727   : > { %2571 = vmax.xlane.f32.xlu1 %v7292_v63  ;;  %v7295_v8 = vpop.f32.mrb[55].mxu1 }
 0x729   : > { %2569 = vmax.xlane.f32.xlu0 %v5474_v19 }
 0x72b   : > { %2567 = vmax.xlane.f32.xlu1 %v7295_v8 }
 0x72c   : > { %v7298_v12 = vpop.f32.mrb[56].mxu1 }
 0x72d   : > { %2565 = vmax.xlane.f32.xlu0 %v7290_v21  ;;  %v7301_v56 = vpop.f32.mrb[57].mxu1 }
 0x72e   : > { %v7303_v52 = vpop.f32.mrb[58].mxu1 }
 0x72f   : > { %2579 = vmax.xlane.f32.xlu1 %v7303_v52  ;;  %v7306_v15 = vpop.f32.mrb[59].mxu1 }
 0x731   : > { %2577 = vmax.xlane.f32.xlu0 %v7298_v12 }
 0x733   : > { %2575 = vmax.xlane.f32.xlu1 %v7306_v15 }
 0x734   : > { %v7310_v38 = vpop.f32.mrb[60].mxu1 }
 0x735   : > { %2573 = vmax.xlane.f32.xlu0 %v7301_v56  ;;  %v7313_v23 = vpop.f32.mrb[61].mxu1 }
 0x736   : > { %v7315_v32 = vpop.f32.mrb[62].mxu1 }
 0x737   : > { %v7317_v40 = vpop.f32.mrb[63].mxu1 }
 0x739   : > { %2585 = vmax.xlane.f32.xlu0 %v7310_v38 }
 0x73d   : > { %2581 = vmax.xlane.f32.xlu0 %v7313_v23 }
 0x744   : > { %2852 = vrot.lane.b32.xlu1 %v6695_v45, %s6258_s21 }
 0x753   : > { %2850 = vrot.lane.b32.xlu0 %v6698_v48, %s6258_s21 }
 0x768   : > { %2587 = vmax.xlane.f32.xlu1 %v7315_v32 }
 0x76c   : > { %2583 = vmax.xlane.f32.xlu1 %v7317_v40 }
 0x7aa   : > { %v2562_v26 = vpop.xlane.xlu0 %2561 }
 0x7ab   : > { %v2591_v61 = vsub.f32 %v5470_v55, %v2562_v26 }
 0x7ad   : > { %v2609_v20 = vmul.f32 1.442695, %v2591_v61  ;;  %v2560_v27 = vpop.xlane.xlu1 %2559 }
 0x7ae   : > { %v2590_v44 = vsub.f32 %v2497_v41, %v2560_v27  ;;  %v2558_v62 = vpop.xlane.xlu0 %2557 }
 0x7af   : > { %6007 = vpow2.f32 %v2609_v20  ;;  %v2589_v49 = vsub.f32 %v2494_v35, %v2558_v62 }
 0x7b0   : > { %v2607_v53 = vmul.f32 1.442695, %v2590_v44 }
 0x7b1   : > { %v2605_v57 = vmul.f32 1.442695, %v2589_v49 }
 0x7b2   : > { %6009 = vpow2.f32 %v2607_v53  ;;  %v2564_v45 = vpop.xlane.xlu0 %2563 }
 0x7b3   : > { %6011 = vpow2.f32 %v2605_v57  ;;  %v2592_v48 = vsub.f32 %v5471_v24, %v2564_v45 }
 0x7b4   : > { %v2572_v62 = vpop.xlane.xlu1 %2571 }
 0x7b5   : > { %v2611_v25 = vmul.f32 1.442695, %v2592_v48  ;;  %v2596_v45 = vsub.f32 %v7292_v63, %v2572_v62 }
 0x7b6   : > { %v2570_v49 = vpop.xlane.xlu0 %2569 }
 0x7b7   : > { %6013 = vpow2.f32 %v2611_v25  ;;  %v2595_v20 = vsub.f32 %v5474_v19, %v2570_v49  ;;  %v2619_v11 = vmul.f32 1.442695, %v2596_v45 }
 0x7b8   : > { %v2568_v61 = vpop.xlane.xlu1 %2567 }
 0x7b9   : > { %v7329_v33 = vpop.eup %6007  ;;  %v2617_v25 = vmul.f32 1.442695, %v2595_v20  ;;  %v2594_v35 = vsub.f32 %v7295_v8, %v2568_v61 }
 0x7ba   : > { %2641 = vadd.xlane.f32.xlu1 %v7329_v33  ;;  %v2566_v53 = vpop.xlane.xlu0 %2565 }
 0x7bb   : > { %v2593_v55 = vsub.f32 %v7290_v21, %v2566_v53  ;;  %6015 = vpow2.f32 %v2617_v25  ;;  %v2615_v48 = vmul.f32 1.442695, %v2594_v35 }
 0x7bc   : > { %v7332_v3 = vpop.eup %6009  ;;  %v2580_v24 = vpop.xlane.xlu1 %2579 }
 0x7bd   : > { %v7334_v26 = vpop.eup %6011  ;;  %2639 = vadd.xlane.f32.xlu0 %v7332_v3  ;;  %v2600_v63 = vsub.f32 %v7303_v52, %v2580_v24 }
 0x7be   : > { %2637 = vadd.xlane.f32.xlu1 %v7334_v26  ;;  %v2578_v27 = vpop.xlane.xlu0 %2577 }
 0x7c0   : > { %v2576_v58 = vpop.xlane.xlu1 %2575 }
 0x7c1   : > { %v7338_v44 = vpop.eup %6013 }
 0x7c2   : > { %2643 = vadd.xlane.f32.xlu1 %v7338_v44  ;;  %v2574_v57 = vpop.xlane.xlu0 %2573 }
 0x7c3   : > { %v2597_v21 = vsub.f32 %v7301_v56, %v2574_v57  ;;  %v2598_v56 = vsub.f32 %v7306_v15, %v2576_v58 }
 0x7c5   : > { %v2621_v62 = vmul.f32 1.442695, %v2597_v21  ;;  %v7353_v61 = vpop.eup %6015  ;;  %v2623_v25 = vmul.f32 1.442695, %v2598_v56 }
 0x7c6   : > { %v2586_v41 = vpop.xlane.xlu0 %2585 }
 0x7c7   : > { %v2603_v19 = vsub.f32 %v7310_v38, %v2586_v41 }
 0x7c9   : > { %v2633_v8 = vmul.f32 1.442695, %v2603_v19 }
 0x7ca   : > { %v2582_v53 = vpop.xlane.xlu0 %2581 }
 0x7cb   : > { %v2601_v20 = vsub.f32 %v7313_v23, %v2582_v53  ;;  %v2887_v53 = vsel %vm1511_vm2, %v7237_v54, 0 }
 0x7cd   : > { %v2629_v38 = vmul.f32 1.442695, %v2601_v20 }
 0x7d3   : > { %2856 = vrot.lane.b32.xlu1 %v6715_v6, %s6258_s21  ;;  %2854 = vrot.lane.b32.xlu0 %v6718_v9, %s6258_s21  ;;  %v2613_v6 = vmul.f32 1.442695, %v2593_v55  ;;  %v2599_v9 = vsub.f32 %v7298_v12, %v2578_v27  ;;  %v7355_v12 = vpop.permute.xlu1 %2852  ;;  %v2627_v27 = vmul.f32 1.442695, %v2600_v63 }
 0x7d5   : > { %6017 = vpow2.f32 %v2613_v6  ;;  %v2625_v49 = vmul.f32 1.442695, %v2599_v9 }
 0x7d6   : > { %6019 = vpow2.f32 %v2615_v48 }
 0x7d7   : > { %6021 = vpow2.f32 %v2619_v11 }
 0x7d8   : > { %6023 = vpow2.f32 %v2625_v49 }
 0x7d9   : > { %6025 = vpow2.f32 %v2633_v8 }
 0x7da   : > { %6027 = vpow2.f32 %v2621_v62 }
 0x7db   : > { %6029 = vpow2.f32 %v2629_v38 }
 0x7dc   : > { %6031 = vpow2.f32 %v2627_v27 }
 0x7df   : > { %v7359_v11 = vpop.eup %6017 }
 0x7e0   : > { %v7361_v23 = vpop.eup %6019 }
 0x7e1   : > { %v7366_v35 = vpop.eup %6021 }
 0x7e2   : > { %v7368_v58 = vpop.eup %6023 }
 0x7e3   : > { %v7373_v41 = vpop.eup %6025 }
 0x7e4   : > { %v7375_v45 = vpop.eup %6027 }
 0x7e5   : > { %v7379_v6 = vpop.eup %6029 }
 0x7e6   : > { %v7381_v48 = vpop.eup %6031 }
 0x7f2   : > { %2649 = vadd.xlane.f32.xlu0 %v7353_v61 }
 0x7f5   : > { %v2588_v57 = vpop.xlane.xlu1 %2587 }
 0x7f6   : > { %v2604_v52 = vsub.f32 %v7315_v32, %v2588_v57  ;;  %2645 = vadd.xlane.f32.xlu0 %v7359_v11 }
 0x7f7   : > { %2647 = vadd.xlane.f32.xlu1 %v7361_v23 }
 0x7f8   : > { %v2635_v55 = vmul.f32 1.442695, %v2604_v52 }
 0x7f9   : > { %v2584_v24 = vpop.xlane.xlu1 %2583 }
 0x7fa   : > { %6033 = vpow2.f32 %v2635_v55  ;;  %v2602_v15 = vsub.f32 %v7317_v40, %v2584_v24  ;;  %2651 = vadd.xlane.f32.xlu0 %v7366_v35 }
 0x7fb   : > { %2657 = vadd.xlane.f32.xlu1 %v7368_v58  ;;  %6035 = vpow2.f32 %v2623_v25 }
 0x7fc   : > { %v2631_v32 = vmul.f32 1.442695, %v2602_v15 }
 0x7fe   : > { %2665 = vadd.xlane.f32.xlu0 %v7373_v41  ;;  %6037 = vpow2.f32 %v2631_v32 }
 0x7ff   : > { %2653 = vadd.xlane.f32.xlu1 %v7375_v45 }
 0x802   : > { %2661 = vadd.xlane.f32.xlu0 %v7379_v6 }
 0x803   : > { %2659 = vadd.xlane.f32.xlu1 %v7381_v48 }
 0x804   : > { %v7385_v40 = vpop.eup %6033 }
 0x805   : > { %v7387_v9 = vpop.eup %6035 }
 0x806   : > { %2667 = vadd.xlane.f32.xlu0 %v7385_v40 }
 0x807   : > { %2655 = vadd.xlane.f32.xlu1 %v7387_v9 }
 0x808   : > { %v7391_v19 = vpop.eup %6037 }
 0x80b   : > { %2663 = vadd.xlane.f32.xlu1 %v7391_v19 }
 0x81c   : > { %2858 = vrot.lane.b32.xlu0 %v6740_v37, %s6258_s21  ;;  %2860 = vrot.lane.b32.xlu1 %v6737_v34, %s6258_s21 }
 0x820   : > { %2830 = vrot.lane.b32.xlu0 %v6713_v4, %s6258_s21  ;;  %2832 = vrot.lane.b32.xlu1 %v6710_v2, %s6258_s21  ;;  %v2851_v2 = vpop.permute.xlu0 %2850 }
 0x824   : > { %2834 = vrot.lane.b32.xlu0 %v6735_v30, %s6258_s21  ;;  %2836 = vrot.lane.b32.xlu1 %v6732_v28, %s6258_s21 }
 0x828   : > { %2838 = vrot.lane.b32.xlu0 %v6751_v51, %s6258_s21  ;;  %2840 = vrot.lane.b32.xlu1 %v6749_v50, %s6258_s21 }
 0x82c   : > { %2842 = vrot.lane.b32.xlu0 %v6768_v5, %s6258_s21  ;;  %2844 = vrot.lane.b32.xlu1 %v6761_v1, %s6258_s21 }
 0x830   : > { %3159 = vrot.lane.b32.xlu0 %v6776_v17, %s6258_s21  ;;  %3161 = vrot.lane.b32.xlu1 %v6772_v16, %s6258_s21 }
 0x834   : > { %3163 = vrot.lane.b32.xlu0 %v6788_v31, %s6258_s21 }
 0x847   : > { %v2642_v4 = vpop.xlane.xlu1 %2641 }
 0x84a   : > { %v2640_v28 = vpop.xlane.xlu0 %2639 }
 0x84b   : > { %6039 = vrcp.f32 %v2640_v28  ;;  %v2638_v30 = vpop.xlane.xlu1 %2637 }
 0x84c   : > { %6041 = vrcp.f32 %v2638_v30 }
 0x84d   : > { %6043 = vrcp.f32 %v2642_v4 }
 0x84e   : > { %v2855_v54 = vpop.permute.xlu0 %2854 }
 0x84f   : > { %v2644_v34 = vpop.xlane.xlu1 %2643  ;;  %v2899_v8 = vsel %vm1511_vm2, %v2855_v54, 0 }
 0x850   : > { %6045 = vrcp.f32 %v2644_v34 }
 0x855   : > { %v6040_v37 = vpop.eup %6039 }
 0x856   : > { %v6042_v50 = vpop.eup %6041  ;;  %v2686_v51 = vmul.f32 %v6040_v37, %v7332_v3  ;;  %v2890_v3 = vsel %vm1511_vm2, %v7327_v36, 0 }
 0x857   : > { %v2685_v1 = vmul.f32 %v6042_v50, %v7334_v26  ;;  %v6044_v5 = vpop.eup %6043  ;;  %v2896_v26 = vsel %vm1511_vm2, %v7355_v12, 0 }
 0x858   : > { %v2687_v31 = vmul.f32 %v6044_v5, %v7329_v33  ;;  %v2893_v33 = vsel %vm1511_vm2, %v2851_v2, 0 }
 0x859   : > { %v2701_v16 = vpack.c.bf16 %v2686_v51, %v2685_v1 }
 0x85a   : > { %v6046_v17 = vpop.eup %6045 }
 0x85b   : > { %v2688_v49 = vmul.f32 %v6046_v17, %v7338_v44  ;;  %5500 = vmatprep.mubr.bf16.mxu0 %v2701_v16 }
 0x85d   : > { %v2702_v21 = vpack.c.bf16 %v2688_v49, %v2687_v31 }
 0x85f   : > { %5501 = vmatmul.mubr.bf16.vlgmr.msra.gmra.mrb[64].mxu0 %v2702_v21 }
 0x860   : > { %5517 = vmatpush3.bf16.xpose.msra.mxu0 %v2887_v53 }
 0x861   : > { %5689 = vmatprep.subr.msk.bf16.mxu0 %vm1511_vm2, %v7327_v36  ;;  %v2857_v36 = vpop.permute.xlu1 %2856 }
 0x862   : > { %v2902_v38 = vsel %vm1511_vm2, %v2857_v36, 0 }
 0x868   : > { %5519 = vmatpush3.bf16.xpose.msra.mxu0 %v2890_v3 }
 0x869   : > { %5690 = vmatprep.subr.msk.bf16.mxu0 %vm1511_vm2, %v2851_v2 }
 0x870   : > { %5521 = vmatpush3.bf16.xpose.msra.mxu0 %v2893_v33 }
 0x871   : > { %5691 = vmatprep.subr.msk.bf16.mxu0 %vm1511_vm2, %v7355_v12 }
 0x878   : > { %5523 = vmatpush3.bf16.xpose.msra.mxu0 %v2896_v26 }
 0x879   : > { %5692 = vmatprep.subr.msk.bf16.mxu0 %vm1511_vm2, %v2855_v54 }
 0x87f   : > { %v2650_v44 = vpop.xlane.xlu0 %2649 }
 0x880   : > { %5525 = vmatpush3.bf16.xpose.msra.mxu0 %v2899_v8 }
 0x881   : > { %5693 = vmatprep.subr.msk.bf16.mxu0 %vm1511_vm2, %v2857_v36 }
 0x883   : > { %v2646_v20 = vpop.xlane.xlu0 %2645 }
 0x884   : > { %6047 = vrcp.f32 %v2646_v20  ;;  %v2648_v63 = vpop.xlane.xlu1 %2647 }
 0x885   : > { %6049 = vrcp.f32 %v2648_v63 }
 0x886   : > { %6051 = vrcp.f32 %v2650_v44 }
 0x887   : > { %v2652_v62 = vpop.xlane.xlu0 %2651 }
 0x888   : > { %6053 = vrcp.f32 %v2652_v62  ;;  %5527 = vmatpush3.bf16.xpose.msra.mxu0 %v2902_v38  ;;  %v2658_v12 = vpop.xlane.xlu1 %2657 }
 0x88b   : > { %v2666_v27 = vpop.xlane.xlu0 %2665 }
 0x88c   : > { %v2654_v56 = vpop.xlane.xlu1 %2653 }
 0x88e   : > { %v6048_v57 = vpop.eup %6047 }
 0x88f   : > { %v6050_v52 = vpop.eup %6049  ;;  %v2662_v25 = vpop.xlane.xlu0 %2661  ;;  %v2689_v55 = vmul.f32 %v6048_v57, %v7359_v11 }
 0x890   : > { %v6052_v24 = vpop.eup %6051  ;;  %v2660_v15 = vpop.xlane.xlu1 %2659  ;;  %v2690_v32 = vmul.f32 %v6050_v52, %v7361_v23 }
 0x891   : > { %6055 = vrcp.f32 %v2660_v15  ;;  %v2691_v30 = vmul.f32 %v6052_v24, %v7353_v61 }
 0x892   : > { %v6054_v2 = vpop.eup %6053  ;;  %v2703_v4 = vpack.c.bf16 %v2690_v32, %v2689_v55  ;;  %6057 = vrcp.f32 %v2654_v56 }
 0x893   : > { %v2668_v28 = vpop.xlane.xlu0 %2667  ;;  %v2692_v34 = vmul.f32 %v6054_v2, %v7366_v35  ;;  %6059 = vrcp.f32 %v2658_v12 }
 0x894   : > { %5504 = vmatprep.mubr.bf16.mxu0 %v2703_v4  ;;  %v2656_v37 = vpop.xlane.xlu1 %2655 }
 0x895   : > { %6061 = vrcp.f32 %v2656_v37  ;;  %v2704_v50 = vpack.c.bf16 %v2692_v34, %v2691_v30 }
 0x896   : > { %6063 = vrcp.f32 %v2662_v25 }
 0x897   : > { %v2859_v11 = vpop.permute.xlu0 %2858  ;;  %5505 = vmatmul.mubr.bf16.gmra.mrb[68].mxu0 %v2704_v50 }
 0x898   : > { %5694 = vmatprep.subr.msk.bf16.mxu0 %vm1511_vm2, %v2859_v11  ;;  %v2664_v23 = vpop.xlane.xlu1 %2663  ;;  %v2905_v51 = vsel %vm1511_vm2, %v2859_v11, 0 }
 0x899   : > { %6065 = vrcp.f32 %v2664_v23  ;;  %5529 = vmatpush3.bf16.xpose.msra.mxu0 %v2905_v51 }
 0x89a   : > { %6067 = vrcp.f32 %v2668_v28 }
 0x89b   : > { %v2831_v1 = vpop.permute.xlu0 %2830  ;;  %v6056_v61 = vpop.eup %6055  ;;  %6069 = vrcp.f32 %v2666_v27 }
 0x89c   : > { %v2861_v35 = vpop.permute.xlu1 %2860  ;;  %v6058_v5 = vpop.eup %6057  ;;  %v2696_v49 = vmul.f32 %v6056_v61, %v7381_v48 }
 0x89d   : > { %5695 = vmatprep.subr.msk.bf16.mxu0 %vm1511_vm2, %v2861_v35  ;;  %v6060_v16 = vpop.eup %6059  ;;  %v2908_v53 = vsel %vm1511_vm2, %v2861_v35, 0  ;;  %v2693_v3 = vmul.f32 %v6058_v5, %v7375_v45 }
 0x89e   : > { %v2695_v54 = vmul.f32 %v6060_v16, %v7368_v58 }
 0x89f   : > { %v6062_v17 = vpop.eup %6061  ;;  %v2835_v31 = vpop.permute.xlu0 %2834 }
 0x8a0   : > { %v2833_v21 = vpop.permute.xlu1 %2832  ;;  %v2694_v33 = vmul.f32 %v6062_v17, %v7387_v9  ;;  %v6064_v26 = vpop.eup %6063  ;;  %v2706_v20 = vpack.c.bf16 %v2696_v49, %v2695_v54 }
 0x8a1   : > { %5531 = vmatpush3.bf16.xpose.msra.mxu0 %v2908_v53  ;;  %v2697_v48 = vmul.f32 %v6064_v26, %v7379_v6 }
 0x8a2   : > { %v2705_v44 = vpack.c.bf16 %v2694_v33, %v2693_v3 }
 0x8a3   : > { %v6066_v8 = vpop.eup %6065  ;;  %v2839_v36 = vpop.permute.xlu0 %2838 }
 0x8a4   : > { %v6068_v63 = vpop.eup %6067  ;;  %5508 = vmatprep.mubr.bf16.mxu0 %v2705_v44  ;;  %v2837_v62 = vpop.permute.xlu1 %2836  ;;  %v2698_v38 = vmul.f32 %v6066_v8, %v7391_v19 }
 0x8a5   : > { %5509 = vmatmul.mubr.bf16.gmra.mrb[72].mxu0 %v2706_v20  ;;  %v6070_v12 = vpop.eup %6069  ;;  %v2700_v9 = vmul.f32 %v6068_v63, %v7385_v40 }
 0x8a6   : > { %v2707_v45 = vpack.c.bf16 %v2698_v38, %v2697_v48  ;;  %v2699_v58 = vmul.f32 %v6070_v12, %v7373_v41 }
 0x8a7   : > { %v2843_v27 = vpop.permute.xlu0 %2842 }
 0x8a8   : > { %5512 = vmatprep.mubr.bf16.mxu0 %v2707_v45  ;;  %v2841_v56 = vpop.permute.xlu1 %2840  ;;  %v2708_v52 = vpack.c.bf16 %v2700_v9, %v2699_v58 }
 0x8ab   : > { %v3160_v57 = vpop.permute.xlu0 %3159 }
 0x8ac   : > { %5548 = vmatprep.subr.bf16.mxu1 %v3160_v57  ;;  %v2845_v25 = vpop.permute.xlu1 %2844 }
 0x8ad   : > { %5513 = vmatmul.mubr.bf16.gmra.mrb[76].mxu0 %v2708_v52  ;;  %5549 = vmatpush3.bf16.msra.mxu1 %v3160_v57 }
 0x8ae   : > { %5532 = vmatprep.mubr.msk.bf16.mxu0 %vm1511_vm2, %v2831_v1 }
 0x8af   : > { %v3164_v19 = vpop.permute.xlu0 %3163 }
 0x8b0   : > { %v3162_v6 = vpop.permute.xlu1 %3161 }
 0x8b1   : > { %5550 = vmatprep.subr.bf16.mxu1 %v3162_v6 }
 0x8b2   : > { %5551 = vmatpush3.bf16.msra.mxu1 %v3162_v6 }
 0x8b3   : > { %5552 = vmatprep.subr.bf16.mxu1 %v3164_v19 }
 0x8b5   : > { %5533 = vmatmul.mubr.msk.bf16.vlgmr.msra.gmra.mrb[80].mxu0 %vm1511_vm2, %v2833_v21 }
 0x8b6   : > { %5536 = vmatprep.mubr.msk.bf16.mxu0 %vm1511_vm2, %v2835_v31  ;;  %5553 = vmatpush3.bf16.msra.mxu1 %v3164_v19 }
 0x8bd   : > { %5537 = vmatmul.mubr.msk.bf16.gmra.mrb[84].mxu0 %vm1511_vm2, %v2837_v62 }
 0x8be   : > { %5540 = vmatprep.mubr.msk.bf16.mxu0 %vm1511_vm2, %v2839_v36 }
 0x8c5   : > { %5541 = vmatmul.mubr.msk.bf16.gmra.mrb[88].mxu0 %vm1511_vm2, %v2841_v56 }
 0x8c6   : > { %5544 = vmatprep.mubr.msk.bf16.mxu0 %vm1511_vm2, %v2843_v27 }
 0x8cd   : > { %5545 = vmatmul.mubr.msk.bf16.gmra.mrb[92].mxu0 %vm1511_vm2, %v2845_v25 }
 0x932   : > { %v7464_v41 = vpop.f32.mrb[64].mxu0 }
 0x933   : > { %v7466_v40 = vpop.f32.mrb[65].mxu0 }
 0x934   : > { %v7468_v55 = vpop.f32.mrb[66].mxu0 }
 0x935   : > { %v5760_v24 = vpack.i.bf16 %v7468_v55, %v7464_v41  ;;  %v7472_v15 = vpop.f32.mrb[67].mxu0  ;;  %v8585_v55 = vpack.i.bf16 %v7270_v14, %v7266_v13  ;;  %v8587_v13 = vpack.i.bf16 %v7262_v10, %v7256_v43 }
 0x936   : > { %v5755_v32 = vpack.i.bf16 %v7472_v15, %v7466_v40  ;;  %v8586_v15 = vpack.i.bf16 %v7250_v22, %v7244_v7 }
 0x96a   : > { %v7476_v2 = vpop.f32.mrb[68].mxu0 }
 0x96b   : > { %v7478_v4 = vpop.f32.mrb[69].mxu0 }
 0x96c   : > { %v7480_v28 = vpop.f32.mrb[70].mxu0 }
 0x96d   : > { %v5780_v30 = vpack.i.bf16 %v7480_v28, %v7476_v2  ;;  %v7484_v34 = vpop.f32.mrb[71].mxu0  ;;  %v8590_v2 = vld [vmem:[#allocation28_spill] sm:$0xff] }
 0x96e   : > { %v8588_v14 = vpack.i.bf16 %v7484_v34, %v7478_v4 }
 0x978   : > { %v7488_v50 = vpop.f32.mrb[72].mxu0 }
 0x979   : > { %v7490_v11 = vpop.f32.mrb[73].mxu0 }
 0x97a   : > { %v7492_v23 = vpop.f32.mrb[74].mxu0 }
 0x97b   : > { %v7496_v1 = vpop.f32.mrb[75].mxu0 }
 0x980   : > { %v7500_v35 = vpop.f32.mrb[76].mxu0 }
 0x981   : > { %v7502_v5 = vpop.f32.mrb[77].mxu0 }
 0x982   : > { %v7504_v16 = vpop.f32.mrb[78].mxu0 }
 0x983   : > { %v7508_v31 = vpop.f32.mrb[79].mxu0 }
 0x988   : > { %v5534_v21 = vpop.f32.mrb[80].mxu0 }
 0x989   : > { %3011 = vmax.xlane.f32.xlu0 %v5534_v21  ;;  %v2944_v53 = vpop.f32.mrb[81].mxu0 }
 0x98a   : > { %v5535_v3 = vpop.f32.mrb[82].mxu0 }
 0x98b   : > { %v2947_v33 = vpop.f32.mrb[83].mxu0 }
 0x98c   : > { %3009 = vmax.xlane.f32.xlu1 %v2947_v33 }
 0x98d   : > { %3007 = vmax.xlane.f32.xlu0 %v2944_v53 }
 0x990   : > { %v5538_v26 = vpop.f32.mrb[84].mxu0 }
 0x991   : > { %3013 = vmax.xlane.f32.xlu0 %v5535_v3  ;;  %v2960_v54 = vpop.f32.mrb[85].mxu0 }
 0x992   : > { %v5539_v44 = vpop.f32.mrb[86].mxu0 }
 0x993   : > { %3021 = vmax.xlane.f32.xlu1 %v5539_v44  ;;  %v2963_v8 = vpop.f32.mrb[87].mxu0 }
 0x995   : > { %3019 = vmax.xlane.f32.xlu0 %v5538_v26 }
 0x997   : > { %3017 = vmax.xlane.f32.xlu1 %v2963_v8 }
 0x998   : > { %v5542_v36 = vpop.f32.mrb[88].mxu0 }
 0x999   : > { %3015 = vmax.xlane.f32.xlu0 %v2960_v54  ;;  %v7512_v20 = vpop.f32.mrb[89].mxu0 }
 0x99a   : > { %v7514_v63 = vpop.f32.mrb[90].mxu0 }
 0x99b   : > { %3029 = vmax.xlane.f32.xlu1 %v7514_v63  ;;  %v7517_v62 = vpop.f32.mrb[91].mxu0 }
 0x99d   : > { %3027 = vmax.xlane.f32.xlu0 %v5542_v36 }
 0x99f   : > { %3025 = vmax.xlane.f32.xlu1 %v7517_v62 }
 0x9a0   : > { %v7520_v48 = vpop.f32.mrb[92].mxu0 }
 0x9a1   : > { %3023 = vmax.xlane.f32.xlu0 %v7512_v20  ;;  %v7523_v38 = vpop.f32.mrb[93].mxu0 }
 0x9a2   : > { %v7525_v12 = vpop.f32.mrb[94].mxu0 }
 0x9a3   : > { %v7527_v45 = vpop.f32.mrb[95].mxu0 }
 0x9a5   : > { %3035 = vmax.xlane.f32.xlu0 %v7520_v48 }
 0x9a9   : > { %3031 = vmax.xlane.f32.xlu0 %v7523_v38 }
 0x9b0   : > { %3167 = vrot.lane.b32.xlu1 %v6798_v47, %s6258_s21 }
 0x9bf   : > { %3165 = vrot.lane.b32.xlu0 %v6783_v29, %s6258_s21 }
 0x9d4   : > { %3037 = vmax.xlane.f32.xlu1 %v7525_v12 }
 0x9d8   : > { %3033 = vmax.xlane.f32.xlu1 %v7527_v45 }
 0x9e9   : > { %3169 = vrot.lane.b32.xlu1 %v6795_v46, %s6258_s21 }
 0xa16   : > { %v3012_v27 = vpop.xlane.xlu0 %3011 }
 0xa17   : > { %v3041_v9 = vsub.f32 %v5534_v21, %v3012_v27 }
 0xa19   : > { %v3059_v56 = vmul.f32 1.442695, %v3041_v9  ;;  %v3010_v57 = vpop.xlane.xlu1 %3009 }
 0xa1a   : > { %v3008_v58 = vpop.xlane.xlu0 %3007  ;;  %v3040_v6 = vsub.f32 %v2947_v33, %v3010_v57 }
 0xa1b   : > { %6071 = vpow2.f32 %v3059_v56  ;;  %v3039_v52 = vsub.f32 %v2944_v53, %v3008_v58 }
 0xa1c   : > { %v3057_v17 = vmul.f32 1.442695, %v3040_v6 }
 0xa1d   : > { %v3055_v25 = vmul.f32 1.442695, %v3039_v52 }
 0xa1e   : > { %v3014_v47 = vpop.xlane.xlu0 %3013 }
 0xa1f   : > { %6073 = vpow2.f32 %v3055_v25  ;;  %v3042_v19 = vsub.f32 %v5535_v3, %v3014_v47 }
 0xa20   : > { %v3022_v29 = vpop.xlane.xlu1 %3021 }
 0xa21   : > { %v3061_v49 = vmul.f32 1.442695, %v3042_v19  ;;  %v3046_v53 = vsub.f32 %v5539_v44, %v3022_v29 }
 0xa22   : > { %v3020_v61 = vpop.xlane.xlu0 %3019 }
 0xa23   : > { %6075 = vpow2.f32 %v3061_v49  ;;  %v3045_v51 = vsub.f32 %v5538_v26, %v3020_v61  ;;  %v3069_v61 = vmul.f32 1.442695, %v3046_v53 }
 0xa24   : > { %v3018_v37 = vpop.xlane.xlu1 %3017  ;;  %6077 = vpow2.f32 %v3057_v17 }
 0xa25   : > { %v7539_v46 = vpop.eup %6071  ;;  %v3067_v21 = vmul.f32 1.442695, %v3045_v51  ;;  %v3044_v27 = vsub.f32 %v2963_v8, %v3018_v37 }
 0xa26   : > { %v3016_v9 = vpop.xlane.xlu0 %3015  ;;  %3091 = vadd.xlane.f32.xlu1 %v7539_v46 }
 0xa27   : > { %6079 = vpow2.f32 %v3067_v21  ;;  %v3065_v33 = vmul.f32 1.442695, %v3044_v27  ;;  %v3043_v56 = vsub.f32 %v2960_v54, %v3016_v9 }
 0xa28   : > { %v3030_v57 = vpop.xlane.xlu1 %3029 }
 0xa29   : > { %v7542_v3 = vpop.eup %6073  ;;  %v3063_v58 = vmul.f32 1.442695, %v3043_v56  ;;  %6081 = vpow2.f32 %v3065_v33  ;;  %v3050_v17 = vsub.f32 %v7514_v63, %v3030_v57 }
 0xa2a   : > { %v3028_v49 = vpop.xlane.xlu0 %3027  ;;  %3087 = vadd.xlane.f32.xlu1 %v7542_v3 }
 0xa2b   : > { %6083 = vpow2.f32 %v3063_v58  ;;  %v3049_v51 = vsub.f32 %v5542_v36, %v3028_v49  ;;  %v3077_v47 = vmul.f32 1.442695, %v3050_v17  ;;  %v8583_v17 = vpack.i.bf16 %v7246_v39, %v7242_v0 }
 0xa2c   : > { %6085 = vpow2.f32 %v3069_v61  ;;  %v3026_v54 = vpop.xlane.xlu1 %3025  ;;  %v8584_v0 = vpack.i.bf16 %v7258_v42, %v7254_v18 }
 0xa2d   : > { %v7545_v37 = vpop.eup %6075  ;;  %v3075_v26 = vmul.f32 1.442695, %v3049_v51  ;;  %v3048_v36 = vsub.f32 %v7517_v62, %v3026_v54 }
 0xa2e   : > { %v3024_v44 = vpop.xlane.xlu0 %3023  ;;  %3093 = vadd.xlane.f32.xlu1 %v7545_v37  ;;  %v7550_v52 = vpop.eup %6077 }
 0xa2f   : > { %v3047_v8 = vsub.f32 %v7512_v20, %v3024_v44  ;;  %6087 = vpow2.f32 %v3075_v26  ;;  %v3073_v27 = vmul.f32 1.442695, %v3048_v36 }
 0xa30   : > { %v3168_v58 = vpop.permute.xlu1 %3167 }
 0xa31   : > { %v7552_v25 = vpop.eup %6079  ;;  %v3071_v6 = vmul.f32 1.442695, %v3047_v8 }
 0xa32   : > { %v3036_v19 = vpop.xlane.xlu0 %3035  ;;  %3099 = vadd.xlane.f32.xlu0 %v7552_v25  ;;  %3089 = vadd.xlane.f32.xlu1 %v7550_v52 }
 0xa33   : > { %6089 = vpow2.f32 %v3071_v6  ;;  %v3053_v63 = vsub.f32 %v7520_v48, %v3036_v19  ;;  %v7558_v29 = vpop.eup %6081 }
 0xa34   : > { %6091 = vpow2.f32 %v3077_v47 }
 0xa35   : > { %v7560_v20 = vpop.eup %6083  ;;  %v3083_v21 = vmul.f32 1.442695, %v3053_v63 }
 0xa36   : > { %3095 = vadd.xlane.f32.xlu0 %v7560_v20  ;;  %v3032_v9 = vpop.xlane.xlu0 %3031  ;;  %3097 = vadd.xlane.f32.xlu1 %v7558_v29  ;;  %v7565_v53 = vpop.eup %6085 }
 0xa37   : > { %6093 = vpow2.f32 %v3083_v21  ;;  %v3051_v62 = vsub.f32 %v7523_v38, %v3032_v9 }
 0xa38   : > { %6095 = vpow2.f32 %v3073_v27 }
 0xa39   : > { %v3079_v33 = vmul.f32 1.442695, %v3051_v62  ;;  %v7568_v56 = vpop.eup %6087 }
 0xa3a   : > { %v3166_v48 = vpop.permute.xlu0 %3165  ;;  %3101 = vadd.xlane.f32.xlu0 %v7565_v53 }
 0xa3b   : > { %6097 = vpow2.f32 %v3079_v33  ;;  %5554 = vmatprep.subr.bf16.mxu1 %v3166_v48 }
 0xa3c   : > { %5555 = vmatpush3.bf16.msra.mxu1 %v3166_v48 }
 0xa3d   : > { %v7570_v57 = vpop.eup %6089  ;;  %5556 = vmatprep.subr.bf16.mxu1 %v3168_v58 }
 0xa3e   : > { %3107 = vadd.xlane.f32.xlu0 %v7568_v56  ;;  %3103 = vadd.xlane.f32.xlu1 %v7570_v57  ;;  %v7574_v38 = vpop.eup %6091 }
 0xa40   : > { %5557 = vmatpush3.bf16.msra.mxu1 %v3168_v58 }
 0xa41   : > { %v7576_v49 = vpop.eup %6093 }
 0xa42   : > { %3115 = vadd.xlane.f32.xlu1 %v7576_v49  ;;  %3109 = vadd.xlane.f32.xlu0 %v7574_v38  ;;  %v7580_v61 = vpop.eup %6095 }
 0xa45   : > { %v7582_v51 = vpop.eup %6097 }
 0xa46   : > { %3111 = vadd.xlane.f32.xlu1 %v7582_v51  ;;  %3105 = vadd.xlane.f32.xlu0 %v7580_v61 }
 0xa57   : > { %3173 = vrot.lane.b32.xlu1 %v6807_v59, %s6258_s21 }
 0xa5b   : > { %5751 = vrot.lane.b32.xlu1 %v8583_v17, %s6259_s22 }
 0xa5c   : > { %3171 = vrot.lane.b32.xlu0 %v6810_v60, %s6258_s21 }
 0xa5f   : > { %5756 = vrot.lane.b32.xlu1 %v5755_v32, %s6260_s27  ;;  %v8589_v32 = vld [vmem:[#allocation29_spill] sm:$0xff] }
 0xa60   : > { %v8591_v28 = vpack.i.bf16 %v8589_v32, %v8590_v2 }
 0xa61   : > { %v3038_v26 = vpop.xlane.xlu1 %3037 }
 0xa62   : > { %v3054_v40 = vsub.f32 %v7525_v12, %v3038_v26 }
 0xa63   : > { %5761 = vrot.lane.b32.xlu1 %v5760_v24, %s6260_s27 }
 0xa64   : > { %v3085_v18 = vmul.f32 1.442695, %v3054_v40 }
 0xa65   : > { %v3034_v59 = vpop.xlane.xlu1 %3033 }
 0xa66   : > { %v3052_v60 = vsub.f32 %v7527_v45, %v3034_v59 }
 0xa67   : > { %5771 = vrot.lane.b32.xlu1 %v8584_v0, %s6259_s22 }
 0xa68   : > { %v3081_v41 = vmul.f32 1.442695, %v3052_v60 }
 0xa69   : > { %v3170_v39 = vpop.permute.xlu1 %3169 }
 0xa6a   : > { %5558 = vmatprep.subr.bf16.mxu1 %v3170_v39  ;;  %6099 = vpow2.f32 %v3081_v41 }
 0xa6b   : > { %5781 = vrot.lane.b32.xlu1 %v5780_v30, %s6260_s27  ;;  %5559 = vmatpush3.bf16.msra.mxu1 %v3170_v39  ;;  %6101 = vpow2.f32 %v3085_v18 }
 0xa6f   : > { %5791 = vrot.lane.b32.xlu1 %v8585_v55, %s6259_s22 }
 0xa74   : > { %v7616_v42 = vpop.eup %6099 }
 0xa75   : > { %v7619_v24 = vpop.eup %6101 }
 0xa7b   : > { %3113 = vadd.xlane.f32.xlu0 %v7616_v42 }
 0xa7f   : > { %3117 = vadd.xlane.f32.xlu0 %v7619_v24 }
 0xa95   : > { %5746 = vrot.lane.b32.xlu0 %v8586_v15, %s6259_s22 }
 0xa99   : > { %5766 = vrot.lane.b32.xlu0 %v8587_v13, %s6259_s22 }
 0xa9d   : > { %5776 = vrot.lane.b32.xlu0 %v8588_v14, %s6260_s27 }
 0xaa1   : > { %5786 = vrot.lane.b32.xlu0 %v8591_v28, %s6259_s22 }
 0xab3   : > { %v3092_v30 = vpop.xlane.xlu1 %3091 }
 0xab7   : > { %v3088_v12 = vpop.xlane.xlu1 %3087 }
 0xab8   : > { %6103 = vrcp.f32 %v3088_v12 }
 0xabb   : > { %v3094_v45 = vpop.xlane.xlu1 %3093 }
 0xabf   : > { %v3100_v7 = vpop.xlane.xlu0 %3099  ;;  %v3090_v22 = vpop.xlane.xlu1 %3089 }
 0xac0   : > { %6105 = vrcp.f32 %v3090_v22 }
 0xac1   : > { %6107 = vrcp.f32 %v3094_v45 }
 0xac2   : > { %v6104_v54 = vpop.eup %6103 }
 0xac3   : > { %v3096_v44 = vpop.xlane.xlu0 %3095  ;;  %v3098_v43 = vpop.xlane.xlu1 %3097  ;;  %v3135_v34 = vmul.f32 %v6104_v54, %v7542_v3 }
 0xac4   : > { %6109 = vrcp.f32 %v3096_v44 }
 0xac5   : > { %6111 = vrcp.f32 %v3098_v43  ;;  %v5871_v43 = vld [vmem:[%s6462_s5] sm:$0xff]  }
 0xac6   : > { %6113 = vrcp.f32 %v3092_v30 }
 0xac7   : > { %v3102_v10 = vpop.xlane.xlu0 %3101 }
 0xac8   : > { %6115 = vrcp.f32 %v3102_v10  ;;  %v5872_v10 = vld [vmem:[%s6462_s5 + $0x8] sm:$0xff]  }
 0xaca   : > { %v6106_v8 = vpop.eup %6105 }
 0xacb   : > { %v3108_v6 = vpop.xlane.xlu0 %3107  ;;  %v3104_v4 = vpop.xlane.xlu1 %3103  ;;  %v3136_v47 = vmul.f32 %v6106_v8, %v7550_v52 }
 0xacc   : > { %v6108_v9 = vpop.eup %6107 }
 0xacd   : > { %v3151_v36 = vpack.c.bf16 %v3136_v47, %v3135_v34  ;;  %v3138_v58 = vmul.f32 %v6108_v9, %v7545_v37  ;;  %v8593_v47 = vpack.i.bf16 %v7496_v1, %v7490_v11  ;;  %v8594_v9 = vld [vmem:[#allocation32_spill] sm:$0xff] }
 0xace   : > { %v6110_v62 = vpop.eup %6109 }
 0xacf   : > { %v3110_v19 = vpop.xlane.xlu0 %3109  ;;  %v3116_v63 = vpop.xlane.xlu1 %3115  ;;  %5564 = vmatprep.mubr.bf16.mxu1 %v3151_v36  ;;  %v3139_v17 = vmul.f32 %v6110_v62, %v7560_v20  ;;  %v8595_v62 = vld [vmem:[#allocation30_spill] sm:$0xff] }
 0xad0   : > { %v6112_v48 = vpop.eup %6111 }
 0xad1   : > { %v6114_v3 = vpop.eup %6113  ;;  %v3140_v26 = vmul.f32 %v6112_v48, %v7558_v29  ;;  %v8598_v48 = vld [vmem:[#allocation31_spill] sm:$0xff] }
 0xad2   : > { %v3137_v59 = vmul.f32 %v6114_v3, %v7539_v46  ;;  %v6116_v60 = vpop.eup %6115 }
 0xad3   : > { %v3106_v21 = vpop.xlane.xlu0 %3105  ;;  %v3112_v27 = vpop.xlane.xlu1 %3111  ;;  %v3153_v39 = vpack.c.bf16 %v3140_v26, %v3139_v17  ;;  %v3142_v37 = vmul.f32 %v6116_v60, %v7565_v53  ;;  %v8600_v17 = vpack.i.bf16 %v7504_v16, %v7500_v35  ;;  %v8601_v26 = vpack.i.bf16 %v7508_v31, %v7502_v5 }
 0xad4   : > { %6117 = vrcp.f32 %v3106_v21  ;;  %v3152_v0 = vpack.c.bf16 %v3138_v58, %v3137_v59 }
 0xad5   : > { %6119 = vrcp.f32 %v3100_v7 }
 0xad6   : > { %6121 = vrcp.f32 %v3104_v4 }
 0xad7   : > { %v3172_v33 = vpop.permute.xlu0 %3171  ;;  %v3174_v52 = vpop.permute.xlu1 %3173  ;;  %6123 = vrcp.f32 %v3110_v19 }
 0xad8   : > { %5560 = vmatprep.subr.bf16.mxu1 %v3172_v33  ;;  %6125 = vrcp.f32 %v3108_v6 }
 0xad9   : > { %5561 = vmatpush3.bf16.msra.mxu1 %v3172_v33  ;;  %6127 = vrcp.f32 %v3112_v27  ;;  %v8597_v33 = vld [vmem:[#allocation33_spill] sm:$0xff] }
 0xada   : > { %5562 = vmatprep.subr.bf16.mxu1 %v3174_v52  ;;  %v8599_v11 = vpack.i.bf16 %v8597_v33, %v8598_v48  ;;  %v8606_v48 = vld [vmem:[#allocation16_spill] sm:$0xff] }
 0xadd   : > { %5563 = vmatpush3.bf16.msra.mxu1 %v3174_v52 }
 0xade   : > { %v6118_v40 = vpop.eup %6117  ;;  %5580 = vmatprep.subr.bf16.mxu1 %v5871_v43 }
 0xadf   : > { %v6120_v41 = vpop.eup %6119  ;;  %v3144_v18 = vmul.f32 %v6118_v40, %v7580_v61 }
 0xae0   : > { %5565 = vmatmul.mubr.bf16.vlgmr.msra.gmra.mrb[64].mxu1 %v3152_v0  ;;  %v6122_v55 = vpop.eup %6121  ;;  %v3141_v20 = vmul.f32 %v6120_v41, %v7552_v25 }
 0xae1   : > { %5568 = vmatprep.mubr.bf16.mxu1 %v3153_v39  ;;  %v3143_v29 = vmul.f32 %v6122_v55, %v7570_v57  ;;  %v6124_v15 = vpop.eup %6123  ;;  %5581 = vmatpush3.bf16.msra.mxu1 %v5871_v43  ;;  %v5752_v55 = vpop.permute.xlu1 %5751 }
 0xae2   : > { %v3154_v46 = vpack.c.bf16 %v3142_v37, %v3141_v20  ;;  %v6126_v14 = vpop.eup %6125  ;;  %v3146_v32 = vmul.f32 %v6124_v15, %v7574_v38  ;;  %5582 = vmatprep.subr.bf16.mxu1 %v5872_v10  ;;  %v5754_v5 = vunpack.i.h.bf16 %v5752_v55  ;;  %v5753_v31 = vunpack.i.l.bf16 %v5752_v55 }
 0xae3   : > { %v3155_v13 = vpack.c.bf16 %v3144_v18, %v3143_v29  ;;  %v3145_v2 = vmul.f32 %v6126_v14, %v7568_v56  ;;  %v6128_v57 = vpop.eup %6127 }
 0xae4   : > { %v3147_v30 = vmul.f32 %v6128_v57, %v7582_v51  ;;  %v8603_v57 = vld [vmem:[#allocation12_spill] sm:$0xff] }
 0xae5   : > { %v3156_v28 = vpack.c.bf16 %v3146_v32, %v3145_v2  ;;  %5583 = vmatpush3.bf16.msra.mxu1 %v5872_v10  ;;  %v5757_v37 = vpop.permute.xlu1 %5756 }
 0xae8   : > { %5569 = vmatmul.mubr.bf16.gmra.mrb[68].mxu1 %v3154_v46 }
 0xae9   : > { %5572 = vmatprep.mubr.bf16.mxu1 %v3155_v13  ;;  %v5762_v18 = vpop.permute.xlu1 %5761 }
 0xaea   : > { %v5764_v32 = vunpack.i.h.bf16 %v5762_v18  ;;  %v5763_v2 = vunpack.i.l.bf16 %v5762_v18 }
 0xaed   : > { %v5772_v16 = vpop.permute.xlu1 %5771 }
 0xaf0   : > { %5573 = vmatmul.mubr.bf16.gmra.mrb[72].mxu1 %v3156_v28 }
 0xaf1   : > { %v5782_v29 = vpop.permute.xlu1 %5781 }
 0xaf5   : > { %v7688_v15 = vpop.permute.xlu1 %5791 }
 0xb08   : > { %v3114_v53 = vpop.xlane.xlu0 %3113 }
 0xb09   : > { %6129 = vrcp.f32 %v3114_v53  ;;  %v8602_v53 = vld [vmem:[#allocation14_spill] sm:$0xff] }
 0xb0a   : > { %6131 = vrcp.f32 %v3116_v63 }
 0xb0c   : > { %v3118_v25 = vpop.xlane.xlu0 %3117 }
 0xb0d   : > { %6133 = vrcp.f32 %v3118_v25  ;;  %v3475_v25 = vsel %vm1511_vm2, %v8602_v53, %v5754_v5 }
 0xb0e   : > { %v3492_v43 = vsel %vm3488_vm3, %v3475_v25, %v5764_v32 }
 0xb10   : > { %v5747_v35 = vpop.permute.xlu0 %5746 }
 0xb11   : > { %v5749_v13 = vunpack.i.h.bf16 %v5747_v35  ;;  %v5748_v14 = vunpack.i.l.bf16 %v5747_v35 }
 0xb13   : > { %v6130_v61 = vpop.eup %6129 }
 0xb14   : > { %v3148_v12 = vmul.f32 %v6130_v61, %v7616_v42  ;;  %v6132_v45 = vpop.eup %6131  ;;  %v5767_v20 = vpop.permute.xlu0 %5766  ;;  %v3474_v61 = vsel %vm1511_vm2, %v8603_v57, %v5753_v31  ;;  %v5793_v31 = vunpack.i.l.bf16 %v7688_v15 }
 0xb15   : > { %v3149_v56 = vmul.f32 %v6132_v45, %v7576_v49  ;;  %v8604_v45 = vld [vmem:[#allocation15_spill] sm:$0xff]  ;;  %v5768_v33 = vunpack.i.l.bf16 %v5767_v20 }
 0xb16   : > { %v3157_v38 = vpack.c.bf16 %v3148_v12, %v3147_v30  ;;  %v5759_v30 = vunpack.i.h.bf16 %v5757_v37  ;;  %v5758_v12 = vunpack.i.l.bf16 %v5757_v37  ;;  %v8609_v37 = vld [vmem:[#allocation17_spill] sm:$0xff] }
 0xb17   : > { %v6134_v7 = vpop.eup %6133  ;;  %v3476_v18 = vsel %vm1511_vm2, %v8609_v37, %v5768_v33 }
 0xb18   : > { %5576 = vmatprep.mubr.bf16.mxu1 %v3157_v38  ;;  %v3150_v22 = vmul.f32 %v6134_v7, %v7619_v24  ;;  %v8592_v24 = vpack.i.bf16 %v7492_v23, %v7488_v50  ;;  %v8596_v50 = vpack.i.bf16 %v8594_v9, %v8595_v62  ;;  %v5777_v46 = vpop.permute.xlu0 %5776  ;;  %v3473_v38 = vsel %vm1511_vm2, %v8604_v45, %v5749_v13  ;;  %v8605_v7 = vld [vmem:[#allocation13_spill] sm:$0xff] }
 0xb19   : > { %v5784_v9 = vunpack.i.h.bf16 %v5782_v29 }
 0xb1a   : > { %v3158_v44 = vpack.c.bf16 %v3150_v22, %v3149_v56  ;;  %v3472_v56 = vsel %vm1511_vm2, %v8605_v7, %v5748_v14  ;;  %v8610_v7 = vld [vmem:[#allocation22_spill] sm:$0xff] }
 0xb1c   : > { %5577 = vmatmul.mubr.bf16.gmra.mrb[76].mxu1 %v3158_v44  ;;  %v7690_v28 = vpop.permute.xlu0 %5786  ;;  %v3491_v44 = vsel %vm3488_vm3, %v3474_v61, %v5763_v2 }
 0xb1d   : > { %v5789_v53 = vunpack.i.h.bf16 %v7690_v28  ;;  %v5788_v25 = vunpack.i.l.bf16 %v7690_v28 }
 0xbb3   : > { %v5566_v54 = vpop.f32.mrb[64].mxu1 }
 0xbb4   : > { %v3217_v51 = vpop.f32.mrb[65].mxu1 }
 0xbb5   : > { %v5567_v8 = vpop.f32.mrb[66].mxu1 }
 0xbb6   : > { %v5795_v42 = vpack.i.bf16 %v5567_v8, %v5566_v54  ;;  %v3220_v6 = vpop.f32.mrb[67].mxu1  ;;  %v5774_v8 = vunpack.i.h.bf16 %v5772_v16 }
 0xbb7   : > { %v5800_v4 = vpack.i.bf16 %v3220_v6, %v3217_v51 }
 0xbb8   : > { %5796 = vrot.lane.b32.xlu1 %v5795_v42, %s6261_s8  ;;  %v5773_v42 = vunpack.i.l.bf16 %v5772_v16 }
 0xbb9   : > { %5801 = vrot.lane.b32.xlu0 %v5800_v4, %s6261_s8 }
 0xbbb   : > { %v5570_v49 = vpop.f32.mrb[68].mxu1 }
 0xbbc   : > { %5811 = vrot.lane.b32.xlu1 %v8592_v24, %s6260_s27  ;;  %v3233_v34 = vpop.f32.mrb[69].mxu1 }
 0xbbd   : > { %5806 = vrot.lane.b32.xlu0 %v8593_v47, %s6260_s27  ;;  %v5571_v36 = vpop.f32.mrb[70].mxu1  ;;  %v3490_v47 = vsel %vm3488_vm3, %v3473_v38, %v5759_v30 }
 0xbbe   : > { %v5815_v19 = vpack.i.bf16 %v5571_v36, %v5570_v49  ;;  %v3236_v63 = vpop.f32.mrb[71].mxu1  ;;  %v5783_v36 = vunpack.i.l.bf16 %v5782_v29 }
 0xbbf   : > { %v5820_v21 = vpack.i.bf16 %v3236_v63, %v3233_v34  ;;  %v3489_v34 = vsel %vm3488_vm3, %v3472_v56, %v5758_v12  ;;  %v8611_v56 = vld [vmem:[#allocation20_spill] sm:$0xff] }
 0xbc0   : > { %5816 = vrot.lane.b32.xlu1 %v5815_v19, %s6261_s8 }
 0xbc1   : > { %5821 = vrot.lane.b32.xlu0 %v5820_v21, %s6261_s8 }
 0xbc3   : > { %v5574_v27 = vpop.f32.mrb[72].mxu1 }
 0xbc4   : > { %5831 = vrot.lane.b32.xlu1 %v8596_v50, %s6259_s22  ;;  %v3249_v23 = vpop.f32.mrb[73].mxu1 }
 0xbc5   : > { %5826 = vrot.lane.b32.xlu0 %v8599_v11, %s6259_s22  ;;  %v5575_v1 = vpop.f32.mrb[74].mxu1  ;;  %v3478_v11 = vsel %vm1511_vm2, %v8606_v48, %v5773_v42 }
 0xbc6   : > { %v5835_v3 = vpack.i.bf16 %v5575_v1, %v5574_v27  ;;  %v3252_v52 = vpop.f32.mrb[75].mxu1  ;;  %v5779_v1 = vunpack.i.h.bf16 %v5777_v46 }
 0xbc7   : > { %v5840_v58 = vpack.i.bf16 %v3252_v52, %v3249_v23  ;;  %v5769_v23 = vunpack.i.h.bf16 %v5767_v20  ;;  %v8607_v52 = vld [vmem:[#allocation18_spill] sm:$0xff] }
 0xbc8   : > { %5836 = vrot.lane.b32.xlu1 %v5835_v3, %s6261_s8  ;;  %v5778_v3 = vunpack.i.l.bf16 %v5777_v46 }
 0xbc9   : > { %5841 = vrot.lane.b32.xlu0 %v5840_v58, %s6261_s8  ;;  %v3479_v58 = vsel %vm1511_vm2, %v8607_v52, %v5774_v8 }
 0xbca   : > { %v3493_v20 = vsel %vm3488_vm3, %v3476_v18, %v5778_v3 }
 0xbcc   : > { %5851 = vrot.lane.b32.xlu1 %v8600_v17, %s6260_s27  ;;  %v3495_v17 = vsel %vm3488_vm3, %v3478_v11, %v5783_v36 }
 0xbcd   : > { %5846 = vrot.lane.b32.xlu0 %v8601_v26, %s6260_s27 }
 0xbef   : > { %v5578_v59 = vpop.f32.mrb[76].mxu1 }
 0xbf0   : > { %v3265_v0 = vpop.f32.mrb[77].mxu1 }
 0xbf1   : > { %v5579_v60 = vpop.f32.mrb[78].mxu1 }
 0xbf2   : > { %v5860_v39 = vpack.i.bf16 %v5579_v60, %v5578_v59  ;;  %v3268_v40 = vpop.f32.mrb[79].mxu1  ;;  %v3496_v59 = vsel %vm3488_vm3, %v3479_v58, %v5784_v9 }
 0xbf3   : > { %v5855_v41 = vpack.i.bf16 %v3268_v40, %v3265_v0  ;;  %v5794_v0 = vunpack.i.h.bf16 %v7688_v15 }
 0xbf4   : > { %5861 = vrot.lane.b32.xlu1 %v5860_v39, %s6261_s8 }
 0xbf5   : > { %5856 = vrot.lane.b32.xlu0 %v5855_v41, %s6261_s8  ;;  %v8608_v41 = vld [vmem:[#allocation19_spill] sm:$0xff]  ;;  %v3483_v15 = vsel %vm1511_vm2, %v8610_v7, %v5794_v0 }
 0xbf6   : > { %v3477_v55 = vsel %vm1511_vm2, %v8608_v41, %v5769_v23  ;;  %v8617_v41 = vld [vmem:[#allocation25_spill] sm:$0xff] }
 0xbf7   : > { %v3494_v29 = vsel %vm3488_vm3, %v3477_v55, %v5779_v1 }
 0xc2a   : > { %v5797_v22 = vpop.permute.xlu1 %5796 }
 0xc2b   : > { %v5799_v10 = vunpack.i.h.bf16 %v5797_v22  ;;  %v5798_v54 = vunpack.i.l.bf16 %v5797_v22  ;;  %v5802_v51 = vpop.permute.xlu0 %5801  ;;  %v3482_v22 = vsel %vm1511_vm2, %v8611_v56, %v5793_v31 }
 0xc2c   : > { %v5804_v6 = vunpack.i.h.bf16 %v5802_v51  ;;  %v5803_v4 = vunpack.i.l.bf16 %v5802_v51 }
 0xc2d   : > { %v3508_v49 = vsel %vm3505_vm4, %v3491_v44, %v5798_v54  ;;  %v3509_v24 = vsel %vm3505_vm4, %v3492_v43, %v5799_v10  ;;  %v8612_v43 = vld [vmem:[#allocation23_spill] sm:$0xff]  ;;  %v8613_v10 = vld [vmem:[#allocation21_spill] sm:$0xff] }
 0xc2e   : > { %v3523_v19 = vpack.c.bf16 %v3509_v24, %v3508_v49  ;;  %v3506_v63 = vsel %vm3505_vm4, %v3489_v34, %v5803_v4  ;;  %v3507_v21 = vsel %vm3505_vm4, %v3490_v47, %v5804_v6  ;;  %v5812_v27 = vpop.permute.xlu1 %5811  ;;  %v3481_v28 = vsel %vm1511_vm2, %v8612_v43, %v5789_v53 }
 0xc2f   : > { %v3522_v62 = vpack.c.bf16 %v3507_v21, %v3506_v63  ;;  %v5807_v50 = vpop.permute.xlu0 %5806  ;;  %v5814_v30 = vunpack.i.h.bf16 %v5812_v27  ;;  %v5813_v12 = vunpack.i.l.bf16 %v5812_v27  ;;  %v3480_v54 = vsel %vm1511_vm2, %v8613_v10, %v5788_v25  ;;  %v6201_v10 = vld [vmem:[%s6506_s13 + $0x8] sm:$0xff] }
 0xc30   : > { %v5809_v45 = vunpack.i.h.bf16 %v5807_v50  ;;  %v5808_v38 = vunpack.i.l.bf16 %v5807_v50 }
 0xc31   : > { %5584 = vmatprep.mubr.msk.bf16.mxu1 %vm1085_vm1, %v3522_v62  ;;  %v3499_v6 = vsel %vm3488_vm3, %v3482_v22, %v5813_v12  ;;  %v3500_v4 = vsel %vm3488_vm3, %v3483_v15, %v5814_v30  ;;  %v6199_v15 = vld [vmem:[%s6506_s13] sm:$0xff] }
 0xc32   : > { %v5817_v26 = vpop.permute.xlu1 %5816  ;;  %5585 = vmatmul.mubr.msk.bf16.vlgmr.msra.gmra.mrb[80].mxu1 %vm1085_vm1, %v3523_v19  ;;  %v3498_v34 = vsel %vm3488_vm3, %v3481_v28, %v5809_v45  ;;  %v3497_v47 = vsel %vm3488_vm3, %v3480_v54, %v5808_v38 }
 0xc33   : > { %v5819_v60 = vunpack.i.h.bf16 %v5817_v26  ;;  %v5818_v39 = vunpack.i.l.bf16 %v5817_v26  ;;  %v5822_v40 = vpop.permute.xlu0 %5821 }
 0xc34   : > { %v5824_v35 = vunpack.i.h.bf16 %v5822_v40  ;;  %v5823_v16 = vunpack.i.l.bf16 %v5822_v40 }
 0xc35   : > { %v3512_v46 = vsel %vm3505_vm4, %v3495_v17, %v5818_v39  ;;  %v3513_v5 = vsel %vm3505_vm4, %v3496_v59, %v5819_v60  ;;  %v8614_v17 = vld [vmem:[#allocation26_spill] sm:$0xff]  ;;  %v8615_v59 = vld [vmem:[#allocation24_spill] sm:$0xff]  ;;  %v8616_v39 = vld [vmem:[#allocation27_spill] sm:$0xff] }
 0xc36   : > { %v3525_v13 = vpack.c.bf16 %v3513_v5, %v3512_v46  ;;  %v3511_v14 = vsel %vm3505_vm4, %v3494_v29, %v5824_v35  ;;  %v3510_v32 = vsel %vm3505_vm4, %v3493_v20, %v5823_v16  ;;  %v5832_v2 = vpop.permute.xlu1 %5831 }
 0xc37   : > { %v3524_v57 = vpack.c.bf16 %v3511_v14, %v3510_v32  ;;  %v5827_v61 = vpop.permute.xlu0 %5826  ;;  %v5834_v50 = vunpack.i.h.bf16 %v5832_v2  ;;  %v5833_v23 = vunpack.i.l.bf16 %v5832_v2 }
 0xc38   : > { %v5829_v48 = vunpack.i.h.bf16 %v5827_v61  ;;  %v5828_v11 = vunpack.i.l.bf16 %v5827_v61 }
 0xc39   : > { %5588 = vmatprep.mubr.msk.bf16.mxu1 %vm1085_vm1, %v3524_v57  ;;  %v3487_v26 = vsel %vm1511_vm2, %v8614_v17, %v5834_v50  ;;  %v3486_v0 = vsel %vm1511_vm2, %v8615_v59, %v5833_v23  ;;  %v7773_v57 = vld [vmem:[%s8618_s3] ss:$0 sm:$0xff] }
 0xc3a   : > { %v5837_v44 = vpop.permute.xlu1 %5836  ;;  %5589 = vmatmul.mubr.msk.bf16.gmra.mrb[84].mxu1 %vm1085_vm1, %v3525_v13  ;;  %v3485_v40 = vsel %vm1511_vm2, %v8616_v39, %v5829_v48  ;;  %v3484_v55 = vsel %vm1511_vm2, %v8617_v41, %v5828_v11 }
 0xc3b   : > { %v5839_v51 = vunpack.i.h.bf16 %v5837_v44  ;;  %v5838_v8 = vunpack.i.l.bf16 %v5837_v44  ;;  %v5842_v42 = vpop.permute.xlu0 %5841  ;;  %v6200_v44 = vld [vmem:[%s6506_s13 + $0x10] sm:$0xff] }
 0xc3c   : > { %v5844_v49 = vunpack.i.h.bf16 %v5842_v42  ;;  %v5843_v24 = vunpack.i.l.bf16 %v5842_v42 }
 0xc3d   : > { %v3516_v36 = vsel %vm3505_vm4, %v3499_v6, %v5838_v8  ;;  %v3517_v19 = vsel %vm3505_vm4, %v3500_v4, %v5839_v51  ;;  %v6202_v4 = vld [vmem:[%s6506_s13 + $0x18] sm:$0xff] }
 0xc3e   : > { %v3527_v63 = vpack.c.bf16 %v3517_v19, %v3516_v36  ;;  %v3515_v21 = vsel %vm3505_vm4, %v3498_v34, %v5844_v49  ;;  %v3514_v27 = vsel %vm3505_vm4, %v3497_v47, %v5843_v24  ;;  %v5852_v62 = vpop.permute.xlu1 %5851 }
 0xc3f   : > { %v3526_v9 = vpack.c.bf16 %v3515_v21, %v3514_v27  ;;  %v5847_v33 = vpop.permute.xlu0 %5846  ;;  %v5854_v1 = vunpack.i.h.bf16 %v5852_v62  ;;  %v5853_v3 = vunpack.i.l.bf16 %v5852_v62  ;;  %v6203_v27 = vld [vmem:[%s6506_s13 + $0x20] sm:$0xff]  ;;  %v6204_v62 = vld [vmem:[%s6506_s13 + $0x28] sm:$0xff] }
 0xc40   : > { %v5849_v52 = vunpack.i.h.bf16 %v5847_v33  ;;  %v5848_v58 = vunpack.i.l.bf16 %v5847_v33  ;;  %v6205_v33 = vld [vmem:[%s6506_s13 + $0x38] sm:$0xff] }
 0xc41   : > { %5592 = vmatprep.mubr.msk.bf16.mxu1 %vm1085_vm1, %v3526_v9  ;;  %v3503_v16 = vsel %vm3488_vm3, %v3486_v0, %v5853_v3  ;;  %v3504_v20 = vsel %vm3488_vm3, %v3487_v26, %v5854_v1 }
 0xc42   : > { %5593 = vmatmul.mubr.msk.bf16.gmra.mrb[88].mxu1 %vm1085_vm1, %v3527_v63  ;;  %v3502_v5 = vsel %vm3488_vm3, %v3485_v40, %v5849_v52  ;;  %v3501_v31 = vsel %vm3488_vm3, %v3484_v55, %v5848_v58  ;;  %v6206_v52 = vld [vmem:[%s6506_s13 + $0x30] sm:$0xff]  ;;  %v6207_v55 = vld [vmem:[%s6506_s13 + $0x40] sm:$0xff] }
 0xc66   : > { %v5862_v60 = vpop.permute.xlu1 %5861 }
 0xc67   : > { %v5864_v37 = vunpack.i.h.bf16 %v5862_v60  ;;  %v5863_v18 = vunpack.i.l.bf16 %v5862_v60  ;;  %v5857_v35 = vpop.permute.xlu0 %5856 }
 0xc68   : > { %v5859_v29 = vunpack.i.h.bf16 %v5857_v35  ;;  %v5858_v46 = vunpack.i.l.bf16 %v5857_v35 }
 0xc69   : > { %v3520_v13 = vsel %vm3505_vm4, %v3503_v16, %v5863_v18  ;;  %v3521_v14 = vsel %vm3505_vm4, %v3504_v20, %v5864_v37  ;;  %v6208_v18 = vld [vmem:[%s6506_s13 + $0x48] sm:$0xff]  ;;  %v6209_v20 = vld [vmem:[%s6506_s13 + $0x58] sm:$0xff] }
 0xc6a   : > { %v3529_v32 = vpack.c.bf16 %v3521_v14, %v3520_v13  ;;  %v3519_v2 = vsel %vm3505_vm4, %v3502_v5, %v5859_v29  ;;  %v3518_v53 = vsel %vm3505_vm4, %v3501_v31, %v5858_v46  ;;  %v6210_v5 = vld [vmem:[%s6506_s13 + $0x50] sm:$0xff] }
 0xc6b   : > { %v3528_v25 = vpack.c.bf16 %v3519_v2, %v3518_v53 }
 0xc6d   : > { %5596 = vmatprep.mubr.msk.bf16.mxu1 %vm1085_vm1, %v3528_v25 }
 0xc6e   : > { %5597 = vmatmul.mubr.msk.bf16.gmra.mrb[92].mxu1 %vm1085_vm1, %v3529_v32 }
 0xd05   : > { %v5586_v61 = vpop.f32.mrb[80].mxu1 }
 0xd06   : > { %v3611_v30 = vpop.f32.mrb[81].mxu1  ;;  %v3620_v12 = vadd.f32 %v5586_v61, %v7773_v57 }
 0xd07   : > { %v3612_v45 = vadd.f32 %v7773_v57, %v3611_v30  ;;  %v5587_v38 = vpop.f32.mrb[82].mxu1 }
 0xd08   : > { %v3614_v7 = vpop.f32.mrb[83].mxu1  ;;  %v7782_v43 = vadd.f32 %v6200_v44, %v3620_v12  ;;  %v3623_v28 = vadd.f32 %v5587_v38, %v7773_v57  ;;  %v6211_v38 = vld [vmem:[%s6506_s13 + $0x60] sm:$0xff] }
 0xd09   : > { %v7778_v56 = vadd.f32 %v6199_v15, %v3612_v45  ;;  %v3615_v22 = vadd.f32 %v7773_v57, %v3614_v7 }
 0xd0a   : > { %v7793_v49 = vadd.f32 %v6202_v4, %v3623_v28  ;;  %v3698_v47 = vsel %vm1085_vm1, %v7782_v43, 0.0  ;;  %v6213_v28 = vld [vmem:[%s6506_s13 + $0x68] sm:$0xff] }
 0xd0b   : > { %v7786_v54 = vadd.f32 %v6201_v10, %v3615_v22  ;;  %v3692_v51 = vsel %vm1085_vm1, %v7778_v56, 0.0  ;;  %v6212_v22 = vld [vmem:[%s6506_s13 + $0x70] sm:$0xff] }
 0xd0c   : > { %3693 = vadd.xlane.f32.xlu0 %v3692_v51  ;;  %v3701_v23 = vsel %vm1085_vm1, %v7793_v49, 0.0 }
 0xd0d   : > { %v5590_v8 = vpop.f32.mrb[84].mxu1  ;;  %v3695_v42 = vsel %vm1085_vm1, %v7786_v54, 0.0 }
 0xd0e   : > { %v3627_v6 = vpop.f32.mrb[85].mxu1  ;;  %3696 = vadd.xlane.f32.xlu1 %v3695_v42  ;;  %v3636_v21 = vadd.f32 %v5590_v8, %v7773_v57  ;;  %v6214_v8 = vld [vmem:[%s6506_s13 + $0x78] sm:$0xff] }
 0xd0f   : > { %v3628_v24 = vadd.f32 %v7773_v57, %v3627_v6  ;;  %v5591_v34 = vpop.f32.mrb[86].mxu1 }
 0xd10   : > { %v3630_v36 = vpop.f32.mrb[87].mxu1  ;;  %3699 = vadd.xlane.f32.xlu0 %v3698_v47  ;;  %v3639_v19 = vadd.f32 %v5591_v34, %v7773_v57  ;;  %v7815_v58 = vadd.f32 %v6206_v52, %v3636_v21 }
 0xd11   : > { %v3631_v63 = vadd.f32 %v7773_v57, %v3630_v36  ;;  %v7802_v9 = vadd.f32 %v6203_v27, %v3628_v24 }
 0xd12   : > { %v7810_v48 = vadd.f32 %v6205_v33, %v3639_v19  ;;  %v3710_v16 = vsel %vm1085_vm1, %v7815_v58, 0.0 }
 0xd13   : > { %v7805_v50 = vadd.f32 %v6204_v62, %v3631_v63  ;;  %v3704_v59 = vsel %vm1085_vm1, %v7802_v9, 0.0 }
 0xd14   : > { %3702 = vadd.xlane.f32.xlu0 %v3701_v23  ;;  %v3713_v40 = vsel %vm1085_vm1, %v7810_v48, 0.0 }
 0xd15   : > { %v5594_v11 = vpop.f32.mrb[88].mxu1  ;;  %v3707_v1 = vsel %vm1085_vm1, %v7805_v50, 0.0 }
 0xd16   : > { %v3643_v3 = vpop.f32.mrb[89].mxu1  ;;  %3708 = vadd.xlane.f32.xlu1 %v3707_v1  ;;  %v3652_v41 = vadd.f32 %v5594_v11, %v7773_v57 }
 0xd17   : > { %v3644_v17 = vadd.f32 %v7773_v57, %v3643_v3  ;;  %v5595_v26 = vpop.f32.mrb[90].mxu1 }
 0xd18   : > { %v3646_v0 = vpop.f32.mrb[91].mxu1  ;;  %3705 = vadd.xlane.f32.xlu0 %v3704_v59  ;;  %v3655_v60 = vadd.f32 %v5595_v26, %v7773_v57  ;;  %v7839_v31 = vadd.f32 %v6210_v5, %v3652_v41 }
 0xd19   : > { %v3647_v39 = vadd.f32 %v7773_v57, %v3646_v0  ;;  %v7826_v37 = vadd.f32 %v6207_v55, %v3644_v17 }
 0xd1a   : > { %3714 = vadd.xlane.f32.xlu1 %v3713_v40  ;;  %v7834_v29 = vadd.f32 %v6209_v20, %v3655_v60  ;;  %v3722_v32 = vsel %vm1085_vm1, %v7839_v31, 0.0 }
 0xd1b   : > { %v7829_v35 = vadd.f32 %v6208_v18, %v3647_v39  ;;  %v3716_v13 = vsel %vm1085_vm1, %v7826_v37, 0.0 }
 0xd1c   : > { %3711 = vadd.xlane.f32.xlu0 %v3710_v16  ;;  %v3725_v14 = vsel %vm1085_vm1, %v7834_v29, 0.0 }
 0xd1d   : > { %v3719_v46 = vsel %vm1085_vm1, %v7829_v35, 0.0 }
 0xd1e   : > { %3720 = vadd.xlane.f32.xlu1 %v3719_v46 }
 0xd20   : > { %3717 = vadd.xlane.f32.xlu0 %v3716_v13 }
 0xd22   : > { %3726 = vadd.xlane.f32.xlu1 %v3725_v14 }
 0xd24   : > { %3723 = vadd.xlane.f32.xlu0 %v3722_v32 }
 0xd41   : > { %v5598_v2 = vpop.f32.mrb[92].mxu1 }
 0xd42   : > { %v3668_v53 = vadd.f32 %v5598_v2, %v7773_v57  ;;  %v3659_v25 = vpop.f32.mrb[93].mxu1 }
 0xd43   : > { %v3660_v61 = vadd.f32 %v7773_v57, %v3659_v25  ;;  %v5599_v30 = vpop.f32.mrb[94].mxu1 }
 0xd44   : > { %v3671_v12 = vadd.f32 %v5599_v30, %v7773_v57  ;;  %v3662_v45 = vpop.f32.mrb[95].mxu1  ;;  %v7855_v44 = vadd.f32 %v6212_v22, %v3668_v53 }
 0xd45   : > { %v7851_v7 = vadd.f32 %v6211_v38, %v3660_v61  ;;  %v3663_v15 = vadd.f32 %v7773_v57, %v3662_v45 }
 0xd46   : > { %v7863_v42 = vadd.f32 %v6214_v8, %v3671_v12  ;;  %v3734_v57 = vsel %vm1085_vm1, %v7855_v44, 0.0 }
 0xd47   : > { %v7858_v10 = vadd.f32 %v6213_v28, %v3663_v15  ;;  %v3728_v51 = vsel %vm1085_vm1, %v7851_v7, 0.0 }
 0xd48   : > { %3729 = vadd.xlane.f32.xlu0 %v3728_v51  ;;  %v3737_v4 = vsel %vm1085_vm1, %v7863_v42, 0.0 }
 0xd49   : > { %v3731_v6 = vsel %vm1085_vm1, %v7858_v10, 0.0 }
 0xd4a   : > { %3732 = vadd.xlane.f32.xlu1 %v3731_v6 }
 0xd4c   : > { %3735 = vadd.xlane.f32.xlu0 %v3734_v57 }
 0xd4e   : > { %3738 = vadd.xlane.f32.xlu1 %v3737_v4 }
 0xd99   : > { %v3694_v24 = vpop.xlane.xlu0 %3693 }
 0xd9a   : > { %v3741_v34 = vmul.f32 0.03125, %v3694_v24 }
 0xd9b   : > { %v3697_v47 = vpop.xlane.xlu1 %3696 }
 0xd9c   : > { %v7872_v36 = vsub.f32 %v7778_v56, %v3741_v34  ;;  %v3742_v19 = vmul.f32 0.03125, %v3697_v47  ;;  %v5874_v34 = vld [vmem:[%s6479_s26 + $0x8] sm:$0xff]  }
 0xd9d   : > { %v3700_v63 = vpop.xlane.xlu0 %3699 }
 0xd9e   : > { %v7875_v21 = vsub.f32 %v7786_v54, %v3742_v19  ;;  %v3743_v27 = vmul.f32 0.03125, %v3700_v63  ;;  %v3773_v62 = vmul.f32 %v7872_v36, %v7872_v36 }
 0xda0   : > { %v7880_v23 = vsub.f32 %v7782_v43, %v3743_v27  ;;  %v3789_v33 = vsel %vm1085_vm1, %v3773_v62, 0.0  ;;  %v3774_v11 = vmul.f32 %v7875_v21, %v7875_v21 }
 0xda1   : > { %3790 = vadd.xlane.f32.xlu0 %v3789_v33  ;;  %v3703_v56 = vpop.xlane.xlu0 %3702 }
 0xda2   : > { %v3744_v1 = vmul.f32 0.03125, %v3703_v56  ;;  %v3792_v3 = vsel %vm1085_vm1, %v3774_v11, 0.0  ;;  %v3775_v54 = vmul.f32 %v7880_v23, %v7880_v23 }
 0xda3   : > { %3793 = vadd.xlane.f32.xlu1 %v3792_v3  ;;  %v3709_v52 = vpop.xlane.xlu1 %3708 }
 0xda4   : > { %v7889_v17 = vsub.f32 %v7793_v49, %v3744_v1  ;;  %v3746_v43 = vmul.f32 0.03125, %v3709_v52  ;;  %v3795_v26 = vsel %vm1085_vm1, %v3775_v54, 0.0 }
 0xda5   : > { %3796 = vadd.xlane.f32.xlu0 %v3795_v26  ;;  %v3706_v59 = vpop.xlane.xlu0 %3705 }
 0xda6   : > { %v7893_v0 = vsub.f32 %v7805_v50, %v3746_v43  ;;  %v3745_v60 = vmul.f32 0.03125, %v3706_v59  ;;  %v3776_v39 = vmul.f32 %v7889_v17, %v7889_v17 }
 0xda7   : > { %v3715_v40 = vpop.xlane.xlu1 %3714 }
 0xda8   : > { %v7898_v41 = vsub.f32 %v7802_v9, %v3745_v60  ;;  %v3748_v55 = vmul.f32 0.03125, %v3715_v40  ;;  %v3798_v49 = vsel %vm1085_vm1, %v3776_v39, 0.0  ;;  %v3778_v18 = vmul.f32 %v7893_v0, %v7893_v0  ;;  %v5875_v40 = vld [vmem:[%s6489_s2] sm:$0xff]  }
 0xda9   : > { %3799 = vadd.xlane.f32.xlu1 %v3798_v49  ;;  %v3712_v16 = vpop.xlane.xlu0 %3711  ;;  %5620 = vmatprep.subr.bf16.mxu1 %v5875_v40 }
 0xdaa   : > { %v7904_v20 = vsub.f32 %v7810_v48, %v3748_v55  ;;  %v3747_v50 = vmul.f32 0.03125, %v3712_v16  ;;  %v3777_v46 = vmul.f32 %v7898_v41, %v7898_v41  ;;  %v3804_v13 = vsel %vm1085_vm1, %v3778_v18, 0.0  ;;  %v5876_v55 = vld [vmem:[%s6489_s2 + $0x8] sm:$0xff]   ;;  %5621 = vmatpush3.bf16.msra.mxu1 %v5875_v40 }
 0xdab   : > { %v3721_v5 = vpop.xlane.xlu1 %3720  ;;  %5622 = vmatprep.subr.bf16.mxu1 %v5876_v55 }
 0xdac   : > { %v7910_v9 = vsub.f32 %v7815_v58, %v3747_v50  ;;  %v3750_v14 = vmul.f32 0.03125, %v3721_v5  ;;  %v3801_v32 = vsel %vm1085_vm1, %v3777_v46, 0.0  ;;  %v3780_v2 = vmul.f32 %v7904_v20, %v7904_v20 }
 0xdad   : > { %3805 = vadd.xlane.f32.xlu1 %v3804_v13  ;;  %3802 = vadd.xlane.f32.xlu0 %v3801_v32  ;;  %v3718_v48 = vpop.xlane.xlu0 %3717 }
 0xdae   : > { %v7916_v53 = vsub.f32 %v7829_v35, %v3750_v14  ;;  %v3749_v25 = vmul.f32 0.03125, %v3718_v48  ;;  %v3779_v61 = vmul.f32 %v7910_v9, %v7910_v9  ;;  %v3810_v58 = vsel %vm1085_vm1, %v3780_v2, 0.0  ;;  %5623 = vmatpush3.bf16.msra.mxu1 %v5876_v55 }
 0xdaf   : > { %v3727_v30 = vpop.xlane.xlu1 %3726 }
 0xdb0   : > { %v7922_v12 = vsub.f32 %v7826_v37, %v3749_v25  ;;  %v3752_v45 = vmul.f32 0.03125, %v3727_v30  ;;  %v3807_v38 = vsel %vm1085_vm1, %v3779_v61, 0.0  ;;  %v3782_v15 = vmul.f32 %v7916_v53, %v7916_v53 }
 0xdb1   : > { %3811 = vadd.xlane.f32.xlu1 %v3810_v58  ;;  %3808 = vadd.xlane.f32.xlu0 %v3807_v38  ;;  %v3724_v35 = vpop.xlane.xlu0 %3723  ;;  %v7976_v38 = vld [vmem:[%s8619_s25] ss:$0 sm:$0xff] }
 0xdb2   : > { %v7928_v22 = vsub.f32 %v7834_v29, %v3752_v45  ;;  %v3751_v28 = vmul.f32 0.03125, %v3724_v35  ;;  %v3781_v51 = vmul.f32 %v7922_v12, %v7922_v12  ;;  %v3816_v8 = vsel %vm1085_vm1, %v3782_v15, 0.0 }
 0xdb4   : > { %v7933_v37 = vsub.f32 %v7839_v31, %v3751_v28  ;;  %v3813_v6 = vsel %vm1085_vm1, %v3781_v51, 0.0  ;;  %v3784_v57 = vmul.f32 %v7928_v22, %v7928_v22  ;;  %v5873_v31 = vld [vmem:[%s6479_s26] sm:$0xff]  }
 0xdb5   : > { %3817 = vadd.xlane.f32.xlu1 %v3816_v8  ;;  %3814 = vadd.xlane.f32.xlu0 %v3813_v6 }
 0xdb6   : > { %v3783_v29 = vmul.f32 %v7933_v37, %v7933_v37  ;;  %v3822_v4 = vsel %vm1085_vm1, %v3784_v57, 0.0  ;;  %5600 = vmatprep.subr.bf16.mxu0 %v5873_v31 }
 0xdb7   : > { %5601 = vmatpush3.bf16.msra.mxu0 %v5873_v31 }
 0xdb8   : > { %v3819_v24 = vsel %vm1085_vm1, %v3783_v29, 0.0  ;;  %5602 = vmatprep.subr.bf16.mxu0 %v5874_v34 }
 0xdb9   : > { %3823 = vadd.xlane.f32.xlu1 %v3822_v4  ;;  %3820 = vadd.xlane.f32.xlu0 %v3819_v24 }
 0xdbb   : > { %5603 = vmatpush3.bf16.msra.mxu0 %v5874_v34  ;;  %v7986_v34 = vld [vmem:[%s8621_s0] ss:$0 sm:$0xff] }
 0xdd5   : > { %v3730_v47 = vpop.xlane.xlu0 %3729 }
 0xdd6   : > { %v3753_v19 = vmul.f32 0.03125, %v3730_v47 }
 0xdd7   : > { %v3733_v63 = vpop.xlane.xlu1 %3732 }
 0xdd8   : > { %v7946_v27 = vsub.f32 %v7851_v7, %v3753_v19  ;;  %v3754_v62 = vmul.f32 0.03125, %v3733_v63 }
 0xdd9   : > { %v3736_v33 = vpop.xlane.xlu0 %3735 }
 0xdda   : > { %v7949_v11 = vsub.f32 %v7858_v10, %v3754_v62  ;;  %v3755_v56 = vmul.f32 0.03125, %v3736_v33  ;;  %v3785_v1 = vmul.f32 %v7946_v27, %v7946_v27 }
 0xddb   : > { %v3739_v3 = vpop.xlane.xlu1 %3738 }
 0xddc   : > { %v7954_v54 = vsub.f32 %v7855_v44, %v3755_v56  ;;  %v3756_v52 = vmul.f32 0.03125, %v3739_v3  ;;  %v3825_v43 = vsel %vm1085_vm1, %v3785_v1, 0.0  ;;  %v3786_v7 = vmul.f32 %v7949_v11, %v7949_v11 }
 0xddd   : > { %3826 = vadd.xlane.f32.xlu0 %v3825_v43 }
 0xdde   : > { %v7960_v10 = vsub.f32 %v7863_v42, %v3756_v52  ;;  %v3828_v26 = vsel %vm1085_vm1, %v3786_v7, 0.0  ;;  %v3787_v59 = vmul.f32 %v7954_v54, %v7954_v54 }
 0xddf   : > { %3829 = vadd.xlane.f32.xlu1 %v3828_v26 }
 0xde0   : > { %v3831_v60 = vsel %vm1085_vm1, %v3787_v59, 0.0  ;;  %v3788_v44 = vmul.f32 %v7960_v10, %v7960_v10 }
 0xde1   : > { %3832 = vadd.xlane.f32.xlu0 %v3831_v60 }
 0xde2   : > { %v3834_v39 = vsel %vm1085_vm1, %v3788_v44, 0.0 }
 0xde3   : > { %3835 = vadd.xlane.f32.xlu1 %v3834_v39 }
 0xe2e   : > { %v3791_v42 = vpop.xlane.xlu0 %3790 }
 0xe2f   : > { %v3837_v49 = vmul.f32 0.03125, %v3791_v42 }
 0xe30   : > { %v3794_v18 = vpop.xlane.xlu1 %3793 }
 0xe31   : > { %v3853_v16 = vadd.f32 1e-05, %v3837_v49  ;;  %v3838_v50 = vmul.f32 0.03125, %v3794_v18 }
 0xe32   : > { %v3797_v46 = vpop.xlane.xlu0 %3796 }
 0xe33   : > { %6135 = vrsqrt.f32 %v3853_v16  ;;  %v3854_v5 = vadd.f32 1e-05, %v3838_v50  ;;  %v3839_v13 = vmul.f32 0.03125, %v3797_v46 }
 0xe35   : > { %6137 = vrsqrt.f32 %v3854_v5  ;;  %v3855_v14 = vadd.f32 1e-05, %v3839_v13 }
 0xe36   : > { %v3800_v32 = vpop.xlane.xlu1 %3799 }
 0xe37   : > { %6139 = vrsqrt.f32 %v3855_v14  ;;  %v3840_v2 = vmul.f32 0.03125, %v3800_v32 }
 0xe39   : > { %v3856_v48 = vadd.f32 1e-05, %v3840_v2 }
 0xe3a   : > { %v3806_v25 = vpop.xlane.xlu1 %3805  ;;  %v3803_v61 = vpop.xlane.xlu0 %3802 }
 0xe3b   : > { %6141 = vrsqrt.f32 %v3856_v48  ;;  %v3842_v30 = vmul.f32 0.03125, %v3806_v25  ;;  %v3841_v58 = vmul.f32 0.03125, %v3803_v61 }
 0xe3d   : > { %v6136_v45 = vpop.eup %6135  ;;  %v3858_v15 = vadd.f32 1e-05, %v3842_v30  ;;  %v3857_v35 = vadd.f32 1e-05, %v3841_v58 }
 0xe3e   : > { %v3885_v28 = vmul.f32 %v6136_v45, %v7872_v36  ;;  %v3812_v51 = vpop.xlane.xlu1 %3811  ;;  %v3809_v8 = vpop.xlane.xlu0 %3808 }
 0xe3f   : > { %v6138_v6 = vpop.eup %6137  ;;  %6143 = vrsqrt.f32 %v3858_v15  ;;  %v3844_v57 = vmul.f32 0.03125, %v3812_v51  ;;  %v3843_v29 = vmul.f32 0.03125, %v3809_v8 }
 0xe40   : > { %v3886_v4 = vmul.f32 %v6138_v6, %v7875_v21  ;;  %6145 = vrsqrt.f32 %v3857_v35  ;;  %v3907_v24 = vmul.f32 %v7976_v38, %v3885_v28 }
 0xe41   : > { %v6140_v31 = vpop.eup %6139  ;;  %v3860_v47 = vadd.f32 1e-05, %v3844_v57  ;;  %v3859_v36 = vadd.f32 1e-05, %v3843_v29 }
 0xe42   : > { %v3887_v19 = vmul.f32 %v6140_v31, %v7880_v23  ;;  %v3818_v63 = vpop.xlane.xlu1 %3817  ;;  %v3815_v62 = vpop.xlane.xlu0 %3814  ;;  %v3908_v33 = vmul.f32 %v7976_v38, %v3886_v4  ;;  %v7991_v1 = vadd.f32 %v7986_v34, %v3907_v24 }
 0xe43   : > { %6147 = vrsqrt.f32 %v3860_v47  ;;  %v3846_v21 = vmul.f32 0.03125, %v3818_v63  ;;  %v3845_v56 = vmul.f32 0.03125, %v3815_v62 }
 0xe44   : > { %6149 = vrsqrt.f32 %v3859_v36  ;;  %v7994_v3 = vadd.f32 %v7986_v34, %v3908_v33  ;;  %v3909_v26 = vmul.f32 %v7976_v38, %v3887_v19 }
 0xe45   : > { %v6142_v52 = vpop.eup %6141  ;;  %v3862_v43 = vadd.f32 1e-05, %v3846_v21  ;;  %v3861_v7 = vadd.f32 1e-05, %v3845_v56 }
 0xe46   : > { %v3888_v23 = vmul.f32 %v6142_v52, %v7889_v17  ;;  %v3824_v59 = vpop.xlane.xlu1 %3823  ;;  %v3821_v60 = vpop.xlane.xlu0 %3820  ;;  %v3945_v44 = vpack.c.bf16 %v7994_v3, %v7991_v1  ;;  %v8003_v50 = vadd.f32 %v7986_v34, %v3909_v26 }
 0xe47   : > { %6151 = vrsqrt.f32 %v3862_v43  ;;  %v3848_v39 = vmul.f32 0.03125, %v3824_v59  ;;  %v3847_v40 = vmul.f32 0.03125, %v3821_v60 }
 0xe48   : > { %v3910_v55 = vmul.f32 %v7976_v38, %v3888_v23  ;;  %6153 = vrsqrt.f32 %v3861_v7  ;;  %5604 = vmatprep.mubr.msk.bf16.mxu0 %vm1085_vm1, %v3945_v44 }
 0xe49   : > { %v6144_v42 = vpop.eup %6143  ;;  %v3864_v49 = vadd.f32 1e-05, %v3848_v39  ;;  %v3863_v18 = vadd.f32 1e-05, %v3847_v40 }
 0xe4a   : > { %v6146_v16 = vpop.eup %6145  ;;  %v8006_v17 = vadd.f32 %v7986_v34, %v3910_v55  ;;  %v3890_v46 = vmul.f32 %v6144_v42, %v7893_v0 }
 0xe4b   : > { %v3889_v5 = vmul.f32 %v6146_v16, %v7898_v41  ;;  %6155 = vrsqrt.f32 %v3864_v49 }
 0xe4c   : > { %6157 = vrsqrt.f32 %v3863_v18  ;;  %v3946_v13 = vpack.c.bf16 %v8006_v17, %v8003_v50  ;;  %v3912_v14 = vmul.f32 %v7976_v38, %v3890_v46 }
 0xe4d   : > { %v6148_v32 = vpop.eup %6147  ;;  %v3911_v2 = vmul.f32 %v7976_v38, %v3889_v5 }
 0xe4e   : > { %v6150_v48 = vpop.eup %6149  ;;  %v3892_v25 = vmul.f32 %v6148_v32, %v7904_v20  ;;  %5605 = vmatmul.mubr.msk.bf16.vlgmr.msra.gmra.mrb[96].mxu0 %vm1085_vm1, %v3946_v13  ;;  %v8017_v61 = vadd.f32 %v7986_v34, %v3912_v14 }
 0xe4f   : > { %v3891_v0 = vmul.f32 %v6150_v48, %v7910_v9  ;;  %v8021_v41 = vadd.f32 %v7986_v34, %v3911_v2 }
 0xe50   : > { %v3914_v30 = vmul.f32 %v7976_v38, %v3892_v25  ;;  %v5877_v25 = vld [vmem:[%s6489_s2 + $0x10] sm:$0xff]  }
 0xe51   : > { %v6152_v58 = vpop.eup %6151  ;;  %v3947_v45 = vpack.c.bf16 %v8017_v61, %v8021_v41  ;;  %v3913_v15 = vmul.f32 %v7976_v38, %v3891_v0  ;;  %5624 = vmatprep.subr.bf16.mxu1 %v5877_v25  ;;  %v5878_v0 = vld [vmem:[%s6489_s2 + $0x18] sm:$0xff]  }
 0xe52   : > { %v6154_v35 = vpop.eup %6153  ;;  %v3894_v20 = vmul.f32 %v6152_v58, %v7916_v53  ;;  %v8029_v28 = vadd.f32 %v7986_v34, %v3914_v30  ;;  %5625 = vmatpush3.bf16.msra.mxu1 %v5877_v25 }
 0xe53   : > { %v3893_v51 = vmul.f32 %v6154_v35, %v7922_v12  ;;  %5608 = vmatprep.mubr.msk.bf16.mxu0 %vm1085_vm1, %v3947_v45  ;;  %v8034_v9 = vadd.f32 %v7986_v34, %v3913_v15  ;;  %5626 = vmatprep.subr.bf16.mxu1 %v5878_v0 }
 0xe54   : > { %v3916_v8 = vmul.f32 %v7976_v38, %v3894_v20 }
 0xe55   : > { %v6156_v6 = vpop.eup %6155  ;;  %v3948_v57 = vpack.c.bf16 %v8029_v28, %v8034_v9  ;;  %v3915_v29 = vmul.f32 %v7976_v38, %v3893_v51 }
 0xe56   : > { %v6158_v4 = vpop.eup %6157  ;;  %v3896_v53 = vmul.f32 %v6156_v6, %v7928_v22  ;;  %v8042_v24 = vadd.f32 %v7986_v34, %v3916_v8  ;;  %5627 = vmatpush3.bf16.msra.mxu1 %v5878_v0 }
 0xe57   : > { %v3895_v12 = vmul.f32 %v6158_v4, %v7933_v37  ;;  %5609 = vmatmul.mubr.msk.bf16.gmra.mrb[100].mxu0 %vm1085_vm1, %v3948_v57  ;;  %v8047_v31 = vadd.f32 %v7986_v34, %v3915_v29 }
 0xe58   : > { %v3918_v47 = vmul.f32 %v7976_v38, %v3896_v53 }
 0xe59   : > { %v3949_v36 = vpack.c.bf16 %v8042_v24, %v8047_v31  ;;  %v3917_v19 = vmul.f32 %v7976_v38, %v3895_v12 }
 0xe5a   : > { %v8054_v63 = vadd.f32 %v7986_v34, %v3918_v47 }
 0xe5b   : > { %5612 = vmatprep.mubr.msk.bf16.mxu0 %vm1085_vm1, %v3949_v36  ;;  %v8058_v22 = vadd.f32 %v7986_v34, %v3917_v19 }
 0xe5d   : > { %v3950_v37 = vpack.c.bf16 %v8054_v63, %v8058_v22 }
 0xe5f   : > { %5613 = vmatmul.mubr.msk.bf16.gmra.mrb[104].mxu0 %vm1085_vm1, %v3950_v37 }
 0xe6a   : > { %v3827_v62 = vpop.xlane.xlu0 %3826 }
 0xe6b   : > { %v3849_v33 = vmul.f32 0.03125, %v3827_v62 }
 0xe6c   : > { %v3830_v21 = vpop.xlane.xlu1 %3829 }
 0xe6d   : > { %v3865_v56 = vadd.f32 1e-05, %v3849_v33  ;;  %v3850_v52 = vmul.f32 0.03125, %v3830_v21 }
 0xe6e   : > { %v3833_v43 = vpop.xlane.xlu0 %3832 }
 0xe6f   : > { %6159 = vrsqrt.f32 %v3865_v56  ;;  %v3866_v7 = vadd.f32 1e-05, %v3850_v52  ;;  %v3851_v26 = vmul.f32 0.03125, %v3833_v43 }
 0xe70   : > { %v3836_v23 = vpop.xlane.xlu1 %3835 }
 0xe71   : > { %6161 = vrsqrt.f32 %v3866_v7  ;;  %v3867_v59 = vadd.f32 1e-05, %v3851_v26  ;;  %v3852_v60 = vmul.f32 0.03125, %v3836_v23 }
 0xe73   : > { %6163 = vrsqrt.f32 %v3867_v59  ;;  %v3868_v44 = vadd.f32 1e-05, %v3852_v60 }
 0xe75   : > { %6165 = vrsqrt.f32 %v3868_v44 }
 0xe79   : > { %v6160_v39 = vpop.eup %6159 }
 0xe7a   : > { %v3897_v40 = vmul.f32 %v6160_v39, %v7946_v27 }
 0xe7b   : > { %v6162_v55 = vpop.eup %6161 }
 0xe7c   : > { %v3898_v42 = vmul.f32 %v6162_v55, %v7949_v11  ;;  %v3919_v49 = vmul.f32 %v7976_v38, %v3897_v40 }
 0xe7d   : > { %v6164_v18 = vpop.eup %6163 }
 0xe7e   : > { %v3899_v16 = vmul.f32 %v6164_v18, %v7954_v54  ;;  %v3920_v46 = vmul.f32 %v7976_v38, %v3898_v42  ;;  %v8070_v14 = vadd.f32 %v7986_v34, %v3919_v49 }
 0xe7f   : > { %v6166_v5 = vpop.eup %6165 }
 0xe80   : > { %v3900_v13 = vmul.f32 %v6166_v5, %v7960_v10  ;;  %v8073_v27 = vadd.f32 %v7986_v34, %v3920_v46  ;;  %v3921_v11 = vmul.f32 %v7976_v38, %v3899_v16 }
 0xe82   : > { %v3951_v32 = vpack.c.bf16 %v8073_v27, %v8070_v14  ;;  %v3922_v54 = vmul.f32 %v7976_v38, %v3900_v13  ;;  %v8080_v2 = vadd.f32 %v7986_v34, %v3921_v11  ;;  %v5026_v38 = vld [vmem:[%s8623_s17] ss:$0 sm:$0xff] }
 0xe84   : > { %5616 = vmatprep.mubr.msk.bf16.mxu0 %vm1085_vm1, %v3951_v32  ;;  %v8084_v10 = vadd.f32 %v7986_v34, %v3922_v54 }
 0xe86   : > { %v3952_v48 = vpack.c.bf16 %v8084_v10, %v8080_v2 }
 0xe88   : > { %5617 = vmatmul.mubr.msk.bf16.gmra.mrb[108].mxu0 %vm1085_vm1, %v3952_v48 }
 0xf21   : > { %v5606_v30 = vpop.f32.mrb[96].mxu0 }
 0xf22   : > { %v4043_v58 = vadd.f32 %v5606_v30, %v5026_v38  ;;  %v4034_v34 = vpop.f32.mrb[97].mxu0 }
 0xf23   : > { %v4035_v45 = vadd.f32 %v5026_v38, %v4034_v34  ;;  %v5607_v15 = vpop.f32.mrb[98].mxu0 }
 0xf24   : > { %v4046_v35 = vadd.f32 %v5607_v15, %v5026_v38  ;;  %v4037_v20 = vpop.f32.mrb[99].mxu0  ;;  %v4099_v8 = vmax.f32 %v4043_v58, 0.0 }
 0xf25   : > { %v4038_v51 = vadd.f32 %v5026_v38, %v4037_v20  ;;  %v4097_v57 = vmax.f32 %v4035_v45, 0.0 }
 0xf26   : > { %v4100_v6 = vmax.f32 %v4046_v35, 0.0 }
 0xf27   : > { %v4098_v29 = vmax.f32 %v4038_v51, 0.0 }
 0xf28   : > { %v4114_v4 = vpack.c.bf16 %v4100_v6, %v4099_v8  ;;  %v8109_v6 = vld [vmem:[%s945_s16] ss:$0 sm:$0xff] }
 0xf29   : > { %v4113_v53 = vpack.c.bf16 %v4098_v29, %v4097_v57 }
 0xf2a   : > { %v5610_v12 = vpop.f32.mrb[100].mxu0 }
 0xf2b   : > { %v4059_v47 = vadd.f32 %v5610_v12, %v5026_v38  ;;  %v4050_v36 = vpop.f32.mrb[101].mxu0  ;;  %5628 = vmatprep.mubr.msk.bf16.mxu1 %vm4160_vm5, %v4113_v53 }
 0xf2c   : > { %v4051_v19 = vadd.f32 %v5026_v38, %v4050_v36  ;;  %v5611_v37 = vpop.f32.mrb[102].mxu0  ;;  %5629 = vmatmul.mubr.msk.bf16.vlgmr.msra.gmra.mrb[96].mxu1 %vm4160_vm5, %v4114_v4 }
 0xf2d   : > { %v4062_v62 = vadd.f32 %v5611_v37, %v5026_v38  ;;  %v4053_v33 = vpop.f32.mrb[103].mxu0  ;;  %v4103_v56 = vmax.f32 %v4059_v47, 0.0 }
 0xf2e   : > { %v4054_v21 = vadd.f32 %v5026_v38, %v4053_v33  ;;  %v4101_v43 = vmax.f32 %v4051_v19, 0.0 }
 0xf2f   : > { %v4104_v52 = vmax.f32 %v4062_v62, 0.0 }
 0xf30   : > { %v4102_v7 = vmax.f32 %v4054_v21, 0.0 }
 0xf31   : > { %v4116_v26 = vpack.c.bf16 %v4104_v52, %v4103_v56 }
 0xf32   : > { %v4115_v23 = vpack.c.bf16 %v4102_v7, %v4101_v43  ;;  %v5614_v59 = vpop.f32.mrb[104].mxu0 }
 0xf33   : > { %v4075_v60 = vadd.f32 %v5614_v59, %v5026_v38  ;;  %v4066_v44 = vpop.f32.mrb[105].mxu0 }
 0xf34   : > { %v4067_v39 = vadd.f32 %v5026_v38, %v4066_v44  ;;  %v5615_v40 = vpop.f32.mrb[106].mxu0  ;;  %5632 = vmatprep.mubr.msk.bf16.mxu1 %vm4160_vm5, %v4115_v23 }
 0xf35   : > { %v4078_v55 = vadd.f32 %v5615_v40, %v5026_v38  ;;  %v4069_v42 = vpop.f32.mrb[107].mxu0  ;;  %5633 = vmatmul.mubr.msk.bf16.gmra.mrb[100].mxu1 %vm4160_vm5, %v4116_v26  ;;  %v4107_v18 = vmax.f32 %v4075_v60, 0.0 }
 0xf36   : > { %v4070_v49 = vadd.f32 %v5026_v38, %v4069_v42  ;;  %v4105_v46 = vmax.f32 %v4067_v39, 0.0 }
 0xf37   : > { %v4108_v16 = vmax.f32 %v4078_v55, 0.0 }
 0xf38   : > { %v4106_v5 = vmax.f32 %v4070_v49, 0.0 }
 0xf39   : > { %v4118_v13 = vpack.c.bf16 %v4108_v16, %v4107_v18 }
 0xf3a   : > { %v4117_v11 = vpack.c.bf16 %v4106_v5, %v4105_v46 }
 0xf3c   : > { %5636 = vmatprep.mubr.msk.bf16.mxu1 %vm4160_vm5, %v4117_v11 }
 0xf3d   : > { %5637 = vmatmul.mubr.msk.bf16.gmra.mrb[104].mxu1 %vm4160_vm5, %v4118_v13 }
 0xf5b   : > { %v5618_v32 = vpop.f32.mrb[108].mxu0 }
 0xf5c   : > { %v4091_v54 = vadd.f32 %v5618_v32, %v5026_v38  ;;  %v4082_v48 = vpop.f32.mrb[109].mxu0 }
 0xf5d   : > { %v4083_v25 = vadd.f32 %v5026_v38, %v4082_v48  ;;  %v5619_v0 = vpop.f32.mrb[110].mxu0 }
 0xf5e   : > { %v4094_v30 = vadd.f32 %v5619_v0, %v5026_v38  ;;  %v4085_v58 = vpop.f32.mrb[111].mxu0  ;;  %v4111_v45 = vmax.f32 %v4091_v54, 0.0 }
 0xf5f   : > { %v4086_v34 = vadd.f32 %v5026_v38, %v4085_v58  ;;  %v4109_v35 = vmax.f32 %v4083_v25, 0.0 }
 0xf60   : > { %v4112_v15 = vmax.f32 %v4094_v30, 0.0 }
 0xf61   : > { %v4110_v20 = vmax.f32 %v4086_v34, 0.0 }
 0xf62   : > { %v4120_v51 = vpack.c.bf16 %v4112_v15, %v4111_v45 }
 0xf63   : > { %v4119_v8 = vpack.c.bf16 %v4110_v20, %v4109_v35 }
 0xf65   : > { %5640 = vmatprep.mubr.msk.bf16.mxu1 %vm4160_vm5, %v4119_v8 }
 0xf66   : > { %5641 = vmatmul.mubr.msk.bf16.gmra.mrb[108].mxu1 %vm4160_vm5, %v4120_v51 }
 0xfff   : > { %v5630_v57 = vpop.f32.mrb[96].mxu1 }
0x1000   : > { %v4228_v29 = vadd.f32 %v5630_v57, %v8109_v6  ;;  %v4219_v38 = vpop.f32.mrb[97].mxu1 }
0x1001   : > { %v4220_v4 = vadd.f32 %v8109_v6, %v4219_v38  ;;  %v5631_v53 = vpop.f32.mrb[98].mxu1 }
0x1002   : > { %v8114_v12 = vadd.f32 %v4228_v29, %v8003_v50  ;;  %v4231_v47 = vadd.f32 %v5631_v53, %v8109_v6  ;;  %v4222_v36 = vpop.f32.mrb[99].mxu1 }
0x1003   : > { %v4223_v19 = vadd.f32 %v8109_v6, %v4222_v36  ;;  %v8119_v37 = vadd.f32 %v4220_v4, %v7991_v1 }
0x1004   : > { %v8122_v62 = vadd.f32 %v4231_v47, %v8006_v17  ;;  %v4306_v33 = vsel %vm1085_vm1, %v8114_v12, 0.0 }
0x1005   : > { %4307 = vadd.xlane.f32.xlu0 %v4306_v33  ;;  %v8127_v21 = vadd.f32 %v4223_v19, %v7994_v3  ;;  %v4300_v52 = vsel %vm1085_vm1, %v8119_v37, 0.0 }
0x1006   : > { %v4309_v50 = vsel %vm1085_vm1, %v8122_v62, 0.0 }
0x1007   : > { %4310 = vadd.xlane.f32.xlu1 %v4309_v50  ;;  %v4303_v26 = vsel %vm1085_vm1, %v8127_v21, 0.0 }
0x1008   : > { %v5634_v56 = vpop.f32.mrb[100].mxu1 }
0x1009   : > { %v4244_v1 = vadd.f32 %v5634_v56, %v8109_v6  ;;  %v4235_v43 = vpop.f32.mrb[101].mxu1  ;;  %4301 = vadd.xlane.f32.xlu0 %v4300_v52 }
0x100a   : > { %v4236_v17 = vadd.f32 %v8109_v6, %v4235_v43  ;;  %v5635_v7 = vpop.f32.mrb[102].mxu1 }
0x100b   : > { %v8138_v3 = vadd.f32 %v4244_v1, %v8034_v9  ;;  %v4247_v23 = vadd.f32 %v5635_v7, %v8109_v6  ;;  %v4238_v59 = vpop.f32.mrb[103].mxu1  ;;  %4304 = vadd.xlane.f32.xlu1 %v4303_v26 }
0x100c   : > { %v4239_v60 = vadd.f32 %v8109_v6, %v4238_v59  ;;  %v8143_v44 = vadd.f32 %v4236_v17, %v8021_v41 }
0x100d   : > { %v8146_v39 = vadd.f32 %v4247_v23, %v8029_v28  ;;  %v4318_v40 = vsel %vm1085_vm1, %v8138_v3, 0.0 }
0x100e   : > { %4319 = vadd.xlane.f32.xlu0 %v4318_v40  ;;  %v8151_v55 = vadd.f32 %v4239_v60, %v8017_v61  ;;  %v4312_v41 = vsel %vm1085_vm1, %v8143_v44, 0.0 }
0x100f   : > { %v4321_v9 = vsel %vm1085_vm1, %v8146_v39, 0.0 }
0x1010   : > { %4322 = vadd.xlane.f32.xlu1 %v4321_v9  ;;  %v5638_v42 = vpop.f32.mrb[104].mxu1  ;;  %v4315_v13 = vsel %vm1085_vm1, %v8151_v55, 0.0 }
0x1011   : > { %v4260_v49 = vadd.f32 %v5638_v42, %v8109_v6  ;;  %v4251_v18 = vpop.f32.mrb[105].mxu1 }
0x1012   : > { %v4252_v28 = vadd.f32 %v8109_v6, %v4251_v18  ;;  %4313 = vadd.xlane.f32.xlu0 %v4312_v41  ;;  %v5639_v16 = vpop.f32.mrb[106].mxu1 }
0x1013   : > { %v8160_v46 = vadd.f32 %v4260_v49, %v8058_v22  ;;  %v4263_v61 = vadd.f32 %v5639_v16, %v8109_v6  ;;  %v4254_v5 = vpop.f32.mrb[107].mxu1 }
0x1014   : > { %v4255_v11 = vadd.f32 %v8109_v6, %v4254_v5  ;;  %4316 = vadd.xlane.f32.xlu1 %v4315_v13  ;;  %v8167_v32 = vadd.f32 %v4252_v28, %v8047_v31 }
0x1015   : > { %v8170_v54 = vadd.f32 %v4263_v61, %v8054_v63  ;;  %v4330_v48 = vsel %vm1085_vm1, %v8160_v46, 0.0 }
0x1016   : > { %4331 = vadd.xlane.f32.xlu0 %v4330_v48  ;;  %v8175_v22 = vadd.f32 %v4255_v11, %v8042_v24  ;;  %v4324_v0 = vsel %vm1085_vm1, %v8167_v32, 0.0 }
0x1017   : > { %v4333_v25 = vsel %vm1085_vm1, %v8170_v54, 0.0 }
0x1018   : > { %4334 = vadd.xlane.f32.xlu1 %v4333_v25  ;;  %v4327_v31 = vsel %vm1085_vm1, %v8175_v22, 0.0 }
0x101a   : > { %4325 = vadd.xlane.f32.xlu0 %v4324_v0 }
0x101c   : > { %4328 = vadd.xlane.f32.xlu1 %v4327_v31 }
0x1039   : > { %v5642_v63 = vpop.f32.mrb[108].mxu1 }
0x103a   : > { %v4267_v30 = vpop.f32.mrb[109].mxu1  ;;  %v4276_v58 = vadd.f32 %v5642_v63, %v8109_v6 }
0x103b   : > { %v4268_v34 = vadd.f32 %v8109_v6, %v4267_v30  ;;  %v5643_v24 = vpop.f32.mrb[110].mxu1 }
0x103c   : > { %v4279_v45 = vadd.f32 %v5643_v24, %v8109_v6  ;;  %v4270_v15 = vpop.f32.mrb[111].mxu1  ;;  %v8191_v51 = vadd.f32 %v4276_v58, %v8080_v2 }
0x103d   : > { %v8187_v35 = vadd.f32 %v4268_v34, %v8070_v14  ;;  %v4271_v20 = vadd.f32 %v8109_v6, %v4270_v15 }
0x103e   : > { %v8199_v29 = vadd.f32 %v4279_v45, %v8084_v10  ;;  %v4342_v14 = vsel %vm1085_vm1, %v8191_v51, 0.0 }
0x103f   : > { %v8194_v8 = vadd.f32 %v4271_v20, %v8073_v27  ;;  %v4336_v57 = vsel %vm1085_vm1, %v8187_v35, 0.0 }
0x1040   : > { %4337 = vadd.xlane.f32.xlu0 %v4336_v57  ;;  %v4345_v2 = vsel %vm1085_vm1, %v8199_v29, 0.0 }
0x1041   : > { %v4339_v38 = vsel %vm1085_vm1, %v8194_v8, 0.0 }
0x1042   : > { %4340 = vadd.xlane.f32.xlu1 %v4339_v38 }
0x1044   : > { %4343 = vadd.xlane.f32.xlu0 %v4342_v14 }
0x1046   : > { %4346 = vadd.xlane.f32.xlu1 %v4345_v2 }
0x1092   : > { %v4308_v27 = vpop.xlane.xlu0 %4307 }
0x1093   : > { %v4350_v6 = vmul.f32 0.03125, %v4308_v27 }
0x1094   : > { %v4311_v4 = vpop.xlane.xlu1 %4310 }
0x1095   : > { %v8208_v53 = vsub.f32 %v8114_v12, %v4350_v6  ;;  %v4351_v10 = vmul.f32 0.03125, %v4311_v4 }
0x1096   : > { %v4302_v47 = vpop.xlane.xlu0 %4301 }
0x1097   : > { %v8211_v36 = vsub.f32 %v8122_v62, %v4351_v10  ;;  %v4348_v19 = vmul.f32 0.03125, %v4302_v47  ;;  %v4382_v33 = vmul.f32 %v8208_v53, %v8208_v53 }
0x1098   : > { %v4305_v50 = vpop.xlane.xlu1 %4304 }
0x1099   : > { %v8216_v56 = vsub.f32 %v8119_v37, %v4348_v19  ;;  %v4349_v52 = vmul.f32 0.03125, %v4305_v50  ;;  %v4402_v1 = vsel %vm1085_vm1, %v4382_v33, 0.0  ;;  %v4383_v12 = vmul.f32 %v8211_v36, %v8211_v36 }
0x109a   : > { %4403 = vadd.xlane.f32.xlu0 %v4402_v1 }
0x109b   : > { %v8222_v43 = vsub.f32 %v8127_v21, %v4349_v52  ;;  %v4320_v62 = vpop.xlane.xlu0 %4319  ;;  %v4405_v17 = vsel %vm1085_vm1, %v4383_v12, 0.0  ;;  %v4380_v7 = vmul.f32 %v8216_v56, %v8216_v56 }
0x109c   : > { %v4354_v26 = vmul.f32 0.03125, %v4320_v62  ;;  %4406 = vadd.xlane.f32.xlu1 %v4405_v17 }
0x109d   : > { %v4323_v37 = vpop.xlane.xlu1 %4322  ;;  %v4396_v23 = vsel %vm1085_vm1, %v4380_v7, 0.0  ;;  %v4381_v59 = vmul.f32 %v8222_v43, %v8222_v43 }
0x109e   : > { %v8231_v60 = vsub.f32 %v8138_v3, %v4354_v26  ;;  %v4355_v40 = vmul.f32 0.03125, %v4323_v37  ;;  %4397 = vadd.xlane.f32.xlu0 %v4396_v23 }
0x109f   : > { %v4314_v21 = vpop.xlane.xlu0 %4313  ;;  %v4399_v9 = vsel %vm1085_vm1, %v4381_v59, 0.0 }
0x10a0   : > { %v8235_v42 = vsub.f32 %v8146_v39, %v4355_v40  ;;  %v4352_v49 = vmul.f32 0.03125, %v4314_v21  ;;  %4400 = vadd.xlane.f32.xlu1 %v4399_v9  ;;  %v4386_v18 = vmul.f32 %v8231_v60, %v8231_v60 }
0x10a1   : > { %v4317_v41 = vpop.xlane.xlu1 %4316 }
0x10a2   : > { %v8240_v28 = vsub.f32 %v8143_v44, %v4352_v49  ;;  %v4353_v16 = vmul.f32 0.03125, %v4317_v41  ;;  %v4414_v3 = vsel %vm1085_vm1, %v4386_v18, 0.0  ;;  %v4387_v61 = vmul.f32 %v8235_v42, %v8235_v42 }
0x10a3   : > { %4415 = vadd.xlane.f32.xlu0 %v4414_v3  ;;  %v4332_v5 = vpop.xlane.xlu0 %4331 }
0x10a4   : > { %v8246_v39 = vsub.f32 %v8151_v55, %v4353_v16  ;;  %v4358_v13 = vmul.f32 0.03125, %v4332_v5  ;;  %v4417_v11 = vsel %vm1085_vm1, %v4387_v61, 0.0  ;;  %v4384_v48 = vmul.f32 %v8240_v28, %v8240_v28 }
0x10a5   : > { %v4335_v25 = vpop.xlane.xlu1 %4334  ;;  %4418 = vadd.xlane.f32.xlu1 %v4417_v11 }
0x10a6   : > { %v8252_v44 = vsub.f32 %v8160_v46, %v4358_v13  ;;  %v4359_v0 = vmul.f32 0.03125, %v4335_v25  ;;  %v4408_v31 = vsel %vm1085_vm1, %v4384_v48, 0.0  ;;  %v4385_v63 = vmul.f32 %v8246_v39, %v8246_v39 }
0x10a7   : > { %4409 = vadd.xlane.f32.xlu0 %v4408_v31  ;;  %v4326_v55 = vpop.xlane.xlu0 %4325 }
0x10a8   : > { %v8258_v30 = vsub.f32 %v8170_v54, %v4359_v0  ;;  %v4356_v58 = vmul.f32 0.03125, %v4326_v55  ;;  %v4411_v34 = vsel %vm1085_vm1, %v4385_v63, 0.0  ;;  %v4390_v24 = vmul.f32 %v8252_v44, %v8252_v44 }
0x10a9   : > { %v4329_v45 = vpop.xlane.xlu1 %4328  ;;  %4412 = vadd.xlane.f32.xlu1 %v4411_v34  ;;  %v8308_v34 = vld [vmem:[%s948_s6] ss:$0 sm:$0xff] }
0x10aa   : > { %v8264_v46 = vsub.f32 %v8167_v32, %v4356_v58  ;;  %v4357_v15 = vmul.f32 0.03125, %v4329_v45  ;;  %v4426_v20 = vsel %vm1085_vm1, %v4390_v24, 0.0  ;;  %v4391_v57 = vmul.f32 %v8258_v30, %v8258_v30 }
0x10ab   : > { %4427 = vadd.xlane.f32.xlu0 %v4426_v20 }
0x10ac   : > { %v8270_v54 = vsub.f32 %v8175_v22, %v4357_v15  ;;  %v4429_v38 = vsel %vm1085_vm1, %v4391_v57, 0.0  ;;  %v4388_v14 = vmul.f32 %v8264_v46, %v8264_v46 }
0x10ad   : > { %4430 = vadd.xlane.f32.xlu1 %v4429_v38  ;;  %v8316_v38 = vld [vmem:[%s951_s11] ss:$0 sm:$0xff]  ;;  %s8626_s11 = sld [smem:[#allocation3_spill]] }
0x10ae   : > { %v4420_v2 = vsel %vm1085_vm1, %v4388_v14, 0.0  ;;  %v4389_v32 = vmul.f32 %v8270_v54, %v8270_v54 }
0x10af   : > { %4421 = vadd.xlane.f32.xlu0 %v4420_v2 }
0x10b0   : > { %v4423_v27 = vsel %vm1085_vm1, %v4389_v32, 0.0 }
0x10b1   : > { %4424 = vadd.xlane.f32.xlu1 %v4423_v27 }
0x10b3   : > { %p5052_p8 = scmp.ne.s32.totalorder %s8626_s11, 1 }
0x10b4   : > { %vm6263_vm6 = vmmov (!%p5052_p8), 0   ;;  %s8628_s5 = sld [smem:[#allocation47_spill]] (!%p5052_p8)  ;;  %s8629_s26 = sld [smem:[#allocation49_spill]] (!%p5052_p8) }
0x10cd   : > { %v4338_v6 = vpop.xlane.xlu0 %4337 }
0x10ce   : > { %v4360_v4 = vmul.f32 0.03125, %v4338_v6 }
0x10cf   : > { %v4341_v10 = vpop.xlane.xlu1 %4340 }
0x10d0   : > { %v8280_v22 = vsub.f32 %v8187_v35, %v4360_v4  ;;  %v4361_v47 = vmul.f32 0.03125, %v4341_v10 }
0x10d1   : > { %v4344_v19 = vpop.xlane.xlu0 %4343 }
0x10d2   : > { %v8283_v33 = vsub.f32 %v8194_v8, %v4361_v47  ;;  %v4362_v50 = vmul.f32 0.03125, %v4344_v19  ;;  %v4392_v52 = vmul.f32 %v8280_v22, %v8280_v22 }
0x10d3   : > { %v4347_v1 = vpop.xlane.xlu1 %4346 }
0x10d4   : > { %v8288_v12 = vsub.f32 %v8191_v51, %v4362_v50  ;;  %v4363_v62 = vmul.f32 0.03125, %v4347_v1  ;;  %v4432_v17 = vsel %vm1085_vm1, %v4392_v52, 0.0  ;;  %v4393_v35 = vmul.f32 %v8283_v33, %v8283_v33 }
0x10d5   : > { %4433 = vadd.xlane.f32.xlu0 %v4432_v17 }
0x10d6   : > { %v8294_v7 = vsub.f32 %v8199_v29, %v4363_v62  ;;  %v4435_v8 = vsel %vm1085_vm1, %v4393_v35, 0.0  ;;  %v4394_v26 = vmul.f32 %v8288_v12, %v8288_v12 }
0x10d7   : > { %4436 = vadd.xlane.f32.xlu1 %v4435_v8 }
0x10d8   : > { %v4438_v37 = vsel %vm1085_vm1, %v4394_v26, 0.0  ;;  %v4395_v51 = vmul.f32 %v8294_v7, %v8294_v7 }
0x10d9   : > { %4439 = vadd.xlane.f32.xlu0 %v4438_v37 }
0x10da   : > { %v4441_v23 = vsel %vm1085_vm1, %v4395_v51, 0.0 }
0x10db   : > { %4442 = vadd.xlane.f32.xlu1 %v4441_v23 }
0x1127   : > { %v4404_v59 = vpop.xlane.xlu0 %4403 }
0x1128   : > { %v4446_v40 = vmul.f32 0.03125, %v4404_v59 }
0x1129   : > { %v4407_v21 = vpop.xlane.xlu1 %4406 }
0x112a   : > { %v4462_v29 = vadd.f32 1e-05, %v4446_v40  ;;  %v4447_v9 = vmul.f32 0.03125, %v4407_v21 }
0x112b   : > { %v4398_v49 = vpop.xlane.xlu0 %4397 }
0x112c   : > { %6167 = vrsqrt.f32 %v4462_v29  ;;  %v4463_v18 = vadd.f32 1e-05, %v4447_v9  ;;  %v4444_v41 = vmul.f32 0.03125, %v4398_v49 }
0x112d   : > { %v4401_v16 = vpop.xlane.xlu1 %4400 }
0x112e   : > { %6169 = vrsqrt.f32 %v4463_v18  ;;  %v4460_v3 = vadd.f32 1e-05, %v4444_v41  ;;  %v4445_v61 = vmul.f32 0.03125, %v4401_v16 }
0x1130   : > { %6171 = vrsqrt.f32 %v4460_v3  ;;  %v4461_v5 = vadd.f32 1e-05, %v4445_v61  ;;  %v4416_v13 = vpop.xlane.xlu0 %4415 }
0x1131   : > { %v4450_v11 = vmul.f32 0.03125, %v4416_v13 }
0x1132   : > { %6173 = vrsqrt.f32 %v4461_v5  ;;  %v4419_v48 = vpop.xlane.xlu1 %4418 }
0x1133   : > { %v4466_v25 = vadd.f32 1e-05, %v4450_v11  ;;  %v4451_v0 = vmul.f32 0.03125, %v4419_v48 }
0x1134   : > { %v4410_v31 = vpop.xlane.xlu0 %4409 }
0x1135   : > { %6175 = vrsqrt.f32 %v4466_v25  ;;  %v4467_v63 = vadd.f32 1e-05, %v4451_v0  ;;  %v4448_v55 = vmul.f32 0.03125, %v4410_v31 }
0x1136   : > { %v6168_v58 = vpop.eup %6167  ;;  %v4413_v24 = vpop.xlane.xlu1 %4412 }
0x1137   : > { %v4494_v45 = vmul.f32 %v6168_v58, %v8208_v53  ;;  %6177 = vrsqrt.f32 %v4467_v63  ;;  %v4464_v15 = vadd.f32 1e-05, %v4448_v55  ;;  %v4449_v20 = vmul.f32 0.03125, %v4413_v24 }
0x1138   : > { %v6170_v57 = vpop.eup %6169  ;;  %v4428_v14 = vpop.xlane.xlu0 %4427 }
0x1139   : > { %v4516_v2 = vmul.f32 %v8308_v34, %v4494_v45  ;;  %v4495_v32 = vmul.f32 %v6170_v57, %v8211_v36  ;;  %6179 = vrsqrt.f32 %v4464_v15  ;;  %v4465_v27 = vadd.f32 1e-05, %v4449_v20 }
0x113a   : > { %v6172_v6 = vpop.eup %6171  ;;  %v4454_v53 = vmul.f32 0.03125, %v4428_v14  ;;  %v4431_v4 = vpop.xlane.xlu1 %4430 }
0x113b   : > { %v8321_v10 = vadd.f32 %v8316_v38, %v4516_v2  ;;  %v4517_v47 = vmul.f32 %v8308_v34, %v4495_v32  ;;  %v4492_v19 = vmul.f32 %v6172_v6, %v8216_v56  ;;  %6181 = vrsqrt.f32 %v4465_v27 }
0x113c   : > { %v6174_v50 = vpop.eup %6173  ;;  %v4470_v52 = vadd.f32 1e-05, %v4454_v53  ;;  %v4455_v1 = vmul.f32 0.03125, %v4431_v4  ;;  %v4422_v62 = vpop.xlane.xlu0 %4421 }
0x113d   : > { %4554 = vst.msk [vmem:[%s6506_s13 + $0x10] sm:$0xff] %vm1085_vm1, %v8321_v10  ;;  %v8329_v36 = vadd.f32 %v8316_v38, %v4517_v47  ;;  %v4514_v17 = vmul.f32 %v8308_v34, %v4492_v19  ;;  %v4493_v35 = vmul.f32 %v6174_v50, %v8222_v43  ;;  %v4452_v8 = vmul.f32 0.03125, %v4422_v62 }
0x113e   : > { %6183 = vrsqrt.f32 %v4470_v52  ;;  %v4471_v26 = vadd.f32 1e-05, %v4455_v1  ;;  %v4425_v56 = vpop.xlane.xlu1 %4424 }
0x113f   : > { %v6176_v37 = vpop.eup %6175  ;;  %4555 = vst.msk [vmem:[%s6506_s13 + $0x18] sm:$0xff] %vm1085_vm1, %v8329_v36  ;;  %v8337_v51 = vadd.f32 %v8316_v38, %v4514_v17  ;;  %v4515_v23 = vmul.f32 %v8308_v34, %v4493_v35  ;;  %v4468_v59 = vadd.f32 1e-05, %v4452_v8  ;;  %v4453_v40 = vmul.f32 0.03125, %v4425_v56 }
0x1140   : > { %v4498_v21 = vmul.f32 %v6176_v37, %v8231_v60  ;;  %6185 = vrsqrt.f32 %v4471_v26 }
0x1141   : > { %v6178_v43 = vpop.eup %6177  ;;  %4552 = vst.msk [vmem:[%s6506_s13] sm:$0xff] %vm1085_vm1, %v8337_v51  ;;  %v8345_v29 = vadd.f32 %v8316_v38, %v4515_v23  ;;  %6187 = vrsqrt.f32 %v4468_v59  ;;  %v4469_v9 = vadd.f32 1e-05, %v4453_v40 }
0x1142   : > { %v4520_v49 = vmul.f32 %v8308_v34, %v4498_v21  ;;  %v4499_v18 = vmul.f32 %v6178_v43, %v8235_v42 }
0x1143   : > { %v6180_v41 = vpop.eup %6179  ;;  %4553 = vst.msk [vmem:[%s6506_s13 + $0x8] sm:$0xff] %vm1085_vm1, %v8345_v29  ;;  %6189 = vrsqrt.f32 %v4469_v9 }
0x1144   : > { %v8353_v60 = vadd.f32 %v8316_v38, %v4520_v49  ;;  %v4521_v16 = vmul.f32 %v8308_v34, %v4499_v18  ;;  %v4496_v3 = vmul.f32 %v6180_v41, %v8240_v28  ;;  %v6262_v18 = vmov (!%p5052_p8), 0.0   ;;  %v4581_v41 = vld [vmem:[#allocation2] sm:$0x1] (!%p5052_p8) }
0x1145   : > { %v6182_v61 = vpop.eup %6181  ;;  %5644 = vmatprep.subr.bf16.mxu0 (!%p5052_p8), %v6262_v18  ;;  %5660 = vmatprep.mubr.msk.bf16.mxu0 (!%p5052_p8), %vm6263_vm6, %v6262_v18 }
0x1146   : > { %4558 = vst.msk [vmem:[%s6506_s13 + $0x30] sm:$0xff] %vm1085_vm1, %v8353_v60  ;;  %v8361_v42 = vadd.f32 %v8316_v38, %v4521_v16  ;;  %v4518_v5 = vmul.f32 %v8308_v34, %v4496_v3  ;;  %v4497_v13 = vmul.f32 %v6182_v61, %v8246_v39 }
0x1148   : > { %v6184_v11 = vpop.eup %6183  ;;  %4559 = vst.msk [vmem:[%s6506_s13 + $0x38] sm:$0xff] %vm1085_vm1, %v8361_v42  ;;  %v8369_v48 = vadd.f32 %v8316_v38, %v4518_v5  ;;  %v4519_v28 = vmul.f32 %v8308_v34, %v4497_v13  ;;  %v4576_v3 = vpack.c.bf16 (!%p5052_p8), %v8361_v42, %v8353_v60 }
0x1149   : > { %v4502_v25 = vmul.f32 %v6184_v11, %v8252_v44 }
0x114a   : > { %v6186_v0 = vpop.eup %6185  ;;  %4556 = vst.msk [vmem:[%s6506_s13 + $0x20] sm:$0xff] %vm1085_vm1, %v8369_v48  ;;  %v8377_v31 = vadd.f32 %v8316_v38, %v4519_v28  ;;  %v4572_v28 = vld [vmem:[%s8628_s5] sm:$0x1] (!%p5052_p8) }
0x114b   : > { %v6188_v39 = vpop.eup %6187  ;;  %v4524_v63 = vmul.f32 %v8308_v34, %v4502_v25  ;;  %v4503_v55 = vmul.f32 %v6186_v0, %v8258_v30  ;;  %v4587_v25 = vlaneseq (!%p5052_p8) }
0x114c   : > { %4557 = vst.msk [vmem:[%s6506_s13 + $0x28] sm:$0xff] %vm1085_vm1, %v8377_v31  ;;  %v4500_v44 = vmul.f32 %v6188_v39, %v8264_v46 }
0x114d   : > { %v6190_v58 = vpop.eup %6189  ;;  %v8386_v24 = vadd.f32 %v8316_v38, %v4524_v63  ;;  %v4525_v45 = vmul.f32 %v8308_v34, %v4503_v55  ;;  %v4588_v0 = vshrl.u32 (!%p5052_p8), %v4587_v25, 7 }
0x114e   : > { %v4522_v15 = vmul.f32 %v8308_v34, %v4500_v44  ;;  %v4501_v20 = vmul.f32 %v6190_v58, %v8270_v54 }
0x114f   : > { %4562 = vst.msk [vmem:[%s6506_s13 + $0x50] sm:$0xff] %vm1085_vm1, %v8386_v24  ;;  %v8395_v30 = vadd.f32 %v8316_v38, %v4525_v45 }
0x1150   : > { %v8398_v57 = vadd.f32 %v8316_v38, %v4522_v15  ;;  %v4523_v46 = vmul.f32 %v8308_v34, %v4501_v20 }
0x1151   : > { %4563 = vst.msk [vmem:[%s6506_s13 + $0x58] sm:$0xff] %vm1085_vm1, %v8395_v30  ;;  %v4578_v5 = vpack.c.bf16 (!%p5052_p8), %v8395_v30, %v8386_v24 }
0x1152   : > { %4560 = vst.msk [vmem:[%s6506_s13 + $0x40] sm:$0xff] %vm1085_vm1, %v8398_v57  ;;  %v8408_v14 = vadd.f32 %v8316_v38, %v4523_v46 }
0x1153   : > { %v4610_v13 = vsel (!%p5052_p8), %vm1085_vm1, %v4578_v5, 0 }
0x1154   : > { %4561 = vst.msk [vmem:[%s6506_s13 + $0x48] sm:$0xff] %vm1085_vm1, %v8408_v14 }
0x1162   : > { %v4434_v54 = vpop.xlane.xlu0 %4433 }
0x1163   : > { %v4456_v2 = vmul.f32 0.03125, %v4434_v54 }
0x1164   : > { %v4437_v32 = vpop.xlane.xlu1 %4436 }
0x1165   : > { %v4472_v27 = vadd.f32 1e-05, %v4456_v2  ;;  %v4457_v6 = vmul.f32 0.03125, %v4437_v32 }
0x1166   : > { %v4440_v53 = vpop.xlane.xlu0 %4439 }
0x1167   : > { %6191 = vrsqrt.f32 %v4472_v27  ;;  %v4473_v4 = vadd.f32 1e-05, %v4457_v6  ;;  %v4458_v47 = vmul.f32 0.03125, %v4440_v53 }
0x1168   : > { %v4443_v19 = vpop.xlane.xlu1 %4442 }
0x1169   : > { %6193 = vrsqrt.f32 %v4473_v4  ;;  %v4474_v50 = vadd.f32 1e-05, %v4458_v47  ;;  %v4459_v52 = vmul.f32 0.03125, %v4443_v19 }
0x116b   : > { %6195 = vrsqrt.f32 %v4474_v50  ;;  %v4475_v1 = vadd.f32 1e-05, %v4459_v52 }
0x116d   : > { %6197 = vrsqrt.f32 %v4475_v1 }
0x1171   : > { %v6192_v62 = vpop.eup %6191 }
0x1172   : > { %v4504_v17 = vmul.f32 %v6192_v62, %v8280_v22 }
0x1173   : > { %v6194_v35 = vpop.eup %6193 }
0x1174   : > { %v4526_v8 = vmul.f32 %v8308_v34, %v4504_v17  ;;  %v4505_v26 = vmul.f32 %v6194_v35, %v8283_v33 }
0x1175   : > { %v6196_v56 = vpop.eup %6195 }
0x1176   : > { %v4548_v37 = vadd.f32 %v8316_v38, %v4526_v8  ;;  %v4527_v23 = vmul.f32 %v8308_v34, %v4505_v26  ;;  %v4506_v59 = vmul.f32 %v6196_v56, %v8288_v12  ;;  %v4573_v12 = vpack.c.bf16 (!%p5052_p8), %v8345_v29, %v8337_v51 }
0x1177   : > { %v6198_v40 = vpop.eup %6197  ;;  %v4575_v51 = vpack.c.bf16 (!%p5052_p8), %v8377_v31, %v8369_v48  ;;  %v4589_v31 = vsub.s32 (!%p5052_p8), 0, %v4588_v0 }
0x1178   : > { %4564 = vst.msk [vmem:[%s6506_s13 + $0x60] sm:$0xff] %vm1085_vm1, %v4548_v37  ;;  %v4549_v21 = vadd.f32 %v8316_v38, %v4527_v23  ;;  %v4528_v22 = vmul.f32 %v8308_v34, %v4506_v59  ;;  %v4507_v43 = vmul.f32 %v6198_v40, %v8294_v7  ;;  %4571 = sbr.rel (%p5052_p8) target bundleno = 4751 (0x128f), region = 108  ;;  %v4595_v7 = vsel (!%p5052_p8), %vm1085_vm1, %v4573_v12, 0 }
0x1179   : > { %5645 = vmatpush3.bf16.xpose.msra.mxu0 (!%p5052_p8), %v4595_v7  ;;  %v4601_v29 = vsel (!%p5052_p8), %vm1085_vm1, %v4575_v51, 0 }
0x117a   : > { %4565 = vst.msk [vmem:[%s6506_s13 + $0x68] sm:$0xff] %vm1085_vm1, %v4549_v21  ;;  %v4550_v33 = vadd.f32 %v8316_v38, %v4528_v22  ;;  %v4529_v9 = vmul.f32 %v8308_v34, %v4507_v43  ;;  %5646 = vmatprep.subr.bf16.mxu0 (!%p5052_p8), %v6262_v18  ;;  %v4574_v34 = vpack.c.bf16 (!%p5052_p8), %v8329_v36, %v8321_v10  ;;  %v4604_v10 = vsel (!%p5052_p8), %vm1085_vm1, %v4576_v3, 0 }
0x117b   : > { %v4577_v36 = vpack.c.bf16 (!%p5052_p8), %v8408_v14, %v8398_v57  ;;  %v4579_v11 = vpack.c.bf16 (!%p5052_p8), %v4549_v21, %v4548_v37 }
0x117c   : > { %4566 = vst.msk [vmem:[%s6506_s13 + $0x70] sm:$0xff] %vm1085_vm1, %v4550_v33  ;;  %v4551_v49 = vadd.f32 %v8316_v38, %v4529_v9  ;;  %v6264_v38 = vmov (!%p5052_p8), 0   ;;  %v4598_v16 = vsel (!%p5052_p8), %vm1085_vm1, %v4574_v34, 0 }
0x117d   : > { %6215 = vset.pattern.permute.xlu0 (!%p5052_p8), %v6264_v38  ;;  %v4607_v61 = vsel (!%p5052_p8), %vm1085_vm1, %v4577_v36, 0  ;;  %v4613_v60 = vsel (!%p5052_p8), %vm1085_vm1, %v4579_v11, 0 }
0x117e   : > { %4567 = vst.msk [vmem:[%s6506_s13 + $0x78] sm:$0xff] %vm1085_vm1, %v4551_v49  ;;  %4584 = vperm.xlu0 (!%p5052_p8), %6215, %v4581_v41   ;;  %s8627_s13 = sld [smem:[#allocation9_spill]] (!%p5052_p8)  ;;  %v4580_v42 = vpack.c.bf16 (!%p5052_p8), %v4551_v49, %v4550_v33 }
0x1180   : > { %v4616_v48 = vsel %vm1085_vm1, %v4580_v42, 0 }
0x1181   : > { %5647 = vmatpush3.bf16.xpose.msra.mxu0 %v4598_v16 }
0x1182   : > { %5648 = vmatprep.subr.bf16.mxu0 %v6262_v18 }
0x1184   : > { %s8630_s30 = scalar_lea.vmem %s8629_s26, %s8627_s13 }
0x1189   : > { %5649 = vmatpush3.bf16.xpose.msra.mxu0 %v4601_v29 }
0x118a   : > { %5650 = vmatprep.subr.bf16.mxu0 %v6262_v18 }
0x1191   : > { %5651 = vmatpush3.bf16.xpose.msra.mxu0 %v4604_v10 }
0x1192   : > { %5652 = vmatprep.subr.bf16.mxu0 %v6262_v18 }
0x1199   : > { %5653 = vmatpush3.bf16.xpose.msra.mxu0 %v4607_v61 }
0x119a   : > { %5654 = vmatprep.subr.bf16.mxu0 %v6262_v18 }
0x11a1   : > { %5655 = vmatpush3.bf16.xpose.msra.mxu0 %v4610_v13 }
0x11a2   : > { %5656 = vmatprep.subr.bf16.mxu0 %v6262_v18 }
0x11a9   : > { %5657 = vmatpush3.bf16.xpose.msra.mxu0 %v4613_v60 }
0x11aa   : > { %5658 = vmatprep.subr.bf16.mxu0 %v6262_v18 }
0x11b1   : > { %5659 = vmatpush3.bf16.xpose.msra.mxu0 %v4616_v48 }
0x11b8   : > { %5661 = vmatmul.mubr.msk.bf16.vlgmr.msra.gmra.mrb[0].mxu0 %vm1085_vm1, %v4572_v28 }
0x11fd   : > { %v4585_v39 = vpop.permute.xlu0 %4584 }
0x11fe   : > { %v4590_v63 = vrot.slane %v4585_v39, %v4589_v31 }
0x128b   : > { %v4652_v55 = vpop.f32.mrb[0].mxu0 }
0x128c   : > { %v4653_v44 = vadd.f32 %v4652_v55, %v4590_v63  ;;  %v5662_v58 = vpop.f32.mrb[1].mxu0 }
0x128d   : > { %v4655_v24 = vpop.f32.mrb[2].mxu0 }
0x128e   : > { %4658 = vst [vmem:[%s8630_s30] sm:$0x1] %v4653_v44  ;;  %v5663_v45 = vpop.f32.mrb[3].mxu0 }
0x128f PF: > { %s8631_s25 = sld [smem:[#allocation6_spill]]  ;;  %s8632_s26 = sld [smem:[#allocation4_spill]] }
0x1290   : > { %s8633_s27 = sld [smem:[#allocation5_spill]]  ;;  %s8634_s3 = sld [smem:[#allocation7_spill]] }
0x1291   : > { %s8635_s28 = sld [smem:[#allocation8_spill]] }
0x1295   : > { %s34_s29 = sadd.s32 1, %s8631_s25  }
0x1296   : > { %p31_p9 = scmp.ge.s32.totalorder %s34_s29, 6  }
0x1298   :  { %33 = sbr.rel (!%p31_p9) target bundleno = 17 (0x11), region = 201 }

</bundles_post_ra>
